<compile_context>
chip_gen: v5e
topology: v5e:2x2
jax: 0.10.0
libtpu: 0.0.40
codegen_flags: <defaults>
</compile_context>

<pallas_src>
import functools

import jax
import jax.numpy as jnp
from jax import lax
from jax.experimental import pallas as pl
from jax.experimental.pallas import tpu as pltpu


# -----------------------------------------------------------------------------
# Fused kernel: B images per grid step.
# -----------------------------------------------------------------------------
def _bottleneck_fused_kernel(x_ref, s1_ref, b1_ref, w1_ref, b2_ref, w2_ref,
                             out_ref, pad_ref, col_ref):
    """Refs:
    x_ref   : (B, H*W, Cin)         f32   input images (spatial dims flattened)
    s1,b1   : (1, Cin)              f32   folded BN1 scale / bias
    w1_ref  : (Cin, Cmid)           bf16  1x1 conv weight, BN2 scale pre-folded
    b2_ref  : (1, Cmid)             f32   folded BN2 bias
    w2_ref  : (9*Cmid, Cout)        bf16  3x3 conv weight, (kh, kw, ci) major
    out_ref : (B, H*W, Cin+Cout)    f32   [x | conv] channel concat
    pad_ref : (H+2, W+2, Cmid)      bf16  VMEM scratch, zero-padded activation
    col_ref : (B, H, W, 9*Cmid)     bf16  VMEM scratch, im2col patches
    """
    B, HW, Cin = x_ref.shape
    Hp, Wp, Cmid = pad_ref.shape
    H, W = Hp - 2, Wp - 2
    Cout = w2_ref.shape[1]
    Ctot = out_ref.shape[2]

    # --- Stage 1: BN1 + ReLU + 1x1 conv (MXU) + bias2 + ReLU, batched over B ---
    x3 = x_ref[...]                                            # (B, HW, Cin) f32
    xb = x3.reshape(B * HW, Cin)
    h = jnp.maximum(xb * s1_ref[...] + b1_ref[...], 0.0)
    mid = jnp.dot(h.astype(jnp.bfloat16), w1_ref[...],
                  preferred_element_type=jnp.float32)          # (B*HW, Cmid) f32
    act = jnp.maximum(mid + b2_ref[...], 0.0).astype(jnp.bfloat16)
    act4 = act.reshape(B, H, W, Cmid)

    # --- Stage 2: 3x3 conv, padding=1, as a single im2col MXU matmul ----------
    # Re-zero only the 1-element border (~2*(H+W)*Cmid elems), not the whole
    # (H+2)*(W+2)*Cmid scratch; the interior stores below never touch it.
    pad_ref[0:1, :, :] = jnp.zeros((1, Wp, Cmid), jnp.bfloat16)
    pad_ref[H + 1:Hp, :, :] = jnp.zeros((1, Wp, Cmid), jnp.bfloat16)
    pad_ref[:, 0:1, :] = jnp.zeros((Hp, 1, Cmid), jnp.bfloat16)
    pad_ref[:, W + 1:Wp, :] = jnp.zeros((Hp, 1, Cmid), jnp.bfloat16)

    for b in range(B):                                         # static unroll
        pad_ref[1:H + 1, 1:W + 1, :] = act4[b]                 # interior only
        for kh in range(3):
            for kw in range(3):
                t = kh * 3 + kw
                tap = pad_ref[kh:kh + H, kw:kw + W, :]         # (H, W, Cmid)
                col_ref[b, :, :, t * Cmid:(t + 1) * Cmid] = tap

    patches = col_ref[...].reshape(B * HW, 9 * Cmid)           # cheap merge
    conv = jnp.dot(patches, w2_ref[...],
                   preferred_element_type=jnp.float32)         # (B*HW, Cout) f32

    # --- Dense connection: two direct stores, no register-level concat --------
    out_ref[:, :, 0:Cin] = x3
    out_ref[:, :, Cin:Ctot] = conv.reshape(B, HW, Cout).astype(out_ref.dtype)


# -----------------------------------------------------------------------------
# Wrapper
# -----------------------------------------------------------------------------
def bottleneck_block_forward(x, params, eps=1e-5, images_per_step=None):
    """x: (N, H, W, Cin) float32. Returns (N, H, W, Cin + growth_rate)."""
    N, H, W, Cin = x.shape
    (g1, be1, rm1, rv1, w1_oi,            # BN1 params + conv1 weight (Cmid, Cin)
     g2, be2, rm2, rv2, w2_ohw) = params  # BN2 params + conv2 weight (Cout, Cmid, 3, 3)

    Cmid = w1_oi.shape[0]
    Cout = w2_ohw.shape[0]
    Ctot = Cin + Cout
    HW = H * W

    # Fold BN running stats into per-channel scale/bias (tiny glue).
    inv1 = g1 * lax.rsqrt(rv1 + eps)
    scale1 = inv1.reshape(1, Cin)
    bias1 = (be1 - rm1 * inv1).reshape(1, Cin)
    inv2 = g2 * lax.rsqrt(rv2 + eps)
    bias2 = (be2 - rm2 * inv2).reshape(1, Cmid)

    # Conv weights in matmul layout; BN2 scale folded into conv1 columns; bf16 MXU operands.
    w1_mat = (jnp.transpose(w1_oi, (1, 0)) * inv2.reshape(1, Cmid)).astype(jnp.bfloat16)
    w2_mat = (jnp.transpose(w2_ohw, (2, 3, 1, 0))                  # (3,3,Cmid,Cout)
              .reshape(9 * Cmid, Cout).astype(jnp.bfloat16))       # (9*Cmid, Cout)

    # Images per grid step: make M = B*H*W >= 256 so the (256-wide) MXU is filled,
    # while keeping a multi-step "parallel" grid axis for megacore sharding.
    if images_per_step is None:
        images_per_step = max(1, 256 // max(1, HW))
    B = max(1, min(images_per_step, N))
    while N % B != 0:
        B -= 1
    n_steps = N // B

    # Row-major (N,H,W,C) <-> (N,H*W,C) reshapes are free (no data movement).
    x_flat = x.reshape(N, HW, Cin)

    out_flat = pl.pallas_call(
        _bottleneck_fused_kernel,
        out_shape=jax.ShapeDtypeStruct((N, HW, Ctot), jnp.float32),
        grid=(n_steps,),
        in_specs=[
            pl.BlockSpec((B, HW, Cin), lambda n: (n, 0, 0)),
            pl.BlockSpec((1, Cin), lambda n: (0, 0)),
            pl.BlockSpec((1, Cin), lambda n: (0, 0)),
            pl.BlockSpec((Cin, Cmid), lambda n: (0, 0)),
            pl.BlockSpec((1, Cmid), lambda n: (0, 0)),
            pl.BlockSpec((9 * Cmid, Cout), lambda n: (0, 0)),
        ],
        out_specs=pl.BlockSpec((B, HW, Ctot), lambda n: (n, 0, 0)),
        scratch_shapes=[
            pltpu.VMEM((H + 2, W + 2, Cmid), jnp.bfloat16),        # padded activation
            pltpu.VMEM((B, H, W, 9 * Cmid), jnp.bfloat16),         # im2col patches
        ],
        compiler_params=pltpu.CompilerParams(
            dimension_semantics=("parallel",)),
        # TODO(synk): if the surrounding network runs bf16, accept/emit bf16 at
        #             the pallas_call boundary to halve HBM traffic (keep f32
        #             accumulation + BN math as written).
    )(x_flat, scale1, bias1, w1_mat, bias2, w2_mat)

    return out_flat.reshape(N, H, W, Ctot)


# -----------------------------------------------------------------------------
# Pure-JAX reference for validation (f32 throughout).
# -----------------------------------------------------------------------------
def bottleneck_block_reference(x, params, eps=1e-5):
    (g1, be1, rm1, rv1, w1_oi, g2, be2, rm2, rv2, w2_ohw) = params
    Cmid = w1_oi.shape[0]

    h = jnp.maximum((x - rm1) / jnp.sqrt(rv1 + eps) * g1 + be1, 0.0)
    w1_hwio = jnp.transpose(w1_oi, (1, 0)).reshape(1, 1, -1, Cmid)
    mid = lax.conv_general_dilated(h, w1_hwio, (1, 1), "VALID",
                                   dimension_numbers=("NHWC", "HWIO", "NHWC"))
    h2 = jnp.maximum((mid - rm2) / jnp.sqrt(rv2 + eps) * g2 + be2, 0.0)
    w2_hwio = jnp.transpose(w2_ohw, (2, 3, 1, 0))              # (3,3,Cmid,Cout)
    out = lax.conv_general_dilated(h2, w2_hwio, (1, 1), ((1, 1), (1, 1)),
                                   dimension_numbers=("NHWC", "HWIO", "NHWC"))
    return jnp.concatenate([x, out], axis=-1)


# -----------------------------------------------------------------------------
# Deterministic parameter construction (shapes from the module's __init__).
# -----------------------------------------------------------------------------
def init_params(key, in_planes, growth_rate):
    expansion = 4
    cmid = expansion * growth_rate
    ks = jax.random.split(key, 10)
    g1 = 1.0 + 0.1 * jax.random.normal(ks[0], (in_planes,), jnp.float32)
    be1 = 0.1 * jax.random.normal(ks[1], (in_planes,), jnp.float32)
    rm1 = 0.1 * jax.random.normal(ks[2], (in_planes,), jnp.float32)
    rv1 = jax.random.uniform(ks[3], (in_planes,), jnp.float32, 0.5, 1.5)
    w1 = 0.1 * jax.random.normal(ks[4], (cmid, in_planes), jnp.float32)  # conv1 (O,I,1,1) squeezed
    g2 = 1.0 + 0.1 * jax.random.normal(ks[5], (cmid,), jnp.float32)
    be2 = 0.1 * jax.random.normal(ks[6], (cmid,), jnp.float32)
    rm2 = 0.1 * jax.random.normal(ks[7], (cmid,), jnp.float32)
    rv2 = jax.random.uniform(ks[8], (cmid,), jnp.float32, 0.5, 1.5)
    w2 = 0.1 * jax.random.normal(ks[9], (growth_rate, cmid, 3, 3), jnp.float32)
    return (g1, be1, rm1, rv1, w1, g2, be2, rm2, rv2, w2)


if __name__ == "__main__":
    # Small shapes: batch=2, in_planes=4, growth_rate=8, spatial=16x16 (NHWC).
    N, H, W = 2, 16, 16
    in_planes, growth_rate = 4, 8

    key = jax.random.PRNGKey(0)
    kx, kp = jax.random.split(key)
    x = jax.random.normal(kx, (N, H, W, in_planes), jnp.float32)
    params = init_params(kp, in_planes, growth_rate)

    fwd = jax.jit(functools.partial(bottleneck_block_forward, params=params))
    y = jax.block_until_ready(fwd(x))

    y_ref = bottleneck_block_reference(x, params)
    assert y.shape == (N, H, W, in_planes + growth_rate), y.shape
    # bf16 MXU operands (f32 accumulation) -> loosened tolerance vs f32 reference.
    max_err = float(jnp.max(jnp.abs(y - y_ref)))
    assert jnp.allclose(y, y_ref, atol=3e-2, rtol=3e-2), max_err

    print("KERNEL_OK")
</pallas_src>

<mosaic_0001>
module attributes {stable_mosaic.version = 11 : i64} {
  func.func @_bottleneck_fused_kernel(%arg0: i32, %arg1: memref<1x256x4xf32, #tpu.memory_space<vmem>>, %arg2: memref<1x4xf32, #tpu.memory_space<vmem>>, %arg3: memref<1x4xf32, #tpu.memory_space<vmem>>, %arg4: memref<4x32xbf16, #tpu.memory_space<vmem>>, %arg5: memref<1x32xf32, #tpu.memory_space<vmem>>, %arg6: memref<288x8xbf16, #tpu.memory_space<vmem>>, %arg7: memref<1x256x12xf32, #tpu.memory_space<vmem>>, %arg8: memref<18x18x32xbf16, #tpu.memory_space<vmem>>, %arg9: memref<1x16x16x288xbf16, #tpu.memory_space<vmem>>) attributes {dimension_semantics = [#tpu.dimension_semantics<parallel>], iteration_bounds = array<i64: 2>, scalar_prefetch = 0 : i64, scratch_operands = 2 : i64, tpu.core_type = #tpu.core_type<tc>, window_params = [{transform_indices = @transform_0, window_bounds = array<i64: 1, 256, 4>}, {pipeline_mode = #tpu.pipeline_mode<synchronous>, transform_indices = @transform_1, window_bounds = array<i64: 1, 4>}, {pipeline_mode = #tpu.pipeline_mode<synchronous>, transform_indices = @transform_2, window_bounds = array<i64: 1, 4>}, {pipeline_mode = #tpu.pipeline_mode<synchronous>, transform_indices = @transform_3, window_bounds = array<i64: 4, 32>}, {pipeline_mode = #tpu.pipeline_mode<synchronous>, transform_indices = @transform_4, window_bounds = array<i64: 1, 32>}, {pipeline_mode = #tpu.pipeline_mode<synchronous>, transform_indices = @transform_5, window_bounds = array<i64: 288, 8>}, {transform_indices = @transform_6, window_bounds = array<i64: 1, 256, 12>}]} {
    %c0 = arith.constant 0 : index
    %c0_0 = arith.constant 0 : index
    %c0_1 = arith.constant 0 : index
    %0 = vector.load %arg1[%c0, %c0_0, %c0_1] : memref<1x256x4xf32, #tpu.memory_space<vmem>>, vector<1x256x4xf32>
    %1 = vector.shape_cast %0 : vector<1x256x4xf32> to vector<256x4xf32>
    %c0_2 = arith.constant 0 : index
    %c0_3 = arith.constant 0 : index
    %2 = vector.load %arg2[%c0_2, %c0_3] : memref<1x4xf32, #tpu.memory_space<vmem>>, vector<1x4xf32>
    %3 = vector.broadcast %2 : vector<1x4xf32> to vector<256x4xf32>
    %4 = arith.mulf %1, %3 : vector<256x4xf32>
    %c0_4 = arith.constant 0 : index
    %c0_5 = arith.constant 0 : index
    %5 = vector.load %arg3[%c0_4, %c0_5] : memref<1x4xf32, #tpu.memory_space<vmem>>, vector<1x4xf32>
    %6 = vector.broadcast %5 : vector<1x4xf32> to vector<256x4xf32>
    %7 = arith.addf %4, %6 : vector<256x4xf32>
    %cst = arith.constant 0.000000e+00 : f32
    %8 = vector.broadcast %cst : f32 to vector<256x4xf32>
    %9 = arith.maximumf %7, %8 : vector<256x4xf32>
    %10 = arith.truncf %9 : vector<256x4xf32> to vector<256x4xbf16>
    %c0_6 = arith.constant 0 : index
    %c0_7 = arith.constant 0 : index
    %11 = vector.load %arg4[%c0_6, %c0_7] : memref<4x32xbf16, #tpu.memory_space<vmem>>, vector<4x32xbf16>
    %cst_8 = arith.constant dense<0.000000e+00> : vector<256x32xf32>
    %12 = tpu.matmul %10, %11, %cst_8 {dimension_numbers = #tpu.dot_dimension_numbers<[1], [0], [0], [1], [0, 0, 1, 1], [], []>} : vector<256x4xbf16>, vector<4x32xbf16>, vector<256x32xf32> -> vector<256x32xf32>
    %c0_9 = arith.constant 0 : index
    %c0_10 = arith.constant 0 : index
    %13 = vector.load %arg5[%c0_9, %c0_10] : memref<1x32xf32, #tpu.memory_space<vmem>>, vector<1x32xf32>
    %14 = vector.broadcast %13 : vector<1x32xf32> to vector<256x32xf32>
    %15 = arith.addf %12, %14 : vector<256x32xf32>
    %cst_11 = arith.constant 0.000000e+00 : f32
    %16 = vector.broadcast %cst_11 : f32 to vector<256x32xf32>
    %17 = arith.maximumf %15, %16 : vector<256x32xf32>
    %18 = arith.truncf %17 : vector<256x32xf32> to vector<256x32xbf16>
    %19 = vector.shape_cast %18 : vector<256x32xbf16> to vector<1x16x16x32xbf16>
    %cst_12 = arith.constant 0.000000e+00 : bf16
    %20 = vector.broadcast %cst_12 : bf16 to vector<1x18x32xbf16>
    %c0_13 = arith.constant 0 : index
    %c0_14 = arith.constant 0 : index
    %c0_15 = arith.constant 0 : index
    %21 = vector.load %arg8[%c0_13, %c0_14, %c0_15] : memref<18x18x32xbf16, #tpu.memory_space<vmem>>, vector<1x18x32xbf16>
    tpu.vector_store %arg8[%c0_13, %c0_14, %c0_15], %20 {strides = array<i32>} : memref<18x18x32xbf16, #tpu.memory_space<vmem>>, vector<1x18x32xbf16>,
    %cst_16 = arith.constant 0.000000e+00 : bf16
    %22 = vector.broadcast %cst_16 : bf16 to vector<1x18x32xbf16>
    %c17 = arith.constant 17 : index
    %c0_17 = arith.constant 0 : index
    %c0_18 = arith.constant 0 : index
    %23 = vector.load %arg8[%c17, %c0_17, %c0_18] : memref<18x18x32xbf16, #tpu.memory_space<vmem>>, vector<1x18x32xbf16>
    tpu.vector_store %arg8[%c17, %c0_17, %c0_18], %22 {strides = array<i32>} : memref<18x18x32xbf16, #tpu.memory_space<vmem>>, vector<1x18x32xbf16>,
    %cst_19 = arith.constant 0.000000e+00 : bf16
    %24 = vector.broadcast %cst_19 : bf16 to vector<18x1x32xbf16>
    %c0_20 = arith.constant 0 : index
    %c0_21 = arith.constant 0 : index
    %c0_22 = arith.constant 0 : index
    %25 = vector.load %arg8[%c0_20, %c0_21, %c0_22] : memref<18x18x32xbf16, #tpu.memory_space<vmem>>, vector<18x1x32xbf16>
    tpu.vector_store %arg8[%c0_20, %c0_21, %c0_22], %24 {strides = array<i32>} : memref<18x18x32xbf16, #tpu.memory_space<vmem>>, vector<18x1x32xbf16>,
    %cst_23 = arith.constant 0.000000e+00 : bf16
    %26 = vector.broadcast %cst_23 : bf16 to vector<18x1x32xbf16>
    %c0_24 = arith.constant 0 : index
    %c17_25 = arith.constant 17 : index
    %c0_26 = arith.constant 0 : index
    %27 = vector.load %arg8[%c0_24, %c17_25, %c0_26] : memref<18x18x32xbf16, #tpu.memory_space<vmem>>, vector<18x1x32xbf16>
    tpu.vector_store %arg8[%c0_24, %c17_25, %c0_26], %26 {strides = array<i32>} : memref<18x18x32xbf16, #tpu.memory_space<vmem>>, vector<18x1x32xbf16>,
    %28 = vector.shape_cast %19 : vector<1x16x16x32xbf16> to vector<16x16x32xbf16>
    %c1 = arith.constant 1 : index
    %c1_27 = arith.constant 1 : index
    %c0_28 = arith.constant 0 : index
    %29 = vector.load %arg8[%c1, %c1_27, %c0_28] : memref<18x18x32xbf16, #tpu.memory_space<vmem>>, vector<16x16x32xbf16>
    tpu.vector_store %arg8[%c1, %c1_27, %c0_28], %28 {strides = array<i32>} : memref<18x18x32xbf16, #tpu.memory_space<vmem>>, vector<16x16x32xbf16>,
    %c0_29 = arith.constant 0 : index
    %c0_30 = arith.constant 0 : index
    %c0_31 = arith.constant 0 : index
    %30 = vector.load %arg8[%c0_29, %c0_30, %c0_31] : memref<18x18x32xbf16, #tpu.memory_space<vmem>>, vector<16x16x32xbf16>
    %c0_32 = arith.constant 0 : index
    %c0_33 = arith.constant 0 : index
    %c0_34 = arith.constant 0 : index
    %c0_35 = arith.constant 0 : index
    %31 = vector.load %arg9[%c0_32, %c0_33, %c0_34, %c0_35] : memref<1x16x16x288xbf16, #tpu.memory_space<vmem>>, vector<1x16x16x32xbf16>
    %32 = vector.shape_cast %31 : vector<1x16x16x32xbf16> to vector<16x16x32xbf16>
    %33 = vector.shape_cast %30 : vector<16x16x32xbf16> to vector<1x16x16x32xbf16>
    tpu.vector_store %arg9[%c0_32, %c0_33, %c0_34, %c0_35], %33 {strides = array<i32>} : memref<1x16x16x288xbf16, #tpu.memory_space<vmem>>, vector<1x16x16x32xbf16>,
    %c0_36 = arith.constant 0 : index
    %c1_37 = arith.constant 1 : index
    %c0_38 = arith.constant 0 : index
    %34 = vector.load %arg8[%c0_36, %c1_37, %c0_38] : memref<18x18x32xbf16, #tpu.memory_space<vmem>>, vector<16x16x32xbf16>
    %c0_39 = arith.constant 0 : index
    %c0_40 = arith.constant 0 : index
    %c0_41 = arith.constant 0 : index
    %c32 = arith.constant 32 : index
    %35 = vector.load %arg9[%c0_39, %c0_40, %c0_41, %c32] : memref<1x16x16x288xbf16, #tpu.memory_space<vmem>>, vector<1x16x16x32xbf16>
    %36 = vector.shape_cast %35 : vector<1x16x16x32xbf16> to vector<16x16x32xbf16>
    %37 = vector.shape_cast %34 : vector<16x16x32xbf16> to vector<1x16x16x32xbf16>
    tpu.vector_store %arg9[%c0_39, %c0_40, %c0_41, %c32], %37 {strides = array<i32>} : memref<1x16x16x288xbf16, #tpu.memory_space<vmem>>, vector<1x16x16x32xbf16>,
    %c0_42 = arith.constant 0 : index
    %c2 = arith.constant 2 : index
    %c0_43 = arith.constant 0 : index
    %38 = vector.load %arg8[%c0_42, %c2, %c0_43] : memref<18x18x32xbf16, #tpu.memory_space<vmem>>, vector<16x16x32xbf16>
    %c0_44 = arith.constant 0 : index
    %c0_45 = arith.constant 0 : index
    %c0_46 = arith.constant 0 : index
    %c64 = arith.constant 64 : index
    %39 = vector.load %arg9[%c0_44, %c0_45, %c0_46, %c64] : memref<1x16x16x288xbf16, #tpu.memory_space<vmem>>, vector<1x16x16x32xbf16>
    %40 = vector.shape_cast %39 : vector<1x16x16x32xbf16> to vector<16x16x32xbf16>
    %41 = vector.shape_cast %38 : vector<16x16x32xbf16> to vector<1x16x16x32xbf16>
    tpu.vector_store %arg9[%c0_44, %c0_45, %c0_46, %c64], %41 {strides = array<i32>} : memref<1x16x16x288xbf16, #tpu.memory_space<vmem>>, vector<1x16x16x32xbf16>,
    %c1_47 = arith.constant 1 : index
    %c0_48 = arith.constant 0 : index
    %c0_49 = arith.constant 0 : index
    %42 = vector.load %arg8[%c1_47, %c0_48, %c0_49] : memref<18x18x32xbf16, #tpu.memory_space<vmem>>, vector<16x16x32xbf16>
    %c0_50 = arith.constant 0 : index
    %c0_51 = arith.constant 0 : index
    %c0_52 = arith.constant 0 : index
    %c96 = arith.constant 96 : index
    %43 = vector.load %arg9[%c0_50, %c0_51, %c0_52, %c96] : memref<1x16x16x288xbf16, #tpu.memory_space<vmem>>, vector<1x16x16x32xbf16>
    %44 = vector.shape_cast %43 : vector<1x16x16x32xbf16> to vector<16x16x32xbf16>
    %45 = vector.shape_cast %42 : vector<16x16x32xbf16> to vector<1x16x16x32xbf16>
    tpu.vector_store %arg9[%c0_50, %c0_51, %c0_52, %c96], %45 {strides = array<i32>} : memref<1x16x16x288xbf16, #tpu.memory_space<vmem>>, vector<1x16x16x32xbf16>,
    %c1_53 = arith.constant 1 : index
    %c1_54 = arith.constant 1 : index
    %c0_55 = arith.constant 0 : index
    %46 = vector.load %arg8[%c1_53, %c1_54, %c0_55] : memref<18x18x32xbf16, #tpu.memory_space<vmem>>, vector<16x16x32xbf16>
    %c0_56 = arith.constant 0 : index
    %c0_57 = arith.constant 0 : index
    %c0_58 = arith.constant 0 : index
    %c128 = arith.constant 128 : index
    %47 = vector.load %arg9[%c0_56, %c0_57, %c0_58, %c128] : memref<1x16x16x288xbf16, #tpu.memory_space<vmem>>, vector<1x16x16x32xbf16>
    %48 = vector.shape_cast %47 : vector<1x16x16x32xbf16> to vector<16x16x32xbf16>
    %49 = vector.shape_cast %46 : vector<16x16x32xbf16> to vector<1x16x16x32xbf16>
    tpu.vector_store %arg9[%c0_56, %c0_57, %c0_58, %c128], %49 {strides = array<i32>} : memref<1x16x16x288xbf16, #tpu.memory_space<vmem>>, vector<1x16x16x32xbf16>,
    %c1_59 = arith.constant 1 : index
    %c2_60 = arith.constant 2 : index
    %c0_61 = arith.constant 0 : index
    %50 = vector.load %arg8[%c1_59, %c2_60, %c0_61] : memref<18x18x32xbf16, #tpu.memory_space<vmem>>, vector<16x16x32xbf16>
    %c0_62 = arith.constant 0 : index
    %c0_63 = arith.constant 0 : index
    %c0_64 = arith.constant 0 : index
    %c160 = arith.constant 160 : index
    %51 = vector.load %arg9[%c0_62, %c0_63, %c0_64, %c160] : memref<1x16x16x288xbf16, #tpu.memory_space<vmem>>, vector<1x16x16x32xbf16>
    %52 = vector.shape_cast %51 : vector<1x16x16x32xbf16> to vector<16x16x32xbf16>
    %53 = vector.shape_cast %50 : vector<16x16x32xbf16> to vector<1x16x16x32xbf16>
    tpu.vector_store %arg9[%c0_62, %c0_63, %c0_64, %c160], %53 {strides = array<i32>} : memref<1x16x16x288xbf16, #tpu.memory_space<vmem>>, vector<1x16x16x32xbf16>,
    %c2_65 = arith.constant 2 : index
    %c0_66 = arith.constant 0 : index
    %c0_67 = arith.constant 0 : index
    %54 = vector.load %arg8[%c2_65, %c0_66, %c0_67] : memref<18x18x32xbf16, #tpu.memory_space<vmem>>, vector<16x16x32xbf16>
    %c0_68 = arith.constant 0 : index
    %c0_69 = arith.constant 0 : index
    %c0_70 = arith.constant 0 : index
    %c192 = arith.constant 192 : index
    %55 = vector.load %arg9[%c0_68, %c0_69, %c0_70, %c192] : memref<1x16x16x288xbf16, #tpu.memory_space<vmem>>, vector<1x16x16x32xbf16>
    %56 = vector.shape_cast %55 : vector<1x16x16x32xbf16> to vector<16x16x32xbf16>
    %57 = vector.shape_cast %54 : vector<16x16x32xbf16> to vector<1x16x16x32xbf16>
    tpu.vector_store %arg9[%c0_68, %c0_69, %c0_70, %c192], %57 {strides = array<i32>} : memref<1x16x16x288xbf16, #tpu.memory_space<vmem>>, vector<1x16x16x32xbf16>,
    %c2_71 = arith.constant 2 : index
    %c1_72 = arith.constant 1 : index
    %c0_73 = arith.constant 0 : index
    %58 = vector.load %arg8[%c2_71, %c1_72, %c0_73] : memref<18x18x32xbf16, #tpu.memory_space<vmem>>, vector<16x16x32xbf16>
    %c0_74 = arith.constant 0 : index
    %c0_75 = arith.constant 0 : index
    %c0_76 = arith.constant 0 : index
    %c224 = arith.constant 224 : index
    %59 = vector.load %arg9[%c0_74, %c0_75, %c0_76, %c224] : memref<1x16x16x288xbf16, #tpu.memory_space<vmem>>, vector<1x16x16x32xbf16>
    %60 = vector.shape_cast %59 : vector<1x16x16x32xbf16> to vector<16x16x32xbf16>
    %61 = vector.shape_cast %58 : vector<16x16x32xbf16> to vector<1x16x16x32xbf16>
    tpu.vector_store %arg9[%c0_74, %c0_75, %c0_76, %c224], %61 {strides = array<i32>} : memref<1x16x16x288xbf16, #tpu.memory_space<vmem>>, vector<1x16x16x32xbf16>,
    %c2_77 = arith.constant 2 : index
    %c2_78 = arith.constant 2 : index
    %c0_79 = arith.constant 0 : index
    %62 = vector.load %arg8[%c2_77, %c2_78, %c0_79] : memref<18x18x32xbf16, #tpu.memory_space<vmem>>, vector<16x16x32xbf16>
    %c0_80 = arith.constant 0 : index
    %c0_81 = arith.constant 0 : index
    %c0_82 = arith.constant 0 : index
    %c256 = arith.constant 256 : index
    %63 = vector.load %arg9[%c0_80, %c0_81, %c0_82, %c256] : memref<1x16x16x288xbf16, #tpu.memory_space<vmem>>, vector<1x16x16x32xbf16>
    %64 = vector.shape_cast %63 : vector<1x16x16x32xbf16> to vector<16x16x32xbf16>
    %65 = vector.shape_cast %62 : vector<16x16x32xbf16> to vector<1x16x16x32xbf16>
    tpu.vector_store %arg9[%c0_80, %c0_81, %c0_82, %c256], %65 {strides = array<i32>} : memref<1x16x16x288xbf16, #tpu.memory_space<vmem>>, vector<1x16x16x32xbf16>,
    %c0_83 = arith.constant 0 : index
    %c0_84 = arith.constant 0 : index
    %c0_85 = arith.constant 0 : index
    %c0_86 = arith.constant 0 : index
    %66 = vector.load %arg9[%c0_83, %c0_84, %c0_85, %c0_86] : memref<1x16x16x288xbf16, #tpu.memory_space<vmem>>, vector<1x16x16x288xbf16>
    %67 = vector.shape_cast %66 : vector<1x16x16x288xbf16> to vector<256x288xbf16>
    %c0_87 = arith.constant 0 : index
    %c0_88 = arith.constant 0 : index
    %68 = vector.load %arg6[%c0_87, %c0_88] : memref<288x8xbf16, #tpu.memory_space<vmem>>, vector<288x8xbf16>
    %cst_89 = arith.constant dense<0.000000e+00> : vector<256x8xf32>
    %69 = tpu.matmul %67, %68, %cst_89 {dimension_numbers = #tpu.dot_dimension_numbers<[1], [0], [0], [1], [0, 0, 1, 1], [], []>} : vector<256x288xbf16>, vector<288x8xbf16>, vector<256x8xf32> -> vector<256x8xf32>
    %c0_90 = arith.constant 0 : index
    %c0_91 = arith.constant 0 : index
    %c0_92 = arith.constant 0 : index
    %70 = vector.load %arg7[%c0_90, %c0_91, %c0_92] : memref<1x256x12xf32, #tpu.memory_space<vmem>>, vector<1x256x4xf32>
    tpu.vector_store %arg7[%c0_90, %c0_91, %c0_92], %0 {strides = array<i32>} : memref<1x256x12xf32, #tpu.memory_space<vmem>>, vector<1x256x4xf32>,
    %71 = vector.shape_cast %69 : vector<256x8xf32> to vector<1x256x8xf32>
    %c0_93 = arith.constant 0 : index
    %c0_94 = arith.constant 0 : index
    %c4 = arith.constant 4 : index
    %72 = vector.load %arg7[%c0_93, %c0_94, %c4] : memref<1x256x12xf32, #tpu.memory_space<vmem>>, vector<1x256x8xf32>
    tpu.vector_store %arg7[%c0_93, %c0_94, %c4], %71 {strides = array<i32>} : memref<1x256x12xf32, #tpu.memory_space<vmem>>, vector<1x256x8xf32>,
    return
  }
  func.func @transform_0(%arg0: i32) -> (i32, i32, i32) {
    %c0_i32 = arith.constant 0 : i32
    %c0_i32_0 = arith.constant 0 : i32
    %c0_i32_1 = arith.constant 0 : i32
    return %arg0, %c0_i32, %c0_i32_0 : i32, i32, i32
  }
  func.func @transform_1(%arg0: i32) -> (i32, i32) {
    %c0_i32 = arith.constant 0 : i32
    %c0_i32_0 = arith.constant 0 : i32
    %c0_i32_1 = arith.constant 0 : i32
    return %c0_i32, %c0_i32_0 : i32, i32
  }
  func.func @transform_2(%arg0: i32) -> (i32, i32) {
    %c0_i32 = arith.constant 0 : i32
    %c0_i32_0 = arith.constant 0 : i32
    %c0_i32_1 = arith.constant 0 : i32
    return %c0_i32, %c0_i32_0 : i32, i32
  }
  func.func @transform_3(%arg0: i32) -> (i32, i32) {
    %c0_i32 = arith.constant 0 : i32
    %c0_i32_0 = arith.constant 0 : i32
    %c0_i32_1 = arith.constant 0 : i32
    return %c0_i32, %c0_i32_0 : i32, i32
  }
  func.func @transform_4(%arg0: i32) -> (i32, i32) {
    %c0_i32 = arith.constant 0 : i32
    %c0_i32_0 = arith.constant 0 : i32
    %c0_i32_1 = arith.constant 0 : i32
    return %c0_i32, %c0_i32_0 : i32, i32
  }
  func.func @transform_5(%arg0: i32) -> (i32, i32) {
    %c0_i32 = arith.constant 0 : i32
    %c0_i32_0 = arith.constant 0 : i32
    %c0_i32_1 = arith.constant 0 : i32
    return %c0_i32, %c0_i32_0 : i32, i32
  }
  func.func @transform_6(%arg0: i32) -> (i32, i32, i32) {
    %c0_i32 = arith.constant 0 : i32
    %c0_i32_0 = arith.constant 0 : i32
    %c0_i32_1 = arith.constant 0 : i32
    return %arg0, %c0_i32, %c0_i32_0 : i32, i32, i32
  }
}

</mosaic_0001>

<bundles_post_ra>
// kernel: bottleneck_block_forward.1
= control target key start
LH: loop header
LB: loop body
LE: loop exit
PB: predicated region body
PF: predicated region fallthrough
CT: control target
= control target key end

     0   :  { %s5702_s21 = smov 0   ;;  %s8054_s0 = inlined_call_operand.vmem [shape: f32[2,256,4], index: 0, kind: input, shape index: {}]   ;;  %s8055_s1 = inlined_call_operand.vmem [shape: f32[1,4], index: 1, kind: input, shape index: {}]   ;;  %s8056_s2 = inlined_call_operand.vmem [shape: f32[1,4], index: 2, kind: input, shape index: {}]   ;;  %s8057_s3 = inlined_call_operand.vmem [shape: bf16[4,32], index: 3, kind: input, shape index: {}]   ;;  %s8058_s4 = inlined_call_operand.vmem [shape: f32[1,32], index: 4, kind: input, shape index: {}]   ;;  %s8059_s5 = inlined_call_operand.vmem [shape: bf16[288,8], index: 5, kind: input, shape index: {}]   ;;  %s8060_s6 = inlined_call_operand.vmem [shape: f32[2,256,12], index: 6, kind: output, shape index: {}]  }
   0x1 LB: > { %s5205_s22 = sadd.s32 4294967295, %s5660_s21   ;;  %p5209_p0 = scmp.ge.s32.totalorder %s5660_s21, 1  ;;  %s5660_s21 = sphi %s5702_s21, %s16_s21  }
   0x2   : > { %p212_p1 = scmp.lt.s32.totalorder %s5660_s21, 3 }
   0x4   : > { %p213_p2 = pnand %p5209_p0, %p212_p1 }
   0x5   : > { %p242_p3 = scmp.lt.s32.totalorder (!%p213_p2), %s5205_s22, 1  ;;  %s5663_s12 = smov (!%p213_p2), 64  }
   0x6   : > { %216 = sbr.rel (%p213_p2) target bundleno = 1058 (0x422), region = 44  ;;  %s5664_s13 = smov (!%p213_p2), 32  }
   0x7   : > { %s5665_s16 = smov (!%p213_p2), 96  }
   0xb   : > { %v405_v0 = vld [vmem:[%s8057_s3] sm:$0x3]  ;;  %vm459_vm0 = vcmask 1041408   ;;  %s8074_s22 = smov (!%p242_p3, %s5205_s22), 1  ;;  %vm410_vm1 = vcmask 31744   ;;  %vm616_vm2 = vcmask 257024  }
   0xc   : > { %v461_v1 = vsel %vm459_vm0, %v405_v0, 0  ;;  %v5716_v2 = vld [vmem:[%s8055_s1] ss:$0 sm:$0xff]  ;;  %s5560_s27 = sshll.u32 %s8074_s22, 8  ;;  %vm619_vm3 = vcmask 253952   ;;  %v5662_v37 = vmov 0  }
   0xd   : > { %470 = vmatpush.bf16.msra.mxu0 %v461_v1  ;;  %s5721_s30 = scalar_lea.vmem %s8054_s0, %s5560_s27  ;;  %v5726_v3 = vld [vmem:[%s8056_s2] ss:$0 sm:$0xff]  ;;  %s5731_s11 = scalar_lea.vmem %s8060_s6, %s5560_s27  ;;  %618 = vst.msk [vmem:[#allocation2 + $0x4] sm:$0xf] %vm616_vm2, %v5662_v37  ;;  %vm682_vm4 = vsmask.f32 7938 }
   0xe   : > { %v253_v4 = vld [vmem:[%s5721_s30] sm:$0xff]  ;;  %v254_v5 = vld [vmem:[%s5721_s30 + $0x8] sm:$0xff]  ;;  %v255_v8 = vld [vmem:[%s5721_s30 + $0x10] sm:$0xff]  ;;  %620 = vst.msk [vmem:[#allocation2 + $0x8] sm:$0x1] %vm619_vm3, %v5662_v37  ;;  %vm1899_vm6 = vcmask 1042432  }
   0xf   : > { %v289_v6 = vmul.f32 %v5716_v2, %v253_v4  ;;  %v290_v7 = vmul.f32 %v5716_v2, %v254_v5  ;;  %4957 = vst.msk [vmem:[%s5731_s11] sm:$0xff] %vm410_vm1, %v253_v4  ;;  %v256_v11 = vld [vmem:[%s5721_s30 + $0x18] sm:$0xff]  ;;  %v257_v12 = vld [vmem:[%s5721_s30 + $0x20] sm:$0xff]  ;;  %v258_v15 = vld [vmem:[%s5721_s30 + $0x28] sm:$0xff]  ;;  %v291_v17 = vmul.f32 %v5716_v2, %v255_v8  ;;  %vm1900_vm7 = vcmask 1046532  }
  0x10   : > { %4958 = vst.msk [vmem:[%s5731_s11 + $0x8] sm:$0xff] %vm410_vm1, %v254_v5  ;;  %v292_v18 = vmul.f32 %v5716_v2, %v256_v11  ;;  %v259_v19 = vld [vmem:[%s5721_s30 + $0x30] sm:$0xff]  ;;  %v260_v20 = vld [vmem:[%s5721_s30 + $0x38] sm:$0xff]  ;;  %v293_v26 = vmul.f32 %v5716_v2, %v257_v12  ;;  %v294_v27 = vmul.f32 %v5716_v2, %v258_v15  ;;  %v261_v28 = vld [vmem:[%s5721_s30 + $0x40] sm:$0xff]  ;;  %vm626_vm9 = vsmask.f32 256 }
  0x11   : > { %v325_v9 = vadd.f32 %v5726_v3, %v289_v6  ;;  %v326_v10 = vadd.f32 %v5726_v3, %v290_v7  ;;  %4959 = vst.msk [vmem:[%s5731_s11 + $0x10] sm:$0xff] %vm410_vm1, %v255_v8  ;;  %v327_v21 = vadd.f32 %v5726_v3, %v291_v17  ;;  %v262_v29 = vld [vmem:[%s5721_s30 + $0x48] sm:$0xff]  ;;  %v295_v35 = vmul.f32 %v5716_v2, %v259_v19  ;;  %vm5790_vm5 = vmand %vm619_vm3, %vm682_vm4  ;;  %v263_v63 = vld [vmem:[%s5721_s30 + $0x50] sm:$0xff] }
  0x12   : > { %4960 = vst.msk [vmem:[%s5731_s11 + $0x18] sm:$0xff] %vm410_vm1, %v256_v11  ;;  %v328_v22 = vadd.f32 %v5726_v3, %v292_v18  ;;  %v329_v30 = vadd.f32 %v5726_v3, %v293_v26  ;;  %v330_v31 = vadd.f32 %v5726_v3, %v294_v27  ;;  %v296_v36 = vmul.f32 %v5716_v2, %v260_v20  ;;  %vm5804_vm8 = vmor %vm1899_vm6, %vm1900_vm7  ;;  %v264_v0 = vld [vmem:[%s5721_s30 + $0x58] sm:$0xff] }
  0x13   : > { %v357_v13 = vmax.f32 %v325_v9, 0.0  ;;  %v358_v14 = vmax.f32 %v326_v10, 0.0  ;;  %4961 = vst.msk [vmem:[%s5731_s11 + $0x20] sm:$0xff] %vm410_vm1, %v257_v12  ;;  %v359_v23 = vmax.f32 %v327_v21, 0.0  ;;  %v331_v38 = vadd.f32 %v5726_v3, %v295_v35  ;;  %vm5826_vm10 = vmand %vm619_vm3, %vm626_vm9 }
  0x14   : > { %4962 = vst.msk [vmem:[%s5731_s11 + $0x28] sm:$0xff] %vm410_vm1, %v258_v15  ;;  %v360_v24 = vmax.f32 %v328_v22, 0.0  ;;  %v361_v32 = vmax.f32 %v329_v30, 0.0  ;;  %v362_v33 = vmax.f32 %v330_v31, 0.0  ;;  %v332_v39 = vadd.f32 %v5726_v3, %v296_v36  ;;  %v5796_v45 = vld [vmem:[#allocation2 + $0x4] sm:$0xf]  ;;  %vm5878_vm14 = vmand %vm616_vm2, %vm682_vm4 }
  0x15   : > { %v389_v16 = vpack.c.bf16 %v358_v14, %v357_v13  ;;  %4963 = vst.msk [vmem:[%s5731_s11 + $0x30] sm:$0xff] %vm410_vm1, %v259_v19  ;;  %v363_v41 = vmax.f32 %v331_v38, 0.0  ;;  %v684_v43 = vld [vmem:[#allocation2 + $0x8] sm:$0x1]  ;;  %v1904_v47 = vrot.slane %v5796_v45, 5  ;;  %v297_v48 = vmul.f32 %v5716_v2, %v261_v28 }
  0x16   : > { %4964 = vst.msk [vmem:[%s5731_s11 + $0x38] sm:$0xff] %vm410_vm1, %v260_v20  ;;  %v390_v25 = vpack.c.bf16 %v360_v24, %v359_v23  ;;  %v391_v34 = vpack.c.bf16 %v362_v33, %v361_v32  ;;  %v364_v42 = vmax.f32 %v332_v39, 0.0  ;;  %v685_v44 = vsel %vm5790_vm5, 0, %v684_v43  ;;  %v1240_v60 = vld [vmem:[#allocation2 + $0x4] sm:$0xf] }
  0x17   : > { %5214 = vmatmul.msk.bf16.vlgmr.msra.gmra.mxu0 %vm410_vm1, %v389_v16  ;;  %4965 = vst.msk [vmem:[%s5731_s11 + $0x40] sm:$0xff] %vm410_vm1, %v261_v28  ;;  %v298_v49 = vmul.f32 %v5716_v2, %v262_v29  ;;  %v1906_v50 = vrot.slane %v1904_v47, 4  ;;  %v333_v54 = vadd.f32 %v5726_v3, %v297_v48  ;;  %v1300_v61 = vshll.u32 %v1240_v60, 16  ;;  %v631_v20 = vld [vmem:[#allocation2 + $0xc] sm:$0x1]  ;;  %v265_v39 = vld [vmem:[%s5721_s30 + $0x60] sm:$0xff] }
  0x18   : > { %4966 = vst.msk [vmem:[%s5731_s11 + $0x48] sm:$0xff] %vm410_vm1, %v262_v29  ;;  %v392_v46 = vpack.c.bf16 %v364_v42, %v363_v41  ;;  %v1304_v62 = vshrl.u32 %v1240_v60, 16  ;;  %v299_v1 = vmul.f32 %v5716_v2, %v263_v63  ;;  %v300_v4 = vmul.f32 %v5716_v2, %v264_v0  ;;  %v687_v24 = vld [vmem:[#allocation2 + $0x14] sm:$0x1]  ;;  %v266_v41 = vld [vmem:[%s5721_s30 + $0x68] sm:$0xff] }
  0x19   : > { %617 = vst.msk [vmem:[#allocation2] sm:$0xf] %vm616_vm2, %v5662_v37  ;;  %v334_v55 = vadd.f32 %v5726_v3, %v298_v49  ;;  %v365_v57 = vmax.f32 %v333_v54, 0.0  ;;  %v1302_v5 = vrot.slane %v1300_v61, 5  ;;  %vm1287_vm11 = vsmask.f32 3328 }
  0x1a   : > { %622 = vst.msk [vmem:[#allocation2 + $0xcc] sm:$0xf] %vm616_vm2, %v5662_v37  ;;  %v1306_v6 = vrot.slane %v1304_v62, 4  ;;  %v335_v8 = vadd.f32 %v5726_v3, %v299_v1  ;;  %v336_v9 = vadd.f32 %v5726_v3, %v300_v4  ;;  %vm1288_vm12 = vsmask.f32 7440 }
  0x1b   : > { %623 = vst.msk [vmem:[#allocation2 + $0xd0] sm:$0xf] %vm616_vm2, %v5662_v37  ;;  %v366_v58 = vmax.f32 %v334_v55, 0.0  ;;  %vm5830_vm13 = vmor %vm1287_vm11, %vm1288_vm12  ;;  %v632_v23 = vsel %vm5826_vm10, 0, %v631_v20  ;;  %v688_v26 = vsel %vm5790_vm5, 0, %v687_v24  ;;  %v301_v42 = vmul.f32 %v5716_v2, %v265_v39 }
  0x1c   : > { %624 = vst.msk [vmem:[#allocation2 + $0xd4] sm:$0x1] %vm619_vm3, %v5662_v37  ;;  %v1307_v10 = vor.u32 %v1306_v6, %v1302_v5  ;;  %v367_v13 = vmax.f32 %v335_v8, 0.0  ;;  %v368_v14 = vmax.f32 %v336_v9, 0.0  ;;  %v634_v37 = vld [vmem:[#allocation2 + $0x18] sm:$0x1]  ;;  %v302_v43 = vmul.f32 %v5716_v2, %v266_v41 }
  0x1d   : > { %686 = vst [vmem:[#allocation2 + $0x8] sm:$0x1] %v685_v44  ;;  %v393_v59 = vpack.c.bf16 %v366_v58, %v365_v57  ;;  %v635_v38 = vsel %vm5826_vm10, 0, %v634_v37  ;;  %v5865_v44 = vld [vmem:[%s8058_s4] ss:$0 sm:$0xff]  ;;  %v337_v45 = vadd.f32 %v5726_v3, %v301_v42  ;;  %v268_v37 = vld [vmem:[%s5721_s30 + $0x78] sm:$0xff] }
  0x1e   : > { %4967 = vst.msk [vmem:[%s5731_s11 + $0x50] sm:$0xff] %vm410_vm1, %v263_v63  ;;  %v1308_v15 = vrot.slane %v1307_v10, 4  ;;  %v394_v18 = vpack.c.bf16 %v368_v14, %v367_v13  ;;  %v637_v58 = vld [vmem:[#allocation2 + $0x24] sm:$0x1]  ;;  %v693_v8 = vld [vmem:[#allocation2 + $0x2c] sm:$0x1] }
  0x1f   : > { %4968 = vst.msk [vmem:[%s5731_s11 + $0x58] sm:$0xff] %vm410_vm1, %v264_v0  ;;  %v369_v49 = vmax.f32 %v337_v45, 0.0  ;;  %v638_v60 = vsel %vm5826_vm10, 0, %v637_v58  ;;  %vm738_vm15 = vsmask.f32 4368  ;;  %v694_v10 = vsel %vm5790_vm5, 0, %v693_v8 }
  0x20   : > { %v628_v19 = vld [vmem:[#allocation2] sm:$0x1]  ;;  %633 = vst [vmem:[#allocation2 + $0xc] sm:$0x1] %v632_v23  ;;  %v1803_v33 = vld [vmem:[#allocation2] sm:$0xe]  ;;  %vm5888_vm0 = vmor %vm626_vm9, %vm738_vm15 }
  0x21   : > { %v629_v22 = vsel %vm5826_vm10, 0, %v628_v19  ;;  %689 = vst [vmem:[#allocation2 + $0x14] sm:$0x1] %v688_v26  ;;  %v5230_v35 = vrot.slane %v1803_v33, 9  ;;  %v5627_v33 = vld [vmem:[%s8059_s5 + $0x88] sm:$0xff]  ;;  %vm4641_vm3 = vcmask 261120  }
  0x22   : > { %630 = vst [vmem:[#allocation2] sm:$0x1] %v629_v22  ;;  %4874 = vmatpush.bf16.msra.mxu3 %v5627_v33  ;;  %vm1770_vm4 = vcmask 519424   ;;  %vm2110_vm6 = vcmask 781824   ;;  %vm2303_vm7 = vcmask 1044224  }
  0x23   : > { %v1905_v36 = vsel %vm5804_vm8, %v5230_v35, %v1904_v47  ;;  %636 = vst [vmem:[#allocation2 + $0x18] sm:$0x1] %v635_v38  ;;  %v690_v47 = vld [vmem:[#allocation2 + $0x20] sm:$0x1] }
  0x24   : > { %v1805_v51 = vld [vmem:[#allocation2 + $0x8] sm:$0x1]  ;;  %2014 = vrot.lane.b32.xlu2 %v1905_v36, %s5663_s12  ;;  %4969 = vst.msk [vmem:[%s5731_s11 + $0x60] sm:$0xff] %vm410_vm1, %v265_v39  ;;  %v691_v48 = vsel %vm5790_vm5, 0, %v690_v47 }
  0x25   : > { %v1907_v53 = vrot.slane %v1805_v51, 5  ;;  %v1241_v7 = vld [vmem:[#allocation2 + $0x8] sm:$0x1]  ;;  %4970 = vst.msk [vmem:[%s5731_s11 + $0x68] sm:$0xff] %vm410_vm1, %v266_v41  ;;  %v5626_v41 = vld [vmem:[%s8059_s5 + $0x80] sm:$0xff] }
  0x26   : > { %v1310_v11 = vshll.u32 %v1241_v7, 16  ;;  %692 = vst [vmem:[#allocation2 + $0x20] sm:$0x1] %v691_v48  ;;  %4875 = vmatpush.bf16.msra.mxu3 %v5626_v41 }
  0x27   : > { %5215 = vmatmul.msk.bf16.gmra.mxu0 %vm410_vm1, %v390_v25  ;;  %v1908_v56 = vsel %vm5804_vm8, %v1906_v50, %v1907_v53  ;;  %639 = vst [vmem:[#allocation2 + $0x24] sm:$0x1] %v638_v60  ;;  %v1063_v1 = vld [vmem:[#allocation2 + $0xc] sm:$0xf] }
  0x28   : > { %2016 = vrot.lane.b32.xlu0 %v1908_v56, %s5663_s12  ;;  %v1312_v16 = vrot.slane %v1310_v11, 5  ;;  %695 = vst [vmem:[#allocation2 + $0x2c] sm:$0x1] %v694_v10 }
  0x29   : > { %v1239_v25 = vld [vmem:[#allocation2] sm:$0xf]  ;;  %4972 = vst.msk [vmem:[%s5731_s11 + $0x78] sm:$0xff] %vm410_vm1, %v268_v37 }
  0x2a   : > { %v1313_v21 = vsel %vm5830_vm13, %v1308_v15, %v1312_v16  ;;  %v1291_v27 = vshrl.u32 %v1239_v25, 16  ;;  %v1294_v28 = vshll.u32 %v1239_v25, 16  ;;  %v1070_v38 = vld [vmem:[#allocation2 + $0x18] sm:$0xf] }
  0x2c   : > { %v1293_v29 = vrot.slane %v1291_v27, 4  ;;  %v1296_v30 = vrot.slane %v1294_v28, 5 }
  0x2e   : > { %v1297_v31 = vor.u32 %v1296_v30, %v1293_v29 }
  0x30   : > { %1676 = vrot.lane.b32.xlu0 %v1313_v21, %s5664_s13  ;;  %v1298_v32 = vrot.slane %v1297_v31, 4 }
  0x37   : > { %5216 = vmatmul.msk.bf16.gmra.mxu0 %vm410_vm1, %v391_v34  ;;  %v1303_v34 = vsel %vm5830_vm13, %v1298_v32, %v1302_v5 }
  0x38   : > { %1674 = vrot.lane.b32.xlu0 %v1303_v34, %s5664_s13  ;;  %v267_v34 = vld [vmem:[%s5721_s30 + $0x70] sm:$0xff] }
  0x39   : > { %4971 = vst.msk [vmem:[%s5731_s11 + $0x70] sm:$0xff] %vm410_vm1, %v267_v34 }
  0x47   : > { %5217 = vmatmul.msk.bf16.gmra.mxu0 %vm410_vm1, %v392_v46  ;;  %v338_v46 = vadd.f32 %v5726_v3, %v302_v43 }
  0x49   : > { %v370_v50 = vmax.f32 %v338_v46, 0.0 }
  0x4b   : > { %v395_v54 = vpack.c.bf16 %v370_v50, %v369_v49 }
  0x57   : > { %5218 = vmatmul.msk.bf16.gmra.mxu0 %vm410_vm1, %v393_v59 }
  0x67   : > { %5219 = vmatmul.msk.bf16.gmra.mxu0 %vm410_vm1, %v394_v18  ;;  %v1067_v18 = vld [vmem:[#allocation2 + $0x14] sm:$0x1] }
  0x77   : > { %5220 = vmatmul.msk.bf16.gmra.mxu0 %vm410_vm1, %v395_v54  ;;  %v303_v54 = vmul.f32 %v5716_v2, %v267_v34 }
  0x94   : > { %v472_v51 = vpop.f32.mrf.mxu0 }
  0x95   : > { %v473_v53 = vadd.f32 %v5865_v44, %v472_v51 }
  0x97   : > { %v552_v55 = vmax.f32 %v473_v53, 0.0 }
  0x99   : > { %v584_v56 = vpack.c.bf16 %v552_v55, %v552_v55 }
  0x9b   : > { %v741_v57 = vshrl.u32 %v584_v56, 16  ;;  %v744_v62 = vshll.u32 %v584_v56, 16 }
  0x9c   : > { %v474_v59 = vpop.f32.mrf.mxu0 }
  0x9d   : > { %v743_v61 = vrot.slane %v741_v57, 7  ;;  %v475_v63 = vadd.f32 %v5865_v44, %v474_v59 }
  0x9f   : > { %v746_v4 = vor.u32 %v744_v62, %v743_v61  ;;  %v553_v5 = vmax.f32 %v475_v63, 0.0  ;;  %v747_v19 = vrot.slane %v743_v61, 4 }
  0xa1   : > { %v1064_v6 = vsel %vm5878_vm14, %v746_v4, %v1063_v1  ;;  %v585_v7 = vpack.c.bf16 %v553_v5, %v553_v5  ;;  %v304_v1 = vmul.f32 %v5716_v2, %v268_v37  ;;  %v1077_v37 = vld [vmem:[#allocation2 + $0x24] sm:$0xf] }
  0xa2   : > { %1065 = vst [vmem:[#allocation2 + $0xc] sm:$0xf] %v1064_v6 }
  0xa3   : > { %v749_v9 = vshrl.u32 %v585_v7, 16  ;;  %v752_v14 = vshll.u32 %v585_v7, 16 }
  0xa4   : > { %v477_v11 = vpop.f32.mrf.mxu0 }
  0xa5   : > { %v751_v13 = vrot.slane %v749_v9, 7  ;;  %v478_v15 = vadd.f32 %v5865_v44, %v477_v11 }
  0xa7   : > { %v754_v20 = vor.u32 %v752_v14, %v751_v13  ;;  %v756_v21 = vrot.slane %v751_v13, 4  ;;  %v554_v22 = vmax.f32 %v478_v15, 0.0  ;;  %v339_v13 = vadd.f32 %v5726_v3, %v303_v54  ;;  %v1074_v14 = vld [vmem:[#allocation2 + $0x20] sm:$0x1] }
  0xa9   : > { %v755_v23 = vsel %vm5888_vm0, %v747_v19, %v754_v20  ;;  %v1068_v24 = vsel %vm5826_vm10, %v756_v21, %v1067_v18  ;;  %v586_v25 = vpack.c.bf16 %v554_v22, %v554_v22  ;;  %v2143_v26 = vld [vmem:[#allocation2 + $0xc] sm:$0xf]  ;;  %v340_v21 = vadd.f32 %v5726_v3, %v304_v1 }
  0xaa   : > { %1066 = vst.msk [vmem:[#allocation2 + $0x10] sm:$0xf] %vm616_vm2, %v755_v23  ;;  %2207 = vrot.lane.b32.xlu1 %v2143_v26, %s5665_s16  ;;  %v1242_v27 = vld [vmem:[#allocation2 + $0xc] sm:$0xf] }
  0xab   : > { %1069 = vst [vmem:[#allocation2 + $0x14] sm:$0x1] %v1068_v24  ;;  %v758_v28 = vshrl.u32 %v586_v25, 16  ;;  %v761_v29 = vshll.u32 %v586_v25, 16  ;;  %v1315_v31 = vshrl.u32 %v1242_v27, 16  ;;  %v1318_v32 = vshll.u32 %v1242_v27, 16 }
  0xac   : > { %v479_v30 = vpop.f32.mrf.mxu0  ;;  %v2832_v39 = vld [vmem:[#allocation2 + $0xc] sm:$0xe] }
  0xad   : > { %v760_v35 = vrot.slane %v758_v28, 7  ;;  %v480_v36 = vadd.f32 %v5865_v44, %v479_v30  ;;  %v1806_v45 = vld [vmem:[#allocation2 + $0xc] sm:$0xe]  ;;  %v1317_v46 = vrot.slane %v1315_v31, 4  ;;  %v1320_v47 = vrot.slane %v1318_v32, 5 }
  0xae   : > { %v5246_v55 = vrot.slane %v2832_v39, 9  ;;  %v5231_v57 = vrot.slane %v1806_v45, 9  ;;  %v371_v30 = vmax.f32 %v339_v13, 0.0 }
  0xaf   : > { %v763_v42 = vor.u32 %v761_v29, %v760_v35  ;;  %v555_v43 = vmax.f32 %v480_v36, 0.0  ;;  %v1321_v63 = vor.u32 %v1320_v47, %v1317_v46  ;;  %v764_v9 = vrot.slane %v760_v35, 4  ;;  %v640_v36 = vld [vmem:[#allocation2 + $0x30] sm:$0x1] }
  0xb1   : > { %v1071_v48 = vsel %vm5878_vm14, %v763_v42, %v1070_v38  ;;  %v587_v49 = vpack.c.bf16 %v555_v43, %v555_v43  ;;  %v2144_v50 = vld [vmem:[#allocation2 + $0x10] sm:$0xf]  ;;  %v1322_v23 = vrot.slane %v1321_v63, 4  ;;  %v372_v43 = vmax.f32 %v340_v21, 0.0 }
  0xb2   : > { %v5913_v51 = vld [vmem:[#allocation2 + $0x10] sm:$0xf]  ;;  %1072 = vst [vmem:[#allocation2 + $0x18] sm:$0xf] %v1071_v48  ;;  %2209 = vrot.lane.b32.xlu2 %v2144_v50, %s5665_s16  ;;  %v1808_v61 = vld [vmem:[#allocation2 + $0x14] sm:$0x1] }
  0xb3   : > { %v1807_v53 = vld [vmem:[#allocation2 + $0x10] sm:$0xf]  ;;  %v2930_v56 = vrot.slane %v5913_v51, 5  ;;  %v766_v59 = vshrl.u32 %v587_v49, 16  ;;  %v769_v60 = vshll.u32 %v587_v49, 16  ;;  %v1914_v15 = vrot.slane %v1808_v61, 5 }
  0xb4   : > { %v1911_v58 = vrot.slane %v1807_v53, 5  ;;  %v1243_v62 = vld [vmem:[#allocation2 + $0x10] sm:$0xf]  ;;  %v482_v4 = vpop.f32.mrf.mxu0  ;;  %v2834_v47 = vld [vmem:[#allocation2 + $0x14] sm:$0x1]  ;;  %v396_v53 = vpack.c.bf16 %v372_v43, %v371_v30 }
  0xb5   : > { %v2931_v5 = vsel %vm5804_vm8, %v5246_v55, %v2930_v56  ;;  %v1324_v8 = vshll.u32 %v1243_v62, 16  ;;  %v768_v10 = vrot.slane %v766_v59, 7  ;;  %v483_v11 = vadd.f32 %v5865_v44, %v482_v4  ;;  %v696_v48 = vld [vmem:[#allocation2 + $0x38] sm:$0x1]  ;;  %v1244_v50 = vld [vmem:[#allocation2 + $0x14] sm:$0x1] }
  0xb6   : > { %v1912_v6 = vsel %vm5804_vm8, %v5231_v57, %v1911_v58  ;;  %v1913_v7 = vrot.slane %v1911_v58, 4  ;;  %3040 = vrot.lane.b32.xlu0 %v2931_v5, %s5664_s13  ;;  %v1328_v25 = vshrl.u32 %v1243_v62, 16  ;;  %v641_v55 = vsel %vm5826_vm10, 0, %v640_v36  ;;  %5221 = vmatmul.msk.bf16.gmra.mxu0 %vm410_vm1, %v396_v53 }
  0xb7   : > { %2018 = vrot.lane.b32.xlu1 %v1912_v6, %s5663_s12  ;;  %v771_v18 = vor.u32 %v769_v60, %v768_v10  ;;  %v773_v19 = vrot.slane %v768_v10, 4  ;;  %v556_v20 = vmax.f32 %v483_v11, 0.0  ;;  %v5932_v24 = vrot.slane %v1324_v8, 5  ;;  %642 = vst [vmem:[#allocation2 + $0x30] sm:$0x1] %v641_v55 }
  0xb8   : > { %v1915_v22 = vsel %vm5804_vm8, %v1913_v7, %v1914_v15  ;;  %v697_v60 = vsel %vm5790_vm5, 0, %v696_v48  ;;  %v2932_v61 = vrot.slane %v2930_v56, 4  ;;  %v2933_v62 = vrot.slane %v2834_v47, 5 }
  0xb9   : > { %v772_v26 = vsel %vm5888_vm0, %v764_v9, %v771_v18  ;;  %v1075_v27 = vsel %vm5826_vm10, %v773_v19, %v1074_v14  ;;  %v588_v28 = vpack.c.bf16 %v556_v20, %v556_v20  ;;  %v1245_v29 = vld [vmem:[#allocation2 + $0x18] sm:$0xf]  ;;  %v1327_v39 = vsel %vm5830_vm13, %v1322_v23, %v5932_v24  ;;  %698 = vst [vmem:[#allocation2 + $0x38] sm:$0x1] %v697_v60 }
  0xba   : > { %1073 = vst.msk [vmem:[#allocation2 + $0x1c] sm:$0xf] %vm616_vm2, %v772_v26  ;;  %2020 = vrot.lane.b32.xlu2 %v1915_v22, %s5663_s12  ;;  %v2145_v31 = vld [vmem:[#allocation2 + $0x18] sm:$0xf]  ;;  %v1339_v32 = vshrl.u32 %v1245_v29, 16  ;;  %v1342_v33 = vshll.u32 %v1245_v29, 16  ;;  %v2934_v14 = vsel %vm5804_vm8, %v2932_v61, %v2933_v62 }
  0xbb   : > { %1076 = vst [vmem:[#allocation2 + $0x20] sm:$0x1] %v1075_v27  ;;  %v775_v34 = vshrl.u32 %v588_v28, 16  ;;  %v778_v35 = vshll.u32 %v588_v28, 16  ;;  %v3921_v54 = vld [vmem:[#allocation2 + $0x18] sm:$0xe] }
  0xbc   : > { %v484_v38 = vpop.f32.mrf.mxu0  ;;  %v1341_v41 = vrot.slane %v1339_v32, 4  ;;  %v1344_v42 = vrot.slane %v1342_v33, 5  ;;  %v3169_v59 = vld [vmem:[#allocation2 + $0x18] sm:$0xf]  ;;  %v1330_v63 = vrot.slane %v1328_v25, 4  ;;  %v1334_v6 = vshll.u32 %v1244_v50, 16 }
  0xbd   : > { %v777_v45 = vrot.slane %v775_v34, 7  ;;  %v485_v46 = vadd.f32 %v5865_v44, %v484_v38  ;;  %v5262_v7 = vrot.slane %v3921_v54, 9  ;;  %v1809_v15 = vld [vmem:[#allocation2 + $0x18] sm:$0xe]  ;;  %v1081_v28 = vld [vmem:[#allocation2 + $0x2c] sm:$0x1] }
  0xbe   : > { %2211 = vrot.lane.b32.xlu0 %v2145_v31, %s5665_s16  ;;  %v1345_v49 = vor.u32 %v1344_v42, %v1341_v41  ;;  %v1331_v18 = vor.u32 %v1330_v63, %v5932_v24  ;;  %v5232_v34 = vrot.slane %v1809_v15, 9  ;;  %v1336_v41 = vrot.slane %v1334_v6, 5  ;;  %v2835_v43 = vld [vmem:[#allocation2 + $0x18] sm:$0xe]  ;;  %v643_v54 = vld [vmem:[#allocation2 + $0x3c] sm:$0x1] }
  0xbf   : > { %1678 = vrot.lane.b32.xlu1 %v1327_v39, %s5664_s13  ;;  %v780_v57 = vor.u32 %v778_v35, %v777_v45  ;;  %v557_v58 = vmax.f32 %v485_v46, 0.0  ;;  %v781_v22 = vrot.slane %v777_v45, 4  ;;  %v3361_v45 = vld [vmem:[#allocation2 + $0x18] sm:$0xf]  ;;  %v1084_v62 = vld [vmem:[#allocation2 + $0x30] sm:$0xf] }
  0xc0   : > { %v1346_v9 = vrot.slane %v1345_v49, 4  ;;  %v1332_v36 = vrot.slane %v1331_v18, 4  ;;  %v3410_v60 = vshrl.u32 %v3361_v45, 16 }
  0xc1   : > { %v1078_v1 = vsel %vm5878_vm14, %v780_v57, %v1077_v37  ;;  %v589_v4 = vpack.c.bf16 %v557_v58, %v557_v58  ;;  %v5955_v5 = vld [vmem:[#allocation2 + $0x1c] sm:$0xf]  ;;  %v5247_v57 = vrot.slane %v2835_v43, 9 }
  0xc2   : > { %1079 = vst [vmem:[#allocation2 + $0x24] sm:$0xf] %v1078_v1  ;;  %3233 = vrot.lane.b32.xlu2 %v3169_v59, %s5663_s12  ;;  %v3170_v8 = vld [vmem:[#allocation2 + $0x1c] sm:$0xf]  ;;  %v1348_v51 = vshll.u32 %v5955_v5, 16  ;;  %v1337_v50 = vsel %vm5830_vm13, %v1332_v36, %v1336_v41  ;;  %v644_v1 = vsel %vm5826_vm10, 0, %v643_v54 }
  0xc3   : > { %v783_v56 = vshrl.u32 %v589_v4, 16  ;;  %v786_v10 = vshll.u32 %v589_v4, 16  ;;  %v3922_v11 = vld [vmem:[#allocation2 + $0x1c] sm:$0xf]  ;;  %v3923_v13 = vld [vmem:[#allocation2 + $0x20] sm:$0x1] }
  0xc4   : > { %v4019_v19 = vrot.slane %v3922_v11, 5  ;;  %v4022_v20 = vrot.slane %v3923_v13, 5  ;;  %v487_v21 = vpop.f32.mrf.mxu0  ;;  %v5964_v25 = vrot.slane %v1348_v51, 5  ;;  %v5966_v26 = vld [vmem:[#allocation2 + $0x1c] sm:$0xf]  ;;  %v1352_v4 = vshrl.u32 %v5955_v5, 16 }
  0xc5   : > { %v785_v23 = vrot.slane %v783_v56, 7  ;;  %v488_v27 = vadd.f32 %v5865_v44, %v487_v21  ;;  %v1918_v35 = vrot.slane %v5966_v26, 5  ;;  %v5985_v48 = vld [vmem:[#allocation2 + $0x1c] sm:$0xf]  ;;  %645 = vst [vmem:[#allocation2 + $0x3c] sm:$0x1] %v644_v1 }
  0xc6   : > { %3235 = vrot.lane.b32.xlu0 %v3170_v8, %s5663_s12  ;;  %v4020_v29 = vsel %vm5804_vm8, %v5262_v7, %v4019_v19  ;;  %v4021_v24 = vrot.slane %v4019_v19, 4  ;;  %v1351_v32 = vsel %vm5830_vm13, %v1346_v9, %v5964_v25  ;;  %v2937_v63 = vrot.slane %v5985_v48, 5  ;;  %v3362_v15 = vld [vmem:[#allocation2 + $0x1c] sm:$0xf]  ;;  %v1811_v19 = vld [vmem:[#allocation2 + $0x20] sm:$0x1] }
  0xc7   : > { %3042 = vrot.lane.b32.xlu1 %v2934_v14, %s5664_s13  ;;  %v788_v30 = vor.u32 %v786_v10, %v785_v23  ;;  %v790_v31 = vrot.slane %v785_v23, 4  ;;  %4161 = vst.msk [vmem:[#allocation3 + $0x8] sm:$0xf] %vm616_vm2, %v4020_v29  ;;  %v558_v33 = vmax.f32 %v488_v27, 0.0  ;;  %v1919_v49 = vsel %vm5804_vm8, %v5232_v34, %v1918_v35  ;;  %v2146_v18 = vld [vmem:[#allocation2 + $0x1c] sm:$0xf] }
  0xc8   : > { %v4023_v37 = vsel %vm5804_vm8, %v4021_v24, %v4022_v20  ;;  %v3413_v56 = vshll.u32 %v3361_v45, 16  ;;  %v2938_v5 = vsel %vm5804_vm8, %v5247_v57, %v2937_v63  ;;  %v1247_v29 = vld [vmem:[#allocation2 + $0x20] sm:$0x1]  ;;  %v1354_v24 = vrot.slane %v1352_v4, 4 }
  0xc9   : > { %v789_v38 = vsel %vm5888_vm0, %v781_v22, %v788_v30  ;;  %v1082_v39 = vsel %vm5826_vm10, %v790_v31, %v1081_v28  ;;  %4162 = vst.msk [vmem:[#allocation3 + $0x14] sm:$0xf] %vm616_vm2, %v4023_v37  ;;  %v590_v42 = vpack.c.bf16 %v558_v33, %v558_v33  ;;  %v3924_v59 = vld [vmem:[#allocation2 + $0x24] sm:$0xe]  ;;  %v3412_v22 = vrot.slane %v3410_v60, 4 }
  0xca   : > { %1080 = vst.msk [vmem:[#allocation2 + $0x28] sm:$0xf] %vm616_vm2, %v789_v38  ;;  %1682 = vrot.lane.b32.xlu2 %v1351_v32, %s5664_s13  ;;  %v3171_v6 = vld [vmem:[#allocation2 + $0x24] sm:$0xf]  ;;  %v5263_v51 = vrot.slane %v3924_v59, 9  ;;  %v3415_v33 = vrot.slane %v3413_v56, 5  ;;  %v1355_v57 = vor.u32 %v1354_v24, %v5964_v25 }
  0xcb   : > { %1083 = vst [vmem:[#allocation2 + $0x2c] sm:$0x1] %v1082_v39  ;;  %v792_v46 = vshrl.u32 %v590_v42, 16  ;;  %v795_v47 = vshll.u32 %v590_v42, 16  ;;  %v1088_v30 = vld [vmem:[#allocation2 + $0x38] sm:$0x1] }
  0xcc   : > { %v489_v53 = vpop.f32.mrf.mxu0  ;;  %v3419_v34 = vshll.u32 %v3362_v15, 16  ;;  %v2147_v38 = vld [vmem:[#allocation2 + $0x24] sm:$0xf]  ;;  %v1920_v42 = vrot.slane %v1918_v35, 4  ;;  %v3423_v45 = vshrl.u32 %v3362_v15, 16  ;;  %v1358_v26 = vshll.u32 %v1247_v29, 16 }
  0xcd   : > { %v5995_v55 = vrot.slane %v792_v46, 7  ;;  %v490_v58 = vadd.f32 %v5865_v44, %v489_v53  ;;  %v1248_v46 = vld [vmem:[#allocation2 + $0x24] sm:$0xf]  ;;  %v1921_v53 = vrot.slane %v1811_v19, 5  ;;  %v270_v59 = vld [vmem:[%s5721_s30 + $0x88] sm:$0xff] }
  0xce   : > { %2022 = vrot.lane.b32.xlu0 %v1919_v49, %s5663_s12  ;;  %v5288_v61 = vld [vmem:[#allocation3 + $0x8] sm:$0xf]  ;;  %v6025_v35 = vrot.slane %v3419_v34, 5  ;;  %4974 = vst.msk [vmem:[%s5731_s11 + $0x88] sm:$0xff] %vm410_vm1, %v270_v59  ;;  %v306_v29 = vmul.f32 %v5716_v2, %v270_v59  ;;  %v1812_v48 = vld [vmem:[#allocation2 + $0x24] sm:$0xe] }
  0xcf   : > { %1680 = vrot.lane.b32.xlu1 %v1337_v50, %s5664_s13  ;;  %v797_v7 = vor.u32 %v795_v47, %v5995_v55  ;;  %v559_v8 = vmax.f32 %v490_v58, 0.0  ;;  %v798_v37 = vrot.slane %v5995_v55, 4  ;;  %v699_v47 = vld [vmem:[#allocation2 + $0x44] sm:$0x1]  ;;  %v3416_v58 = vor.u32 %v3415_v33, %v3412_v22 }
  0xd0   : > { %v5564_v9 = vld [vmem:[#allocation3 + $0x10] sm:$0xf0]  ;;  %v269_v55 = vld [vmem:[%s5721_s30 + $0x80] sm:$0xff]  ;;  %v700_v4 = vsel %vm5790_vm5, 0, %v699_v47  ;;  %v1922_v56 = vsel %vm5804_vm8, %v1920_v42, %v1921_v53 }
  0xd1   : > { %v5289_v10 = vor.u32 %v5564_v9, %v5288_v61  ;;  %v1085_v11 = vsel %vm5878_vm14, %v797_v7, %v1084_v62  ;;  %v591_v13 = vpack.c.bf16 %v559_v8, %v559_v8  ;;  %v3925_v14 = vld [vmem:[#allocation2 + $0x28] sm:$0xf]  ;;  %4973 = vst.msk [vmem:[%s5731_s11 + $0x80] sm:$0xff] %vm410_vm1, %v269_v55  ;;  %v3363_v62 = vld [vmem:[#allocation2 + $0x20] sm:$0x1]  ;;  %v1363_v7 = vshrl.u32 %v1248_v46, 16 }
  0xd2   : > { %3237 = vrot.lane.b32.xlu2 %v3171_v6, %s5663_s12  ;;  %1086 = vst [vmem:[#allocation2 + $0x30] sm:$0xf] %v1085_v11  ;;  %v3926_v20 = vld [vmem:[#allocation2 + $0x2c] sm:$0x1]  ;;  %v4026_v21 = vrot.slane %v3925_v14, 5  ;;  %v3425_v6 = vrot.slane %v3423_v45, 4  ;;  %v305_v15 = vmul.f32 %v5716_v2, %v269_v55 }
  0xd3   : > { %5542 = vmatmul.msk.bf16.vlgmr.msra.gmra.mxu3 %vm4641_vm3, %v5289_v10  ;;  %v800_v23 = vshrl.u32 %v591_v13, 16  ;;  %v803_v27 = vshll.u32 %v591_v13, 16  ;;  %v4029_v28 = vrot.slane %v3926_v20, 5  ;;  %v3172_v25 = vld [vmem:[#allocation2 + $0x28] sm:$0xf]  ;;  %v1360_v11 = vrot.slane %v1358_v26, 5 }
  0xd4   : > { %v4027_v31 = vsel %vm5804_vm8, %v5263_v51, %v4026_v21  ;;  %v4028_v32 = vrot.slane %v4026_v21, 4  ;;  %v492_v36 = vpop.f32.mrf.mxu0  ;;  %v1366_v51 = vshll.u32 %v1248_v46, 16  ;;  %v3429_v13 = vshll.u32 %v3363_v62, 16  ;;  %701 = vst [vmem:[#allocation2 + $0x44] sm:$0x1] %v700_v4 }
  0xd5   : > { %v802_v39 = vrot.slane %v800_v23, 7  ;;  %4163 = vst.msk [vmem:[#allocation3 + $0x20] sm:$0xf] %vm616_vm2, %v4027_v31  ;;  %v493_v41 = vadd.f32 %v5865_v44, %v492_v36  ;;  %v1179_v21 = vld [vmem:[#allocation2 + $0x18] sm:$0xf]  ;;  %v3426_v23 = vor.u32 %v3425_v6, %v6025_v35  ;;  %v341_v24 = vadd.f32 %v5726_v3, %v305_v15 }
  0xd6   : > { %3044 = vrot.lane.b32.xlu0 %v2938_v5, %s5664_s13  ;;  %v4030_v43 = vsel %vm5804_vm8, %v4028_v32, %v4029_v28  ;;  %v1356_v5 = vrot.slane %v1355_v57, 4  ;;  %v1365_v28 = vrot.slane %v1363_v7, 4  ;;  %v1368_v32 = vrot.slane %v1366_v51, 5  ;;  %1211 = vst.msk [vmem:[#allocation3 + $0x30] sm:$0xf] %vm616_vm2, %v1179_v21  ;;  %v5617_v51 = vld [vmem:[%s8059_s5 + $0x38] sm:$0xff] }
  0xd7   : > { %2213 = vrot.lane.b32.xlu1 %v2146_v18, %s5665_s16  ;;  %v805_v49 = vor.u32 %v803_v27, %v802_v39  ;;  %v807_v50 = vrot.slane %v802_v39, 4  ;;  %4164 = vst.msk [vmem:[#allocation3 + $0x2c] sm:$0xf] %vm616_vm2, %v4030_v43  ;;  %v560_v54 = vmax.f32 %v493_v41, 0.0  ;;  %v3417_v18 = vrot.slane %v3416_v58, 4  ;;  %v6053_v39 = vpop.permute.xlu0 %2016  ;;  %4690 = vmatpush.bf16.msra.mxu1 %v5617_v51 }
  0xd8   : > { %v1091_v27 = vld [vmem:[#allocation2 + $0x3c] sm:$0xf]  ;;  %v3431_v36 = vrot.slane %v3429_v13, 5  ;;  %v1361_v41 = vsel %vm5830_vm13, %v1356_v5, %v1360_v11  ;;  %v3364_v43 = vld [vmem:[#allocation2 + $0x24] sm:$0xf]  ;;  %v3427_v53 = vrot.slane %v3426_v23, 4 }
  0xd9   : > { %v806_v60 = vsel %vm5888_vm0, %v798_v37, %v805_v49  ;;  %v1089_v61 = vsel %vm5826_vm10, %v807_v50, %v1088_v30  ;;  %v592_v1 = vpack.c.bf16 %v560_v54, %v560_v54  ;;  %v3927_v34 = vld [vmem:[#allocation2 + $0x30] sm:$0xe]  ;;  %v342_v37 = vadd.f32 %v5726_v3, %v306_v29  ;;  %v6064_v46 = vld [vmem:[#allocation2 + $0x28] sm:$0xf]  ;;  %v2837_v47 = vld [vmem:[#allocation2 + $0x20] sm:$0x1] }
  0xda   : > { %2215 = vrot.lane.b32.xlu2 %v2147_v38, %s5665_s16  ;;  %1087 = vst.msk [vmem:[#allocation2 + $0x34] sm:$0xf] %vm616_vm2, %v806_v60  ;;  %v373_v38 = vmax.f32 %v341_v24, 0.0  ;;  %v3422_v3 = vsel %vm5830_vm13, %v3417_v18, %v6025_v35  ;;  %v5264_v50 = vrot.slane %v3927_v34, 9  ;;  %v1369_v54 = vor.u32 %v1368_v32, %v1365_v28  ;;  %v2148_v58 = vld [vmem:[#allocation2 + $0x28] sm:$0xf] }
  0xdb   : > { %1090 = vst [vmem:[#allocation2 + $0x38] sm:$0x1] %v1089_v61  ;;  %v809_v8 = vshrl.u32 %v592_v1, 16  ;;  %v812_v9 = vshll.u32 %v592_v1, 16  ;;  %v374_v49 = vmax.f32 %v342_v37, 0.0  ;;  %v3434_v59 = vshrl.u32 %v3364_v43, 16 }
  0xdc   : > { %v5300_v10 = vld [vmem:[#allocation3 + $0x20] sm:$0xf]  ;;  %v494_v14 = vpop.f32.mrf.mxu0  ;;  %v3437_v60 = vshll.u32 %v3364_v43, 16  ;;  %v1372_v1 = vshll.u32 %v6064_v46, 16  ;;  %v6071_v4 = vld [vmem:[#allocation2 + $0x28] sm:$0xf] }
  0xdd   : > { %v6045_v19 = vrot.slane %v809_v8, 7  ;;  %v495_v20 = vadd.f32 %v5865_v44, %v494_v14  ;;  %v397_v61 = vpack.c.bf16 %v374_v49, %v373_v38  ;;  %v1095_v7 = vld [vmem:[#allocation2 + $0x44] sm:$0x1]  ;;  %v2940_v11 = vrot.slane %v2837_v47, 5  ;;  %v5616_v28 = vld [vmem:[%s8059_s5 + $0x30] sm:$0xff]  ;;  %v5615_v38 = vld [vmem:[%s8059_s5 + $0x28] sm:$0xff] }
  0xde   : > { %3239 = vrot.lane.b32.xlu0 %v3172_v25, %s5663_s12  ;;  %v5567_v22 = vld [vmem:[#allocation3 + $0x28] sm:$0xf0]  ;;  %v1370_v15 = vrot.slane %v1369_v54, 4  ;;  %v3436_v5 = vrot.slane %v3434_v59, 4  ;;  %v3439_v18 = vrot.slane %v3437_v60, 5  ;;  %v6087_v21 = vrot.slane %v1372_v1, 5  ;;  %4691 = vmatpush.bf16.msra.mxu1 %v5616_v28 }
  0xdf   : > { %2024 = vrot.lane.b32.xlu1 %v1922_v56, %s5663_s12  ;;  %v5301_v30 = vor.u32 %v5567_v22, %v5300_v10  ;;  %v814_v31 = vor.u32 %v812_v9, %v6045_v19  ;;  %v561_v33 = vmax.f32 %v495_v20, 0.0  ;;  %v815_v35 = vrot.slane %v6045_v19, 4  ;;  %5222 = vmatmul.msk.bf16.gmra.mxu0 %vm410_vm1, %v397_v61  ;;  %v1176_v56 = vld [vmem:[#allocation2 + $0x4] sm:$0xf]  ;;  %v1814_v29 = vld [vmem:[#allocation2 + $0x2c] sm:$0x1] }
  0xe0   : > { %v2939_v10 = vrot.slane %v2937_v63, 4  ;;  %1208 = vst.msk [vmem:[#allocation3 + $0xc] sm:$0xf] %vm616_vm2, %v1176_v56  ;;  %v3432_v20 = vsel %vm5830_vm13, %v3427_v53, %v3431_v36  ;;  %v1925_v23 = vrot.slane %v6071_v4, 5  ;;  %v3365_v24 = vld [vmem:[#allocation2 + $0x28] sm:$0xf]  ;;  %v3440_v32 = vor.u32 %v3439_v18, %v3436_v5 }
  0xe1   : > { %v1092_v2 = vsel %vm5878_vm14, %v814_v31, %v1091_v27  ;;  %v593_v42 = vpack.c.bf16 %v561_v33, %v561_v33  ;;  %v3928_v45 = vld [vmem:[#allocation2 + $0x34] sm:$0xf]  ;;  %v1677_v27 = vpop.permute.xlu0 %1676  ;;  %v6105_v33 = vld [vmem:[#allocation2 + $0x28] sm:$0xf]  ;;  %v2337_v34 = vld [vmem:[#allocation2 + $0x10] sm:$0xf] }
  0xe2   : > { %1684 = vrot.lane.b32.xlu2 %v1361_v41, %s5664_s13  ;;  %1093 = vst [vmem:[#allocation2 + $0x3c] sm:$0xf] %v1092_v2  ;;  %v3929_v26 = vld [vmem:[#allocation2 + $0x38] sm:$0x1]  ;;  %v4033_v62 = vrot.slane %v3928_v45, 5  ;;  %v2941_v31 = vsel %vm5804_vm8, %v2939_v10, %v2940_v11  ;;  %v5233_v36 = vrot.slane %v1812_v48, 9  ;;  %4692 = vmatpush.bf16.msra.mxu1 %v5615_v38 }
  0xe3   : > { %5543 = vmatmul.msk.bf16.gmra.mxu3 %vm4641_vm3, %v5301_v30  ;;  %v817_v55 = vshrl.u32 %v593_v42, 16  ;;  %v820_v57 = vshll.u32 %v593_v42, 16  ;;  %v4036_v6 = vrot.slane %v3929_v26, 5  ;;  %v1375_v30 = vsel %vm5830_vm13, %v1370_v15, %v6087_v21  ;;  %1772 = vst.msk [vmem:[#allocation3 + $0xc] sm:$0xf] %vm1770_vm4, %v1677_v27 }
  0xe4   : > { %v4034_v8 = vsel %vm5804_vm8, %v5264_v50, %v4033_v62  ;;  %v4035_v9 = vrot.slane %v4033_v62, 4  ;;  %v3367_v37 = vld [vmem:[#allocation2 + $0x30] sm:$0xf]  ;;  %2112 = vst.msk [vmem:[#allocation3 + $0xc] sm:$0xf] %vm2110_vm6, %v6053_v39  ;;  %v1927_v41 = vrot.slane %v1925_v23, 4  ;;  %v1926_v39 = vsel %vm5804_vm8, %v5233_v36, %v1925_v23  ;;  %v497_v10 = vpop.f32.mrf.mxu0 }
  0xe5   : > { %v819_v25 = vrot.slane %v817_v55, 7  ;;  %4165 = vst.msk [vmem:[#allocation3 + $0x38] sm:$0xf] %vm616_vm2, %v4034_v8  ;;  %v1928_v2 = vrot.slane %v1814_v29, 5  ;;  %v3443_v42 = vshll.u32 %v3365_v24, 16  ;;  %v3447_v45 = vshrl.u32 %v3365_v24, 16 }
  0xe6   : > { %2217 = vrot.lane.b32.xlu0 %v2148_v58, %s5665_s16  ;;  %v4037_v19 = vsel %vm5804_vm8, %v4035_v9, %v4036_v6  ;;  %v2944_v47 = vrot.slane %v6105_v33, 5  ;;  %v2840_v49 = vld [vmem:[#allocation2 + $0x2c] sm:$0x1]  ;;  %v3441_v50 = vrot.slane %v3440_v32, 4  ;;  %v3458_v54 = vshrl.u32 %v3367_v37, 16  ;;  %v5614_v62 = vld [vmem:[%s8059_s5 + $0x20] sm:$0xff] }
  0xe7   : > { %3793 = vrot.lane.b32.xlu1 %v3422_v3, %s5665_s16  ;;  %v822_v13 = vor.u32 %v820_v57, %v819_v25  ;;  %v824_v14 = vrot.slane %v819_v25, 4  ;;  %4166 = vst.msk [vmem:[#allocation3 + $0x44] sm:$0xf] %vm616_vm2, %v4037_v19  ;;  %v2838_v3 = vld [vmem:[#allocation2 + $0x24] sm:$0xe]  ;;  %v3461_v55 = vshll.u32 %v3367_v37, 16  ;;  %v1929_v60 = vsel %vm5804_vm8, %v1927_v41, %v1928_v2  ;;  %4693 = vmatpush.bf16.msra.mxu1 %v5614_v62 }
  0xe8   : > { %v3366_v26 = vld [vmem:[#allocation2 + $0x2c] sm:$0x1]  ;;  %v2394_v58 = vshll.u32 %v2337_v34, 16  ;;  %v1376_v59 = vshrl.u32 %v6064_v46, 16  ;;  %v3445_v61 = vrot.slane %v3443_v42, 5  ;;  %v5248_v1 = vrot.slane %v2838_v3, 9 }
  0xe9   : > { %v823_v63 = vsel %vm5888_vm0, %v815_v35, %v822_v13  ;;  %v1096_v22 = vsel %vm5826_vm10, %v824_v14, %v1095_v7  ;;  %v2398_v35 = vshrl.u32 %v2337_v34, 16  ;;  %v2946_v4 = vrot.slane %v2944_v47, 4  ;;  %v6128_v8 = vld [vmem:[#allocation2 + $0x34] sm:$0xf]  ;;  %v646_v56 = vld [vmem:[#allocation2 + $0x48] sm:$0x1] }
  0xea   : > { %3795 = vrot.lane.b32.xlu2 %v3432_v20, %s5665_s16  ;;  %1094 = vst.msk [vmem:[#allocation2 + $0x40] sm:$0xf] %vm616_vm2, %v823_v63  ;;  %v2947_v25 = vrot.slane %v2840_v49, 5  ;;  %v3449_v6 = vrot.slane %v3447_v45, 4  ;;  %v3446_v46 = vsel %vm5830_vm13, %v3441_v50, %v3445_v61  ;;  %v3453_v7 = vshll.u32 %v3366_v26, 16  ;;  %v271_v13 = vld [vmem:[%s5721_s30 + $0x90] sm:$0xff] }
  0xeb   : > { %1097 = vst [vmem:[#allocation2 + $0x44] sm:$0x1] %v1096_v22  ;;  %v6130_v9 = vrot.slane %v3458_v54, 4  ;;  %v6132_v51 = vrot.slane %v3461_v55, 5  ;;  %v647_v11 = vsel %vm5826_vm10, 0, %v646_v56  ;;  %v272_v14 = vld [vmem:[%s5721_s30 + $0x98] sm:$0xff]  ;;  %v498_v18 = vadd.f32 %v5865_v44, %v497_v10 }
  0xec   : > { %v5312_v43 = vld [vmem:[#allocation3 + $0x38] sm:$0xf]  ;;  %v1175_v15 = vld [vmem:[#allocation2] sm:$0xf]  ;;  %v6140_v5 = vrot.slane %v2394_v58, 5  ;;  %v5613_v63 = vld [vmem:[%s8059_s5 + $0x18] sm:$0xff]  ;;  %v2945_v27 = vsel %vm5804_vm8, %v5248_v1, %v2944_v47  ;;  %v2948_v28 = vsel %vm5804_vm8, %v2946_v4, %v2947_v25  ;;  %v3450_v29 = vor.u32 %v3449_v6, %v3445_v61  ;;  %v2015_v58 = vpop.permute.xlu2 %2014  ;;  %v499_v1 = vpop.f32.mrf.mxu0 }
  0xed   : > { %648 = vst [vmem:[#allocation2 + $0x48] sm:$0x1] %v647_v11  ;;  %v6146_v19 = vld [vmem:[%s8055_s1] ss:$0 sm:$0xff]  ;;  %v3930_v22 = vld [vmem:[#allocation2 + $0x3c] sm:$0xe]  ;;  %4694 = vmatpush.bf16.msra.mxu1 %v5613_v63  ;;  %v3464_v41 = vor.u32 %v6132_v51, %v6130_v9  ;;  %v500_v9 = vadd.f32 %v5865_v44, %v499_v1 }
  0xee   : > { %1686 = vrot.lane.b32.xlu0 %v1375_v30, %s5664_s13  ;;  %v5570_v53 = vld [vmem:[#allocation3 + $0x40] sm:$0xf0]  ;;  %v307_v20 = vmul.f32 %v6146_v19, %v271_v13  ;;  %v308_v48 = vmul.f32 %v6146_v19, %v272_v14  ;;  %v6153_v23 = vrot.slane %v2398_v35, 4  ;;  %4975 = vst.msk [vmem:[%s5731_s11 + $0x90] sm:$0xff] %vm410_vm1, %v271_v13  ;;  %v562_v32 = vmax.f32 %v498_v18, 0.0  ;;  %v5612_v50 = vld [vmem:[%s8059_s5 + $0x10] sm:$0xff] }
  0xef   : > { %3046 = vrot.lane.b32.xlu1 %v2941_v31, %s5664_s13  ;;  %v5313_v57 = vor.u32 %v5570_v53, %v5312_v43  ;;  %v5265_v31 = vrot.slane %v3930_v22, 9  ;;  %v6164_v33 = vld [vmem:[%s8056_s2] ss:$0 sm:$0xff]  ;;  %4976 = vst.msk [vmem:[%s5731_s11 + $0x98] sm:$0xff] %vm410_vm1, %v272_v14  ;;  %v3455_v38 = vrot.slane %v3453_v7, 5  ;;  %v3467_v2 = vshll.u32 %v6128_v8, 16 }
  0xf0   : > { %v343_v34 = vadd.f32 %v6164_v33, %v307_v20  ;;  %v344_v36 = vadd.f32 %v6164_v33, %v308_v48  ;;  %1207 = vst.msk [vmem:[#allocation3] sm:$0xf] %vm616_vm2, %v1175_v15  ;;  %v3173_v43 = vld [vmem:[#allocation2 + $0x30] sm:$0xf]  ;;  %v594_v45 = vpack.c.bf16 %v562_v32, %v562_v32  ;;  %v2336_v53 = vld [vmem:[#allocation2 + $0xc] sm:$0xf]  ;;  %v2401_v26 = vor.u32 %v6153_v23, %v6140_v5 }
  0xf1   : > { %v3931_v24 = vld [vmem:[#allocation2 + $0x40] sm:$0xf]  ;;  %v3451_v54 = vrot.slane %v3450_v29, 4  ;;  %v6180_v55 = vrot.slane %v1376_v59, 4  ;;  %4695 = vmatpush.bf16.msra.mxu1 %v5612_v50  ;;  %v2385_v35 = vshrl.u32 %v2336_v53, 16  ;;  %v3465_v6 = vrot.slane %v3464_v41, 4 }
  0xf2   : > { %2026 = vrot.lane.b32.xlu2 %v1926_v39, %s5663_s12  ;;  %v3932_v30 = vld [vmem:[#allocation2 + $0x44] sm:$0x1]  ;;  %v4040_v37 = vrot.slane %v3931_v24, 5  ;;  %v375_v3 = vmax.f32 %v343_v34, 0.0  ;;  %v376_v47 = vmax.f32 %v344_v36, 0.0  ;;  %v1675_v39 = vpop.permute.xlu0 %1674  ;;  %v829_v61 = vshll.u32 %v594_v45, 16 }
  0xf3   : > { %5544 = vmatmul.msk.bf16.gmra.mxu3 %vm4641_vm3, %v5313_v57  ;;  %v4043_v42 = vrot.slane %v3932_v30, 5  ;;  %1771 = vst.msk [vmem:[#allocation3] sm:$0xf] %vm1770_vm4, %v1675_v39  ;;  %v702_v4 = vld [vmem:[#allocation2 + $0x50] sm:$0x1]  ;;  %v5611_v56 = vld [vmem:[%s8059_s5 + $0x8] sm:$0xff]  ;;  %v3456_v44 = vsel %vm5830_vm13, %v3451_v54, %v3455_v38  ;;  %v1379_v38 = vor.u32 %v6180_v55, %v6087_v21 }
  0xf4   : > { %v4041_v49 = vsel %vm5804_vm8, %v5265_v31, %v4040_v37  ;;  %v4042_v57 = vrot.slane %v4040_v37, 4  ;;  %v398_v62 = vpack.c.bf16 %v376_v47, %v375_v3  ;;  %2111 = vst.msk [vmem:[#allocation3] sm:$0xf] %vm2110_vm6, %v2015_v58  ;;  %v1177_v25 = vld [vmem:[#allocation2 + $0xc] sm:$0xf]  ;;  %v703_v51 = vsel %vm5790_vm5, 0, %v702_v4 }
  0xf5   : > { %4167 = vst.msk [vmem:[#allocation3 + $0x50] sm:$0xf] %vm616_vm2, %v4041_v49  ;;  %v1098_v10 = vld [vmem:[#allocation2 + $0x48] sm:$0xf]  ;;  %v2387_v11 = vrot.slane %v2385_v35, 4  ;;  %v2388_v13 = vshll.u32 %v2336_v53, 16  ;;  %4696 = vmatpush.bf16.msra.mxu1 %v5611_v56 }
  0xf6   : > { %2028 = vrot.lane.b32.xlu0 %v1929_v60, %s5663_s12  ;;  %v826_v60 = vshrl.u32 %v594_v45, 16  ;;  %v4044_v59 = vsel %vm5804_vm8, %v4042_v57, %v4043_v42  ;;  %5223 = vmatmul.msk.bf16.gmra.mxu0 %vm410_vm1, %v398_v62  ;;  %704 = vst [vmem:[#allocation2 + $0x50] sm:$0x1] %v703_v51  ;;  %v563_v15 = vmax.f32 %v500_v9, 0.0  ;;  %v2338_v18 = vld [vmem:[#allocation2 + $0x14] sm:$0x1] }
  0xf7   : > { %3797 = vrot.lane.b32.xlu1 %v3446_v46, %s5665_s16  ;;  %v1250_v46 = vld [vmem:[#allocation2 + $0x2c] sm:$0x1]  ;;  %4168 = vst.msk [vmem:[#allocation3 + $0x5c] sm:$0xf] %vm616_vm2, %v4044_v59  ;;  %v2402_v20 = vrot.slane %v2401_v26, 4  ;;  %v2390_v48 = vrot.slane %v2388_v13, 5 }
  0xf8   : > { %v6191_v7 = vrot.slane %v826_v60, 7  ;;  %1209 = vst.msk [vmem:[#allocation3 + $0x18] sm:$0xf] %vm616_vm2, %v1177_v25  ;;  %v2404_v63 = vshll.u32 %v2338_v18, 16  ;;  %v1180_v22 = vld [vmem:[#allocation2 + $0x1c] sm:$0xf]  ;;  %v595_v24 = vpack.c.bf16 %v563_v15, %v563_v15 }
  0xf9   : > { %v1178_v23 = vld [vmem:[#allocation2 + $0x10] sm:$0xf]  ;;  %v5610_v30 = vld [vmem:[%s8059_s5] sm:$0xff]  ;;  %1212 = vst.msk [vmem:[#allocation3 + $0x3c] sm:$0xf] %vm616_vm2, %v1180_v22  ;;  %v1382_v31 = vshll.u32 %v1250_v46, 16  ;;  %v2391_v34 = vor.u32 %v2390_v48, %v2387_v11 }
  0xfa   : > { %3048 = vrot.lane.b32.xlu2 %v2945_v27, %s5664_s13  ;;  %v831_v14 = vor.u32 %v829_v61, %v6191_v7  ;;  %v6206_v27 = vrot.slane %v3467_v2, 5  ;;  %v2406_v36 = vrot.slane %v2404_v63, 5  ;;  %v834_v41 = vshrl.u32 %v595_v24, 16  ;;  %4697 = vmatpush.bf16.msra.mxu1 %v5610_v30  ;;  %1210 = vst.msk [vmem:[#allocation3 + $0x24] sm:$0xf] %vm616_vm2, %v1178_v23 }
  0xfb   : > { %v837_v2 = vshll.u32 %v595_v24, 16  ;;  %v2339_v42 = vld [vmem:[#allocation2 + $0x18] sm:$0xf]  ;;  %v1251_v45 = vld [vmem:[#allocation2 + $0x30] sm:$0xf]  ;;  %v832_v47 = vrot.slane %v6191_v7, 4 }
  0xfc   : > { %v1099_v29 = vsel %vm5878_vm14, %v831_v14, %v1098_v10  ;;  %v5324_v32 = vld [vmem:[#allocation3 + $0x50] sm:$0xf]  ;;  %v3470_v37 = vsel %vm5830_vm13, %v3465_v6, %v6206_v27  ;;  %v2407_v3 = vsel %vm5830_vm13, %v2402_v20, %v2406_v36  ;;  %v836_v50 = vrot.slane %v834_v41, 7  ;;  %v2340_v53 = vld [vmem:[#allocation2 + $0x1c] sm:$0xf] }
  0xfd   : > { %1100 = vst [vmem:[#allocation2 + $0x48] sm:$0xf] %v1099_v29  ;;  %v1102_v21 = vld [vmem:[#allocation2 + $0x50] sm:$0x1]  ;;  %v3174_v54 = vld [vmem:[#allocation2 + $0x34] sm:$0xf] }
  0xfe   : > { %3050 = vrot.lane.b32.xlu0 %v2948_v28, %s5664_s13  ;;  %v2149_v28 = vld [vmem:[#allocation2 + $0x30] sm:$0xf]  ;;  %v1384_v55 = vrot.slane %v1382_v31, 5  ;;  %v2392_v39 = vrot.slane %v2391_v34, 4  ;;  %2801 = vst.msk [vmem:[#allocation3 + $0x10] sm:$0xf] %vm616_vm2, %v2407_v3  ;;  %v839_v35 = vor.u32 %v837_v2, %v836_v50 }
  0xff   : > { %3241 = vrot.lane.b32.xlu1 %v3173_v43, %s5663_s12  ;;  %v5573_v43 = vld [vmem:[#allocation3 + $0x58] sm:$0xf0]  ;;  %v2409_v57 = vshrl.u32 %v2339_v42, 16  ;;  %v2412_v26 = vshll.u32 %v2339_v42, 16  ;;  %v1380_v58 = vrot.slane %v1379_v38, 4  ;;  %v1387_v62 = vshrl.u32 %v1251_v45, 16 }
 0x100   : > { %v5325_v49 = vor.u32 %v5573_v43, %v5324_v32  ;;  %v1815_v60 = vld [vmem:[#allocation2 + $0x30] sm:$0xe]  ;;  %v1252_v61 = vld [vmem:[#allocation2 + $0x34] sm:$0xf]  ;;  %v841_v59 = vrot.slane %v836_v50, 4  ;;  %v1390_v4 = vshll.u32 %v1251_v45, 16  ;;  %v2397_v25 = vsel %vm5830_vm13, %v2392_v39, %v6140_v5 }
 0x101   : > { %v3175_v1 = vld [vmem:[#allocation2 + $0x3c] sm:$0xf]  ;;  %v2411_v6 = vrot.slane %v2409_v57, 4  ;;  %v2414_v46 = vrot.slane %v2412_v26, 5  ;;  %v6231_v7 = vld [vmem:[#allocation2 + $0x34] sm:$0xf]  ;;  %v840_v9 = vsel %vm5888_vm0, %v832_v47, %v839_v35  ;;  %v1385_v14 = vsel %vm5830_vm13, %v1380_v58, %v1384_v55 }
 0x102   : > { %3799 = vrot.lane.b32.xlu2 %v3456_v44, %s5665_s16  ;;  %v1103_v51 = vsel %vm5826_vm10, %v841_v59, %v1102_v21  ;;  %2800 = vst.msk [vmem:[#allocation3 + $0x4] sm:$0xf] %vm616_vm2, %v2397_v25  ;;  %v2418_v56 = vshll.u32 %v2340_v53, 16  ;;  %v1396_v10 = vshll.u32 %v1252_v61, 16  ;;  %v1400_v11 = vshrl.u32 %v1252_v61, 16  ;;  %v273_v50 = vld [vmem:[%s5721_s30 + $0xa0] sm:$0xff] }
 0x103   : > { %5545 = vmatmul.msk.bf16.gmra.mxu3 %vm4641_vm3, %v5325_v49  ;;  %1101 = vst.msk [vmem:[#allocation2 + $0x4c] sm:$0xf] %vm616_vm2, %v840_v9  ;;  %v2415_v5 = vor.u32 %v2414_v46, %v2411_v6  ;;  %v1253_v15 = vld [vmem:[#allocation2 + $0x38] sm:$0x1]  ;;  %v2422_v18 = vshrl.u32 %v2340_v53, 16  ;;  %v5234_v20 = vrot.slane %v1815_v60, 9  ;;  %v309_v57 = vmul.f32 %v6146_v19, %v273_v50 }
 0x104   : > { %1104 = vst [vmem:[#allocation2 + $0x50] sm:$0x1] %v1103_v51  ;;  %v1932_v44 = vrot.slane %v6231_v7, 5  ;;  %v1389_v48 = vrot.slane %v1387_v62, 4  ;;  %v1392_v63 = vrot.slane %v1390_v4, 5  ;;  %v3471_v22 = vshrl.u32 %v6128_v8, 16  ;;  %v502_v62 = vpop.f32.mrf.mxu0 }
 0x105   : > { %v6246_v23 = vld [vmem:[#allocation2 + $0x30] sm:$0xe]  ;;  %v2420_v29 = vrot.slane %v2418_v56, 5  ;;  %v2150_v24 = vld [vmem:[#allocation2 + $0x34] sm:$0xf]  ;;  %v6248_v30 = vrot.slane %v1396_v10, 5  ;;  %v345_v6 = vadd.f32 %v6164_v33, %v309_v57 }
 0x106   : > { %3801 = vrot.lane.b32.xlu0 %v3470_v37, %s5665_s16  ;;  %v1402_v31 = vrot.slane %v1400_v11, 4  ;;  %v1406_v32 = vshll.u32 %v1253_v15, 16  ;;  %v6250_v34 = vld [vmem:[#allocation2 + $0x34] sm:$0xf]  ;;  %v2342_v36 = vld [vmem:[#allocation2 + $0x24] sm:$0xf]  ;;  %v1933_v43 = vsel %vm5804_vm8, %v5234_v20, %v1932_v44  ;;  %v1393_v45 = vor.u32 %v1392_v63, %v1389_v48 }
 0x107   : > { %2219 = vrot.lane.b32.xlu1 %v2149_v28, %s5665_s16  ;;  %v2416_v28 = vrot.slane %v2415_v5, 4  ;;  %v2433_v38 = vshrl.u32 %v2342_v36, 16  ;;  %v2436_v41 = vshll.u32 %v2342_v36, 16  ;;  %v2341_v8 = vld [vmem:[#allocation2 + $0x20] sm:$0x1]  ;;  %v2424_v2 = vrot.slane %v2422_v18, 4 }
 0x108   : > { %v2151_v42 = vld [vmem:[#allocation2 + $0x3c] sm:$0xf]  ;;  %v6259_v3 = vld [vmem:[#allocation2 + $0x28] sm:$0xf]  ;;  %v5249_v47 = vrot.slane %v6246_v23, 9  ;;  %v3473_v49 = vrot.slane %v3471_v22, 4  ;;  %v1403_v55 = vor.u32 %v1402_v31, %v6248_v30 }
 0x109   : > { %v2421_v37 = vsel %vm5830_vm13, %v2416_v28, %v2420_v29  ;;  %v274_v21 = vld [vmem:[%s5721_s30 + $0xa8] sm:$0xff]  ;;  %v2435_v53 = vrot.slane %v2433_v38, 4  ;;  %v3369_v39 = vld [vmem:[#allocation2 + $0x38] sm:$0x1]  ;;  %4977 = vst.msk [vmem:[%s5731_s11 + $0xa0] sm:$0xff] %vm410_vm1, %v273_v50  ;;  %v2428_v58 = vshll.u32 %v2341_v8, 16 }
 0x10a   : > { %3243 = vrot.lane.b32.xlu2 %v3174_v54, %s5663_s12  ;;  %2802 = vst.msk [vmem:[#allocation3 + $0x1c] sm:$0xf] %vm616_vm2, %v2421_v37  ;;  %v2438_v54 = vrot.slane %v2436_v41, 5  ;;  %v310_v26 = vmul.f32 %v6146_v19, %v274_v21  ;;  %v2951_v61 = vrot.slane %v6250_v34, 5  ;;  %v2442_v59 = vshll.u32 %v6259_v3, 16 }
 0x10b   : > { %4978 = vst.msk [vmem:[%s5731_s11 + $0xa8] sm:$0xff] %vm410_vm1, %v274_v21  ;;  %v1394_v4 = vrot.slane %v1393_v45, 4  ;;  %v1408_v25 = vrot.slane %v1406_v32, 5  ;;  %v649_v9 = vld [vmem:[#allocation2 + $0x54] sm:$0x1]  ;;  %v3474_v10 = vor.u32 %v3473_v49, %v6206_v27  ;;  %v3477_v11 = vshll.u32 %v3369_v39, 16 }
 0x10c   : > { %v2210_v13 = vpop.permute.xlu2 %2209  ;;  %v2439_v35 = vor.u32 %v2438_v54, %v2435_v53  ;;  %v346_v46 = vadd.f32 %v6164_v33, %v310_v26  ;;  %v1817_v51 = vld [vmem:[#allocation2 + $0x38] sm:$0x1]  ;;  %v6280_v56 = vld [vmem:[#allocation2 + $0x3c] sm:$0xe]  ;;  %v6286_v5 = vld [vmem:[%s8058_s4] ss:$0 sm:$0xff]  ;;  %v2952_v7 = vsel %vm5804_vm8, %v5249_v47, %v2951_v61  ;;  %v504_v39 = vpop.f32.mrf.mxu0 }
 0x10d   : > { %2305 = vst.msk [vmem:[#allocation3 + $0xc] sm:$0xf] %vm2303_vm7, %v2210_v13  ;;  %v503_v13 = vadd.f32 %v6286_v5, %v502_v62  ;;  %v1404_v15 = vrot.slane %v1403_v55, 4  ;;  %v377_v18 = vmax.f32 %v345_v6, 0.0  ;;  %v2430_v48 = vrot.slane %v2428_v58, 5 }
 0x10e   : > { %3245 = vrot.lane.b32.xlu0 %v3175_v1, %s5663_s12  ;;  %v2425_v1 = vor.u32 %v2424_v2, %v2420_v29  ;;  %v378_v20 = vmax.f32 %v346_v46, 0.0  ;;  %v2440_v22 = vrot.slane %v2439_v35, 4  ;;  %v6291_v23 = vrot.slane %v2442_v59, 5  ;;  %v1181_v27 = vld [vmem:[#allocation2 + $0x24] sm:$0xf] }
 0x10f   : > { %1688 = vrot.lane.b32.xlu1 %v1385_v14, %s5664_s13  ;;  %v650_v14 = vsel %vm5826_vm10, 0, %v649_v9  ;;  %v564_v63 = vmax.f32 %v503_v13, 0.0  ;;  %v1399_v29 = vsel %vm5830_vm13, %v1394_v4, %v6248_v30  ;;  %v1935_v31 = vrot.slane %v1817_v51, 5  ;;  %v705_v41 = vld [vmem:[#allocation2 + $0x5c] sm:$0x1] }
 0x110   : > { %651 = vst [vmem:[#allocation2 + $0x54] sm:$0x1] %v650_v14  ;;  %v2426_v28 = vrot.slane %v2425_v1, 4  ;;  %v399_v32 = vpack.c.bf16 %v378_v20, %v377_v18  ;;  %v6299_v36 = vrot.slane %v3474_v10, 4  ;;  %v6301_v37 = vrot.slane %v3477_v11, 5 }
 0x111   : > { %v596_v38 = vpack.c.bf16 %v564_v63, %v564_v63  ;;  %v2445_v8 = vsel %vm5830_vm13, %v2440_v22, %v6291_v23  ;;  %1213 = vst.msk [vmem:[#allocation3 + $0x48] sm:$0xf] %vm616_vm2, %v1181_v27  ;;  %v5235_v30 = vrot.slane %v6280_v56, 9  ;;  %v3370_v2 = vld [vmem:[#allocation2 + $0x3c] sm:$0xf]  ;;  %v1409_v49 = vsel %vm5830_vm13, %v1404_v15, %v1408_v25 }
 0x112   : > { %2221 = vrot.lane.b32.xlu2 %v2150_v24, %s5665_s16  ;;  %v1934_v24 = vrot.slane %v1932_v44, 4  ;;  %v6311_v44 = vld [vmem:[#allocation2 + $0x40] sm:$0xf]  ;;  %5224 = vmatmul.msk.bf16.gmra.mxu0 %vm410_vm1, %v399_v32  ;;  %2804 = vst.msk [vmem:[#allocation3 + $0x34] sm:$0xf] %vm616_vm2, %v2445_v8  ;;  %v2431_v53 = vsel %vm5830_vm13, %v2426_v28, %v2430_v48  ;;  %v3482_v26 = vshrl.u32 %v3370_v2, 16  ;;  %v505_v35 = vadd.f32 %v6286_v5, %v504_v39 }
 0x113   : > { %v3371_v50 = vld [vmem:[#allocation2 + $0x40] sm:$0xf]  ;;  %v843_v47 = vshrl.u32 %v596_v38, 16  ;;  %v846_v21 = vshll.u32 %v596_v38, 16  ;;  %v2843_v54 = vld [vmem:[#allocation2 + $0x38] sm:$0x1] }
 0x114   : > { %v6270_v60 = vpop.permute.xlu2 %2020  ;;  %v6327_v55 = vld [vmem:[#allocation2 + $0x3c] sm:$0xe]  ;;  %v6329_v57 = vld [vmem:[#allocation2 + $0x40] sm:$0xf]  ;;  %v3485_v58 = vshll.u32 %v3370_v2, 16  ;;  %v1936_v59 = vsel %vm5804_vm8, %v1934_v24, %v1935_v31  ;;  %v3491_v1 = vshll.u32 %v3371_v50, 16 }
 0x115   : > { %v6331_v62 = vrot.slane %v843_v47, 7  ;;  %v2446_v25 = vshrl.u32 %v6259_v3, 16  ;;  %2803 = vst.msk [vmem:[#allocation3 + $0x28] sm:$0xf] %vm616_vm2, %v2431_v53  ;;  %v1939_v6 = vrot.slane %v6311_v44, 5  ;;  %v2953_v46 = vrot.slane %v2951_v61, 4 }
 0x116   : > { %2223 = vrot.lane.b32.xlu0 %v2151_v42, %s5665_s16  ;;  %v706_v42 = vsel %vm5790_vm5, 0, %v705_v41  ;;  %v565_v51 = vmax.f32 %v505_v35, 0.0  ;;  %v1182_v56 = vld [vmem:[#allocation2 + $0x28] sm:$0xf]  ;;  %v2954_v10 = vrot.slane %v2843_v54, 5  ;;  %v5250_v11 = vrot.slane %v6327_v55, 9 }
 0x117   : > { %2030 = vrot.lane.b32.xlu1 %v1933_v43, %s5663_s12  ;;  %707 = vst [vmem:[#allocation2 + $0x5c] sm:$0x1] %v706_v42  ;;  %v1105_v4 = vld [vmem:[#allocation2 + $0x54] sm:$0xf]  ;;  %v848_v9 = vor.u32 %v846_v21, %v6331_v62  ;;  %v2958_v13 = vrot.slane %v6329_v57, 5  ;;  %v3495_v14 = vshrl.u32 %v3371_v50, 16  ;;  %v1940_v28 = vsel %vm5804_vm8, %v5235_v30, %v1939_v6 }
 0x118   : > { %1214 = vst.msk [vmem:[#allocation3 + $0x54] sm:$0xf] %vm616_vm2, %v1182_v56  ;;  %v5563_v3 = vld [vmem:[#allocation3 + $0x8] sm:$0xf0]  ;;  %v6346_v15 = vrot.slane %v3482_v26, 4  ;;  %v6348_v18 = vrot.slane %v3485_v58, 5  ;;  %v597_v61 = vpack.c.bf16 %v565_v51, %v565_v51  ;;  %v2955_v21 = vsel %vm5804_vm8, %v2953_v46, %v2954_v10 }
 0x119   : > { %v1106_v34 = vsel %vm5878_vm14, %v848_v9, %v1105_v4  ;;  %v6352_v20 = vld [vmem:[#allocation2 + $0x2c] sm:$0x1]  ;;  %v6354_v48 = vrot.slane %v3491_v1, 5  ;;  %v3933_v63 = vld [vmem:[#allocation2 + $0x48] sm:$0xe]  ;;  %v2448_v22 = vrot.slane %v2446_v25, 4 }
 0x11a   : > { %1690 = vrot.lane.b32.xlu2 %v1399_v29, %s5664_s13  ;;  %1107 = vst [vmem:[#allocation2 + $0x54] sm:$0xf] %v1106_v34  ;;  %v3480_v29 = vsel %vm5830_vm13, %v6299_v36, %v6301_v37  ;;  %v851_v31 = vshrl.u32 %v597_v61, 16  ;;  %v854_v32 = vshll.u32 %v597_v61, 16  ;;  %v3934_v38 = vld [vmem:[#allocation2 + $0x4c] sm:$0xf]  ;;  %v3488_v46 = vor.u32 %v6348_v18, %v6346_v15 }
 0x11b   : > { %v6367_v8 = vld [vmem:[#allocation2 + $0x44] sm:$0x1]  ;;  %v3935_v30 = vld [vmem:[#allocation2 + $0x50] sm:$0x1]  ;;  %v5266_v36 = vrot.slane %v3933_v63, 9  ;;  %v849_v37 = vrot.slane %v6331_v62, 4  ;;  %v2449_v58 = vor.u32 %v2448_v22, %v6291_v23  ;;  %v2959_v63 = vsel %vm5804_vm8, %v5250_v11, %v2958_v13 }
 0x11c   : > { %v6318_v43 = vpop.permute.xlu2 %3233  ;;  %v2208_v45 = vpop.permute.xlu1 %2207  ;;  %v853_v2 = vrot.slane %v851_v31, 7  ;;  %v4047_v42 = vrot.slane %v3934_v38, 5  ;;  %v276_v54 = vld [vmem:[%s5721_s30 + $0xb8] sm:$0xff]  ;;  %v2452_v62 = vshll.u32 %v6352_v20, 16  ;;  %v3176_v51 = vld [vmem:[#allocation2 + $0x40] sm:$0xf] }
 0x11d   : > { %2304 = vst.msk [vmem:[#allocation3] sm:$0xf] %vm2303_vm7, %v2208_v45  ;;  %v4050_v45 = vrot.slane %v3935_v30, 5  ;;  %v5625_v26 = vld [vmem:[%s8059_s5 + $0x78] sm:$0xff]  ;;  %v312_v9 = vmul.f32 %v6146_v19, %v276_v54  ;;  %v3501_v56 = vshll.u32 %v6367_v8, 16  ;;  %v5623_v11 = vld [vmem:[%s8059_s5 + $0x68] sm:$0xff] }
 0x11e   : > { %1692 = vrot.lane.b32.xlu0 %v1409_v49, %s5664_s13  ;;  %v275_v49 = vld [vmem:[%s5721_s30 + $0xb0] sm:$0xff]  ;;  %v1109_v53 = vld [vmem:[#allocation2 + $0x5c] sm:$0x1]  ;;  %v856_v35 = vor.u32 %v854_v32, %v853_v2  ;;  %v4048_v4 = vsel %vm5804_vm8, %v5266_v36, %v4047_v42  ;;  %v4049_v25 = vrot.slane %v4047_v42, 4  ;;  %4779 = vmatpush.bf16.msra.mxu2 %v5625_v26  ;;  %4980 = vst.msk [vmem:[%s5731_s11 + $0xb8] sm:$0xff] %vm410_vm1, %v276_v54  ;;  %v277_v26 = vld [vmem:[%s5721_s30 + $0xc0] sm:$0xff] }
 0x11f   : > { %3052 = vrot.lane.b32.xlu1 %v2952_v7, %s5664_s13  ;;  %v6369_v7 = vrot.slane %v3495_v14, 4  ;;  %v311_v39 = vmul.f32 %v6146_v19, %v275_v49  ;;  %4979 = vst.msk [vmem:[%s5731_s11 + $0xb0] sm:$0xff] %vm410_vm1, %v275_v49  ;;  %v1254_v1 = vld [vmem:[#allocation2 + $0x3c] sm:$0xf]  ;;  %v348_v34 = vadd.f32 %v6164_v33, %v312_v9  ;;  %v3503_v36 = vrot.slane %v3501_v56, 5  ;;  %v5622_v49 = vld [vmem:[%s8059_s5 + $0x60] sm:$0xff] }
 0x120   : > { %v857_v10 = vsel %vm5888_vm0, %v849_v37, %v856_v35  ;;  %4169 = vst.msk [vmem:[#allocation3 + $0x68] sm:$0xf] %vm616_vm2, %v4048_v4  ;;  %v1411_v15 = vshrl.u32 %v1254_v1, 16  ;;  %v1414_v18 = vshll.u32 %v1254_v1, 16  ;;  %v1255_v37 = vld [vmem:[#allocation2 + $0x40] sm:$0xf] }
 0x121   : > { %v347_v23 = vadd.f32 %v6164_v33, %v311_v39  ;;  %1108 = vst.msk [vmem:[#allocation2 + $0x58] sm:$0xf] %vm616_vm2, %v857_v10  ;;  %v3498_v22 = vor.u32 %v6369_v7, %v6354_v48  ;;  %v380_v31 = vmax.f32 %v348_v34, 0.0  ;;  %v1424_v54 = vshrl.u32 %v1255_v37, 16  ;;  %v1257_v35 = vld [vmem:[#allocation2 + $0x48] sm:$0xf] }
 0x122   : > { %2032 = vrot.lane.b32.xlu2 %v1936_v59, %s5663_s12  ;;  %v858_v59 = vrot.slane %v853_v2, 4  ;;  %v1416_v8 = vrot.slane %v1414_v18, 5  ;;  %4981 = vst.msk [vmem:[%s5731_s11 + $0xc0] sm:$0xff] %vm410_vm1, %v277_v26  ;;  %v5621_v4 = vld [vmem:[%s8059_s5 + $0x58] sm:$0xff]  ;;  %v1435_v18 = vshrl.u32 %v1257_v35, 16  ;;  %v2960_v44 = vrot.slane %v2958_v13, 4 }
 0x123   : > { %v379_v61 = vmax.f32 %v347_v23, 0.0  ;;  %v3499_v30 = vrot.slane %v3498_v22, 4  ;;  %v3177_v23 = vld [vmem:[#allocation2 + $0x48] sm:$0xf]  ;;  %v1183_v22 = vld [vmem:[#allocation2 + $0x30] sm:$0xf] }
 0x124   : > { %v1683_v27 = vpop.permute.xlu2 %1682  ;;  %v5280_v24 = vld [vmem:[#allocation3] sm:$0xf]  ;;  %v1110_v14 = vsel %vm5826_vm10, %v858_v59, %v1109_v53  ;;  %v313_v59 = vmul.f32 %v6146_v19, %v277_v26  ;;  %1215 = vst.msk [vmem:[#allocation3 + $0x60] sm:$0xf] %vm616_vm2, %v1183_v22 }
 0x125   : > { %1775 = vst.msk [vmem:[#allocation3 + $0x30] sm:$0xf] %vm1770_vm4, %v1683_v27  ;;  %v5281_v41 = vor.u32 %v5563_v3, %v5280_v24  ;;  %v5624_v3 = vld [vmem:[%s8059_s5 + $0x70] sm:$0xff]  ;;  %v652_v27 = vld [vmem:[#allocation2 + $0x60] sm:$0x1]  ;;  %v3489_v24 = vrot.slane %v3488_v46, 4  ;;  %v400_v7 = vpack.c.bf16 %v380_v31, %v379_v61  ;;  %v3504_v53 = vsel %vm5830_vm13, %v3499_v30, %v3503_v36 }
 0x126   : > { %2034 = vrot.lane.b32.xlu0 %v1940_v28, %s5663_s12  ;;  %1111 = vst [vmem:[#allocation2 + $0x5c] sm:$0x1] %v1110_v14  ;;  %v2450_v28 = vrot.slane %v2449_v58, 4  ;;  %v653_v55 = vsel %vm5826_vm10, 0, %v652_v27  ;;  %4780 = vmatpush.bf16.msra.mxu2 %v5624_v3  ;;  %v278_v58 = vld [vmem:[%s5721_s30 + $0xc8] sm:$0xff]  ;;  %v349_v10 = vadd.f32 %v6164_v33, %v313_v59  ;;  %v1438_v61 = vshll.u32 %v1257_v35, 16 }
 0x127   : > { %3803 = vrot.lane.b32.xlu1 %v3480_v29, %s5665_s16  ;;  %4698 = vmatmul.bf16.vlgmr.msra.gmra.mxu1 %v5281_v41  ;;  %v2454_v29 = vrot.slane %v2452_v62, 5  ;;  %v1413_v41 = vrot.slane %v1411_v15, 4  ;;  %654 = vst [vmem:[#allocation2 + $0x60] sm:$0x1] %v653_v55  ;;  %v3494_v42 = vsel %vm5830_vm13, %v3489_v24, %v6354_v48  ;;  %v314_v1 = vmul.f32 %v6146_v19, %v278_v58  ;;  %v1256_v3 = vld [vmem:[#allocation2 + $0x44] sm:$0x1] }
 0x128   : > { %v3041_v50 = vpop.permute.xlu0 %3040  ;;  %5225 = vmatmul.msk.bf16.gmra.mxu0 %vm410_vm1, %v400_v7  ;;  %4982 = vst.msk [vmem:[%s5731_s11 + $0xc8] sm:$0xff] %vm410_vm1, %v278_v58  ;;  %v1426_v15 = vrot.slane %v1424_v54, 4  ;;  %v1430_v55 = vshll.u32 %v1256_v3, 16  ;;  %v3373_v54 = vld [vmem:[#allocation2 + $0x48] sm:$0xf] }
 0x129   : > { %v2019_v47 = vpop.permute.xlu1 %2018  ;;  %3136 = vst.msk [vmem:[#allocation3 + $0x4] sm:$0xf] %vm1770_vm4, %v3041_v50  ;;  %v2455_v2 = vsel %vm5830_vm13, %v2450_v28, %v2454_v29  ;;  %v2152_v50 = vld [vmem:[#allocation2 + $0x40] sm:$0xf]  ;;  %v350_v34 = vadd.f32 %v6164_v33, %v314_v1  ;;  %v5620_v28 = vld [vmem:[%s8059_s5 + $0x50] sm:$0xff]  ;;  %v3506_v13 = vshrl.u32 %v3373_v54, 16 }
 0x12a   : > { %3329 = vst.msk [vmem:[#allocation3 + $0x4] sm:$0xf] %vm2110_vm6, %v6318_v43  ;;  %3054 = vrot.lane.b32.xlu2 %v2955_v21, %s5664_s13  ;;  %v4051_v43 = vsel %vm5804_vm8, %v4049_v25, %v4050_v45  ;;  %v5336_v45 = vld [vmem:[#allocation3 + $0x68] sm:$0xf]  ;;  %4781 = vmatpush.bf16.msra.mxu2 %v5623_v11  ;;  %v1420_v21 = vshll.u32 %v1255_v37, 16  ;;  %v1437_v37 = vrot.slane %v1435_v18, 4 }
 0x12b   : > { %4170 = vst.msk [vmem:[#allocation3 + $0x74] sm:$0xf] %vm616_vm2, %v4051_v43  ;;  %v708_v25 = vld [vmem:[#allocation2 + $0x68] sm:$0x1]  ;;  %v3178_v43 = vld [vmem:[#allocation2 + $0x4c] sm:$0xf] }
 0x12c   : > { %v6407_v20 = vpop.permute.xlu2 %3237  ;;  %2805 = vst.msk [vmem:[#allocation3 + $0x40] sm:$0xf] %vm616_vm2, %v2455_v2  ;;  %v1422_v56 = vrot.slane %v1420_v21, 5  ;;  %v709_v14 = vsel %vm5790_vm5, 0, %v708_v25  ;;  %v382_v27 = vmax.f32 %v350_v34, 0.0  ;;  %v1440_v2 = vrot.slane %v1438_v61, 5 }
 0x12d   : > { %710 = vst [vmem:[#allocation2 + $0x68] sm:$0x1] %v709_v14  ;;  %v2346_v29 = vld [vmem:[#allocation2 + $0x34] sm:$0xf]  ;;  %v6471_v11 = vld [vmem:[#allocation2 + $0x4c] sm:$0xf] }
 0x12e   : > { %3056 = vrot.lane.b32.xlu0 %v2959_v63, %s5664_s13  ;;  %4782 = vmatpush.bf16.msra.mxu2 %v5622_v49  ;;  %v381_v63 = vmax.f32 %v349_v10, 0.0  ;;  %v2466_v7 = vshll.u32 %v2346_v29, 16  ;;  %v2470_v30 = vshrl.u32 %v2346_v29, 16  ;;  %v1941_v21 = vrot.slane %v1939_v6, 4  ;;  %v3936_v3 = vld [vmem:[#allocation2 + $0x54] sm:$0xe] }
 0x12f   : > { %3247 = vrot.lane.b32.xlu1 %v3176_v51, %s5663_s12  ;;  %v1432_v1 = vrot.slane %v1430_v55, 5  ;;  %v1112_v34 = vld [vmem:[#allocation2 + $0x60] sm:$0xf] }
 0x130   : > { %v2212_v32 = vpop.permute.xlu0 %2211  ;;  %v2472_v35 = vrot.slane %v2470_v30, 4  ;;  %v3508_v30 = vrot.slane %v3506_v13, 4  ;;  %v6548_v13 = vld [vmem:[#allocation2 + $0x4c] sm:$0xf] }
 0x131   : > { %v1679_v38 = vpop.permute.xlu1 %1678 }
 0x132   : > { %1773 = vst.msk [vmem:[#allocation3 + $0x18] sm:$0xf] %vm1770_vm4, %v1679_v38  ;;  %3805 = vrot.lane.b32.xlu2 %v3494_v42, %s5665_s16  ;;  %v5576_v39 = vld [vmem:[#allocation3 + $0x70] sm:$0xf0]  ;;  %4783 = vmatpush.bf16.msra.mxu2 %v5621_v4  ;;  %v1427_v38 = vor.u32 %v1426_v15, %v1422_v56  ;;  %v2846_v42 = vld [vmem:[#allocation2 + $0x44] sm:$0x1] }
 0x133   : > { %2113 = vst.msk [vmem:[#allocation3 + $0x18] sm:$0xf] %vm2110_vm6, %v2019_v47  ;;  %v1417_v47 = vor.u32 %v1416_v8, %v1413_v41  ;;  %v5337_v62 = vor.u32 %v5576_v39, %v5336_v45  ;;  %v507_v41 = vpop.f32.mrf.mxu0  ;;  %v401_v8 = vpack.c.bf16 %v382_v27, %v381_v63  ;;  %v5619_v45 = vld [vmem:[%s8059_s5 + $0x48] sm:$0xff]  ;;  %v2347_v39 = vld [vmem:[#allocation2 + $0x38] sm:$0x1]  ;;  %v2961_v6 = vrot.slane %v2846_v42, 5 }
 0x134   : > { %2306 = vst.msk [vmem:[#allocation3 + $0x18] sm:$0xf] %vm2303_vm7, %v2212_v32  ;;  %v6441_v48 = vpop.permute.xlu2 %2215  ;;  %v1820_v32 = vld [vmem:[#allocation2 + $0x44] sm:$0x1]  ;;  %v508_v36 = vadd.f32 %v6286_v5, %v507_v41  ;;  %v1428_v59 = vrot.slane %v1427_v38, 4  ;;  %v279_v41 = vld [vmem:[%s5721_s30 + $0xd0] sm:$0xff] }
 0x135   : > { %v1418_v51 = vrot.slane %v1417_v47, 4  ;;  %5546 = vmatmul.msk.bf16.gmra.mxu3 %vm4641_vm3, %v5337_v62  ;;  %v2153_v47 = vld [vmem:[#allocation2 + $0x48] sm:$0xf]  ;;  %v1942_v26 = vrot.slane %v1820_v32, 5  ;;  %v6485_v62 = vrot.slane %v2466_v7, 5  ;;  %v2962_v61 = vsel %vm5804_vm8, %v2960_v44, %v2961_v6  ;;  %4983 = vst.msk [vmem:[%s5731_s11 + $0xd0] sm:$0xff] %vm410_vm1, %v279_v41 }
 0x136   : > { %3807 = vrot.lane.b32.xlu0 %v3504_v53, %s5665_s16  ;;  %4784 = vmatpush.bf16.msra.mxu2 %v5620_v28  ;;  %v1444_v53 = vshll.u32 %v6471_v11, 16  ;;  %v566_v58 = vmax.f32 %v508_v36, 0.0  ;;  %v2154_v4 = vld [vmem:[#allocation2 + $0x4c] sm:$0xf]  ;;  %v3937_v15 = vld [vmem:[#allocation2 + $0x58] sm:$0xf]  ;;  %v315_v42 = vmul.f32 %v6146_v19, %v279_v41 }
 0x137   : > { %2225 = vrot.lane.b32.xlu1 %v2152_v50, %s5665_s16  ;;  %v1423_v31 = vsel %vm5830_vm13, %v1418_v51, %v1422_v56  ;;  %v1943_v56 = vsel %vm5804_vm8, %v1941_v21, %v1942_v26  ;;  %v2473_v18 = vor.u32 %v2472_v35, %v6485_v62  ;;  %v6513_v63 = vld [vmem:[#allocation2 + $0x48] sm:$0xe]  ;;  %v3938_v27 = vld [vmem:[#allocation2 + $0x5c] sm:$0x1]  ;;  %v5267_v28 = vrot.slane %v3936_v3, 9 }
 0x138   : > { %v3236_v46 = vpop.permute.xlu0 %3235  ;;  %5226 = vmatmul.msk.bf16.gmra.mxu0 %vm410_vm1, %v401_v8  ;;  %v598_v25 = vpack.c.bf16 %v566_v58, %v566_v58  ;;  %v6499_v57 = vrot.slane %v1444_v53, 5  ;;  %v4054_v29 = vrot.slane %v3937_v15, 5  ;;  %v6518_v32 = vld [vmem:[#allocation2 + $0x4c] sm:$0xf]  ;;  %v4057_v38 = vrot.slane %v3938_v27, 5 }
 0x139   : > { %v3043_v9 = vpop.permute.xlu1 %3042  ;;  %v5236_v58 = vrot.slane %v6513_v63, 9 }
 0x13a   : > { %3137 = vst.msk [vmem:[#allocation3 + $0x10] sm:$0xf] %vm1770_vm4, %v3043_v9  ;;  %3249 = vrot.lane.b32.xlu2 %v3177_v23, %s5663_s12  ;;  %4785 = vmatpush.bf16.msra.mxu2 %v5619_v45  ;;  %v3509_v9 = vshll.u32 %v3373_v54, 16  ;;  %v2476_v23 = vshll.u32 %v2347_v39, 16  ;;  %v860_v10 = vshrl.u32 %v598_v25, 16  ;;  %v863_v14 = vshll.u32 %v598_v25, 16 }
 0x13b   : > { %3330 = vst.msk [vmem:[#allocation3 + $0x10] sm:$0xf] %vm2110_vm6, %v3236_v46  ;;  %v1441_v46 = vor.u32 %v1440_v2, %v1437_v37  ;;  %v509_v22 = vpop.f32.mrf.mxu0  ;;  %v4056_v37 = vrot.slane %v4054_v29, 4  ;;  %v280_v2 = vld [vmem:[%s5721_s30 + $0xd8] sm:$0xff]  ;;  %v4055_v53 = vsel %vm5804_vm8, %v5267_v28, %v4054_v29  ;;  %v351_v39 = vadd.f32 %v6164_v33, %v315_v42  ;;  %v2847_v29 = vld [vmem:[#allocation2 + $0x48] sm:$0xe] }
 0x13c   : > { %v1685_v24 = vpop.permute.xlu2 %1684  ;;  %v510_v55 = vadd.f32 %v6286_v5, %v509_v22  ;;  %v3511_v36 = vrot.slane %v3509_v9, 5  ;;  %v316_v54 = vmul.f32 %v6146_v19, %v280_v2  ;;  %4171 = vst.msk [vmem:[#allocation3 + $0x80] sm:$0xf] %vm616_vm2, %v4055_v53 }
 0x13d   : > { %1776 = vst.msk [vmem:[#allocation3 + $0x3c] sm:$0xf] %vm1770_vm4, %v1685_v24  ;;  %v6515_v24 = vrot.slane %v860_v10, 7  ;;  %v383_v6 = vmax.f32 %v351_v39, 0.0  ;;  %v5647_v39 = vld [vmem:[%s8055_s1] ss:$0 sm:$0xff] }
 0x13e   : > { %3251 = vrot.lane.b32.xlu0 %v3178_v43, %s5663_s12  ;;  %v6503_v43 = vld [vmem:[#allocation2 + $0x4c] sm:$0xf]  ;;  %v352_v44 = vadd.f32 %v6164_v33, %v316_v54  ;;  %4984 = vst.msk [vmem:[%s5731_s11 + $0xd8] sm:$0xff] %vm410_vm1, %v280_v2 }
 0x13f   : > { %1694 = vrot.lane.b32.xlu1 %v1423_v31, %s5664_s13  ;;  %v1442_v31 = vrot.slane %v1441_v46, 4  ;;  %v865_v45 = vor.u32 %v863_v14, %v6515_v24  ;;  %v1946_v21 = vrot.slane %v6503_v43, 5  ;;  %v3519_v14 = vshrl.u32 %v6518_v32, 16  ;;  %v6560_v43 = vld [vmem:[#allocation2 + $0x30] sm:$0xf]  ;;  %v282_v54 = vld [vmem:[%s5721_s30 + $0xe8] sm:$0xff] }
 0x140   : > { %v2023_v49 = vpop.permute.xlu0 %2022  ;;  %v384_v33 = vmax.f32 %v352_v44, 0.0  ;;  %4986 = vst.msk [vmem:[%s5731_s11 + $0xe8] sm:$0xff] %vm410_vm1, %v282_v54 }
 0x141   : > { %v1681_v50 = vpop.permute.xlu1 %1680  ;;  %2115 = vst.msk [vmem:[#allocation3 + $0x30] sm:$0xf] %vm2110_vm6, %v2023_v49  ;;  %v567_v49 = vmax.f32 %v510_v55, 0.0  ;;  %v1113_v26 = vsel %vm5878_vm14, %v865_v45, %v1112_v34  ;;  %v1447_v19 = vsel %vm5830_vm13, %v1442_v31, %v6499_v57  ;;  %v1947_v31 = vsel %vm5804_vm8, %v5236_v58, %v1946_v21  ;;  %v281_v45 = vld [vmem:[%s5721_s30 + $0xe0] sm:$0xff] }
 0x142   : > { %2308 = vst.msk [vmem:[#allocation3 + $0x30] sm:$0xf] %vm2303_vm7, %v6441_v48  ;;  %2227 = vrot.lane.b32.xlu2 %v2153_v47, %s5665_s16  ;;  %v5618_v48 = vld [vmem:[%s8059_s5 + $0x40] sm:$0xff]  ;;  %v2478_v47 = vrot.slane %v2476_v23, 5  ;;  %v1948_v23 = vrot.slane %v1946_v21, 4  ;;  %v402_v63 = vpack.c.bf16 %v384_v33, %v383_v6  ;;  %v1448_v58 = vshrl.u32 %v6471_v11, 16 }
 0x143   : > { %1774 = vst.msk [vmem:[#allocation3 + $0x24] sm:$0xf] %vm1770_vm4, %v1681_v50  ;;  %4786 = vmatpush.bf16.msra.mxu2 %v5618_v48  ;;  %v2474_v50 = vrot.slane %v2473_v18, 4  ;;  %v599_v35 = vpack.c.bf16 %v567_v49, %v567_v49  ;;  %v3512_v48 = vor.u32 %v3511_v36, %v3508_v30  ;;  %v5292_v18 = vld [vmem:[#allocation3 + $0x18] sm:$0xf]  ;;  %v2460_v11 = vshll.u32 %v6560_v43, 16 }
 0x144   : > { %2114 = vst.msk [vmem:[#allocation3 + $0x24] sm:$0xf] %vm2110_vm6, %v6270_v60  ;;  %v3796_v51 = vpop.permute.xlu2 %3795  ;;  %v1433_v60 = vsel %vm5830_vm13, %v1428_v59, %v1432_v1  ;;  %v1823_v59 = vld [vmem:[#allocation2 + $0x50] sm:$0x1]  ;;  %v3515_v1 = vshll.u32 %v6518_v32, 16  ;;  %v2965_v32 = vrot.slane %v6548_v13, 5 }
 0x145   : > { %3890 = vst.msk [vmem:[#allocation3 + $0x10] sm:$0xf] %vm2303_vm7, %v3796_v51  ;;  %v868_v25 = vshrl.u32 %v599_v35, 16  ;;  %v871_v46 = vshll.u32 %v599_v35, 16  ;;  %v2479_v9 = vsel %vm5830_vm13, %v2474_v50, %v2478_v47  ;;  %v1184_v51 = vld [vmem:[#allocation2 + $0x34] sm:$0xf] }
 0x146   : > { %2229 = vrot.lane.b32.xlu0 %v2154_v4, %s5665_s16  ;;  %1114 = vst [vmem:[#allocation2 + $0x60] sm:$0xf] %v1113_v26  ;;  %v1949_v34 = vrot.slane %v1823_v59, 5  ;;  %v3513_v28 = vrot.slane %v3512_v48, 4  ;;  %v2849_v30 = vld [vmem:[#allocation2 + $0x50] sm:$0x1]  ;;  %v317_v26 = vmul.f32 %v5647_v39, %v281_v45 }
 0x147   : > { %2036 = vrot.lane.b32.xlu1 %v1943_v56, %s5663_s12  ;;  %v866_v56 = vrot.slane %v6515_v24, 4  ;;  %v870_v10 = vrot.slane %v868_v25, 7  ;;  %2807 = vst.msk [vmem:[#allocation3 + $0x58] sm:$0xf] %vm616_vm2, %v2479_v9  ;;  %v3376_v24 = vld [vmem:[#allocation2 + $0x54] sm:$0xf] }
 0x148   : > { %v3045_v8 = vpop.permute.xlu0 %3044  ;;  %5227 = vmatmul.msk.bf16.gmra.mxu0 %vm410_vm1, %v402_v63  ;;  %1216 = vst.msk [vmem:[#allocation3 + $0x6c] sm:$0xf] %vm616_vm2, %v1184_v51  ;;  %v3375_v36 = vld [vmem:[#allocation2 + $0x50] sm:$0x1]  ;;  %v5348_v2 = vld [vmem:[#allocation3 + $0x80] sm:$0xf]  ;;  %v1950_v50 = vsel %vm5804_vm8, %v1948_v23, %v1949_v34 }
 0x149   : > { %v2214_v7 = vpop.permute.xlu1 %2213  ;;  %3138 = vst.msk [vmem:[#allocation3 + $0x1c] sm:$0xf] %vm1770_vm4, %v3045_v8  ;;  %v873_v22 = vor.u32 %v871_v46, %v870_v10  ;;  %v875_v27 = vrot.slane %v870_v10, 4  ;;  %v3530_v42 = vshrl.u32 %v3376_v24, 16  ;;  %v3533_v53 = vshll.u32 %v3376_v24, 16 }
 0x14a   : > { %3331 = vst.msk [vmem:[#allocation3 + $0x1c] sm:$0xf] %vm2110_vm6, %v6407_v20  ;;  %1696 = vrot.lane.b32.xlu2 %v1433_v60, %s5664_s13  ;;  %v4058_v20 = vsel %vm5804_vm8, %v4056_v37, %v4057_v38  ;;  %v1116_v60 = vld [vmem:[#allocation2 + $0x68] sm:$0x1]  ;;  %v2457_v38 = vshrl.u32 %v6560_v43, 16  ;;  %v3521_v37 = vrot.slane %v3519_v14, 4 }
 0x14b   : > { %2307 = vst.msk [vmem:[#allocation3 + $0x24] sm:$0xf] %vm2303_vm7, %v2214_v7  ;;  %v874_v8 = vsel %vm5888_vm0, %v866_v56, %v873_v22  ;;  %v1117_v7 = vsel %vm5826_vm10, %v875_v27, %v1116_v60  ;;  %v5251_v35 = vrot.slane %v2847_v29, 9  ;;  %v655_v59 = vld [vmem:[#allocation2 + $0x6c] sm:$0x1]  ;;  %v2968_v44 = vrot.slane %v2849_v30, 5 }
 0x14c   : > { %v6546_v4 = vpop.permute.xlu2 %2026  ;;  %4172 = vst.msk [vmem:[#allocation3 + $0x8c] sm:$0xf] %vm616_vm2, %v4058_v20  ;;  %v5648_v6 = vld [vmem:[%s8056_s2] ss:$0 sm:$0xff]  ;;  %v3525_v13 = vshll.u32 %v3375_v36, 16  ;;  %v656_v23 = vsel %vm5826_vm10, 0, %v655_v59 }
 0x14d   : > { %1115 = vst.msk [vmem:[#allocation2 + $0x64] sm:$0xf] %vm616_vm2, %v874_v8  ;;  %v353_v25 = vadd.f32 %v5648_v6, %v317_v26  ;;  %v2459_v33 = vrot.slane %v2457_v38, 4  ;;  %v6607_v56 = vld [vmem:[#allocation2 + $0x58] sm:$0xf]  ;;  %v3532_v10 = vrot.slane %v3530_v42, 4  ;;  %v2966_v43 = vsel %vm5804_vm8, %v5251_v35, %v2965_v32 }
 0x14e   : > { %1698 = vrot.lane.b32.xlu0 %v1447_v19, %s5664_s13  ;;  %1118 = vst [vmem:[#allocation2 + $0x68] sm:$0x1] %v1117_v7  ;;  %v318_v19 = vmul.f32 %v5647_v39, %v282_v54  ;;  %v3535_v14 = vrot.slane %v3533_v53, 5  ;;  %v3939_v60 = vld [vmem:[#allocation2 + $0x60] sm:$0xe]  ;;  %v2462_v22 = vrot.slane %v2460_v11, 5 }
 0x14f   : > { %3058 = vrot.lane.b32.xlu1 %v2962_v61, %s5664_s13  ;;  %v6564_v61 = vrot.slane %v3515_v1, 5  ;;  %v2967_v1 = vrot.slane %v2965_v32, 4  ;;  %4985 = vst.msk [vmem:[%s5731_s11 + $0xe0] sm:$0xff] %vm410_vm1, %v281_v45  ;;  %v5268_v63 = vrot.slane %v3939_v60, 9  ;;  %v3179_v24 = vld [vmem:[#allocation2 + $0x54] sm:$0xf] }
 0x150   : > { %v6562_v3 = vpop.permute.xlu0 %3239  ;;  %v354_v9 = vadd.f32 %v5648_v6, %v318_v19  ;;  %657 = vst [vmem:[#allocation2 + $0x6c] sm:$0x1] %v656_v23  ;;  %v3536_v38 = vor.u32 %v3535_v14, %v3532_v10  ;;  %v5304_v32 = vld [vmem:[#allocation3 + $0x30] sm:$0xf]  ;;  %v1450_v8 = vrot.slane %v1448_v58, 4 }
 0x151   : > { %v2025_v15 = vpop.permute.xlu1 %2024  ;;  %v3518_v47 = vsel %vm5830_vm13, %v3513_v28, %v6564_v61  ;;  %v3522_v51 = vor.u32 %v3521_v37, %v6564_v61  ;;  %v2969_v29 = vsel %vm5804_vm8, %v2967_v1, %v2968_v44  ;;  %v711_v36 = vld [vmem:[#allocation2 + $0x74] sm:$0x1]  ;;  %v5282_v37 = vld [vmem:[#allocation3 + $0xc] sm:$0xf0]  ;;  %v1259_v53 = vld [vmem:[#allocation2 + $0x50] sm:$0x1] }
 0x152   : > { %2116 = vst.msk [vmem:[#allocation3 + $0x3c] sm:$0xf] %vm2110_vm6, %v2025_v15  ;;  %v5566_v55 = vld [vmem:[#allocation3 + $0x20] sm:$0xf0]  ;;  %2038 = vrot.lane.b32.xlu2 %v1947_v31, %s5663_s12  ;;  %v385_v15 = vmax.f32 %v353_v25, 0.0  ;;  %v712_v45 = vsel %vm5790_vm5, 0, %v711_v36 }
 0x153   : > { %v5293_v41 = vor.u32 %v5566_v55, %v5292_v18  ;;  %v5579_v21 = vld [vmem:[#allocation3 + $0x88] sm:$0xf0]  ;;  %v386_v18 = vmax.f32 %v354_v9, 0.0  ;;  %v3523_v31 = vrot.slane %v3522_v51, 4  ;;  %v3527_v55 = vrot.slane %v3525_v13, 5 }
 0x154   : > { %v3049_v49 = vpop.permute.xlu2 %3048  ;;  %v5349_v20 = vor.u32 %v5579_v21, %v5348_v2  ;;  %v3940_v34 = vld [vmem:[#allocation2 + $0x64] sm:$0xf]  ;;  %713 = vst [vmem:[#allocation2 + $0x74] sm:$0x1] %v712_v45  ;;  %v3537_v26 = vrot.slane %v3536_v38, 4  ;;  %v1454_v1 = vshll.u32 %v1259_v53, 16 }
 0x155   : > { %4703 = vmatmul.bf16.gmra.mxu1 %v5293_v41  ;;  %3140 = vst.msk [vmem:[#allocation3 + $0x34] sm:$0xf] %vm1770_vm4, %v3049_v49  ;;  %v3941_v27 = vld [vmem:[#allocation2 + $0x68] sm:$0x1]  ;;  %v4061_v61 = vrot.slane %v3940_v34, 5  ;;  %v3539_v41 = vshll.u32 %v6607_v56, 16  ;;  %v403_v7 = vpack.c.bf16 %v386_v18, %v385_v15  ;;  %v2463_v49 = vor.u32 %v2462_v22, %v2459_v33 }
 0x156   : > { %2040 = vrot.lane.b32.xlu0 %v1950_v50, %s5663_s12  ;;  %5547 = vmatmul.msk.bf16.gmra.mxu3 %vm4641_vm3, %v5349_v20  ;;  %v4064_v42 = vrot.slane %v3941_v27, 5  ;;  %v3528_v58 = vsel %vm5830_vm13, %v3523_v31, %v3527_v55  ;;  %v2155_v11 = vld [vmem:[#allocation2 + $0x54] sm:$0xf]  ;;  %v3180_v33 = vld [vmem:[#allocation2 + $0x58] sm:$0xf]  ;;  %v1456_v10 = vrot.slane %v1454_v1, 5 }
 0x157   : > { %3809 = vrot.lane.b32.xlu1 %v3518_v47, %s5665_s16  ;;  %v4062_v30 = vsel %vm5804_vm8, %v5268_v63, %v4061_v61  ;;  %v4063_v2 = vrot.slane %v4061_v61, 4  ;;  %v6631_v20 = vrot.slane %v3539_v41, 5  ;;  %v2464_v59 = vrot.slane %v2463_v49, 4  ;;  %v3181_v14 = vld [vmem:[#allocation2 + $0x60] sm:$0xf] }
 0x158   : > { %v2218_v46 = vpop.permute.xlu0 %2217  ;;  %4173 = vst.msk [vmem:[#allocation3 + $0x98] sm:$0xf] %vm616_vm2, %v4062_v30  ;;  %5228 = vmatmul.msk.bf16.gmra.mxu0 %vm410_vm1, %v403_v7  ;;  %v6654_v15 = vld [vmem:[#allocation2 + $0x54] sm:$0xe]  ;;  %v2348_v18 = vld [vmem:[#allocation2 + $0x3c] sm:$0xf] }
 0x159   : > { %v3794_v48 = vpop.permute.xlu1 %3793  ;;  %2309 = vst.msk [vmem:[#allocation3 + $0x3c] sm:$0xf] %vm2303_vm7, %v2218_v46  ;;  %v4065_v19 = vsel %vm5804_vm8, %v4063_v2, %v4064_v42  ;;  %v3542_v25 = vsel %vm5830_vm13, %v3537_v26, %v6631_v20  ;;  %v2469_v13 = vsel %vm5830_vm13, %v2464_v59, %v6485_v62  ;;  %v5237_v41 = vrot.slane %v6654_v15, 9  ;;  %v1119_v30 = vld [vmem:[#allocation2 + $0x6c] sm:$0xf] }
 0x15a   : > { %3889 = vst.msk [vmem:[#allocation3 + $0x4] sm:$0xf] %vm2303_vm7, %v3794_v48  ;;  %3060 = vrot.lane.b32.xlu2 %v2966_v43, %s5664_s13  ;;  %v1261_v48 = vld [vmem:[#allocation2 + $0x58] sm:$0xf] }
 0x15b   : > { %4174 = vst.msk [vmem:[#allocation3 + $0xa4] sm:$0xf] %vm616_vm2, %v4065_v19  ;;  %v1468_v63 = vshll.u32 %v1261_v48, 16  ;;  %v1472_v61 = vshrl.u32 %v1261_v48, 16  ;;  %v2156_v1 = vld [vmem:[#allocation2 + $0x58] sm:$0xf] }
 0x15c   : > { %v3800_v28 = vpop.permute.xlu2 %3799  ;;  %v512_v44 = vpop.f32.mrf.mxu0  ;;  %2806 = vst.msk [vmem:[#allocation3 + $0x4c] sm:$0xf] %vm616_vm2, %v2469_v13  ;;  %v1123_v15 = vld [vmem:[#allocation2 + $0x74] sm:$0x1] }
 0x15d   : > { %v513_v46 = vadd.f32 %v6286_v5, %v512_v44  ;;  %v6670_v42 = vrot.slane %v1468_v63, 5  ;;  %v2157_v44 = vld [vmem:[#allocation2 + $0x60] sm:$0xf]  ;;  %v658_v63 = vld [vmem:[#allocation2 + $0x78] sm:$0x1] }
 0x15e   : > { %3062 = vrot.lane.b32.xlu0 %v2969_v29, %s5664_s13  ;;  %v2481_v29 = vshrl.u32 %v2348_v18, 16 }
 0x15f   : > { %3253 = vrot.lane.b32.xlu1 %v3179_v24, %s5663_s12  ;;  %v5360_v27 = vld [vmem:[#allocation3 + $0x98] sm:$0xf]  ;;  %v2484_v24 = vshll.u32 %v2348_v18, 16 }
 0x160   : > { %v1687_v50 = vpop.permute.xlu0 %1686  ;;  %v5569_v21 = vld [vmem:[#allocation3 + $0x38] sm:$0xf0] }
 0x161   : > { %v3047_v47 = vpop.permute.xlu1 %3046  ;;  %1777 = vst.msk [vmem:[#allocation3 + $0x48] sm:$0xf] %vm1770_vm4, %v1687_v50  ;;  %v5305_v54 = vor.u32 %v5569_v21, %v5304_v32  ;;  %v5562_v39 = vld [vmem:[#allocation3 + $0x4] sm:$0xf]  ;;  %v6664_v32 = vld [vmem:[#allocation2 + $0x58] sm:$0xf] }
 0x162   : > { %2117 = vst.msk [vmem:[#allocation3 + $0x48] sm:$0xf] %vm2110_vm6, %v6546_v4  ;;  %v5285_v35 = vor.u32 %v5562_v39, %v5282_v37  ;;  %3811 = vrot.lane.b32.xlu2 %v3528_v58, %s5665_s16  ;;  %v1451_v4 = vor.u32 %v1450_v8, %v6499_v57  ;;  %v568_v57 = vmax.f32 %v513_v46, 0.0  ;;  %v5582_v8 = vld [vmem:[#allocation3 + $0xa0] sm:$0xf0]  ;;  %v2486_v26 = vrot.slane %v2484_v24, 5 }
 0x163   : > { %3139 = vst.msk [vmem:[#allocation3 + $0x28] sm:$0xf] %vm1770_vm4, %v3047_v47  ;;  %v5361_v36 = vor.u32 %v5582_v8, %v5360_v27  ;;  %v1474_v47 = vrot.slane %v1472_v61, 4  ;;  %v1186_v21 = vld [vmem:[#allocation2 + $0x40] sm:$0xf]  ;;  %v1953_v19 = vrot.slane %v6664_v32, 5 }
 0x164   : > { %3332 = vst.msk [vmem:[#allocation3 + $0x28] sm:$0xf] %vm2110_vm6, %v6562_v3  ;;  %4787 = vmatmul.bf16.vlgmr.msra.gmra.mxu2 %v5285_v35  ;;  %v6639_v6 = vpop.permute.xlu2 %3243  ;;  %v1260_v3 = vld [vmem:[#allocation2 + $0x54] sm:$0xf]  ;;  %v1452_v51 = vrot.slane %v1451_v4, 4  ;;  %v600_v43 = vpack.c.bf16 %v568_v57, %v568_v57 }
 0x165   : > { %3892 = vst.msk [vmem:[#allocation3 + $0x28] sm:$0xf] %vm2303_vm7, %v3800_v28  ;;  %4708 = vmatmul.bf16.gmra.mxu1 %v5305_v54  ;;  %v1459_v60 = vshrl.u32 %v1260_v3, 16  ;;  %v1462_v34 = vshll.u32 %v1260_v3, 16  ;;  %v514_v28 = vpop.f32.mrf.mxu0  ;;  %v1262_v4 = vld [vmem:[#allocation2 + $0x5c] sm:$0x1]  ;;  %v1475_v48 = vor.u32 %v1474_v47, %v6670_v42 }
 0x166   : > { %3813 = vrot.lane.b32.xlu0 %v3542_v25, %s5665_s16  ;;  %v877_v62 = vshrl.u32 %v600_v43, 16  ;;  %v880_v22 = vshll.u32 %v600_v43, 16  ;;  %v1457_v55 = vsel %vm5830_vm13, %v1452_v51, %v1456_v10  ;;  %v515_v7 = vadd.f32 %v6286_v5, %v514_v28  ;;  %5548 = vmatmul.msk.bf16.gmra.mxu3 %vm4641_vm3, %v5361_v36  ;;  %1218 = vst.msk [vmem:[#allocation3 + $0x84] sm:$0xf] %vm616_vm2, %v1186_v21  ;;  %v6683_v57 = vld [vmem:[#allocation2 + $0x40] sm:$0xf] }
 0x167   : > { %2231 = vrot.lane.b32.xlu1 %v2155_v11, %s5665_s16  ;;  %v1461_v37 = vrot.slane %v1459_v60, 4  ;;  %v1464_v2 = vrot.slane %v1462_v34, 5  ;;  %v2483_v5 = vrot.slane %v2481_v29, 4  ;;  %v3543_v3 = vshrl.u32 %v6607_v56, 16  ;;  %v6690_v43 = vld [vmem:[#allocation2 + $0x58] sm:$0xf] }
 0x168   : > { %v6651_v9 = vpop.permute.xlu0 %2028  ;;  %v6662_v38 = vrot.slane %v877_v62, 7  ;;  %v569_v50 = vmax.f32 %v515_v7, 0.0  ;;  %v1478_v13 = vshll.u32 %v1262_v4, 16  ;;  %v1954_v51 = vsel %vm5804_vm8, %v5237_v41, %v1953_v19  ;;  %v3378_v28 = vld [vmem:[#allocation2 + $0x5c] sm:$0x1] }
 0x169   : > { %v3798_v23 = vpop.permute.xlu1 %3797  ;;  %v1465_v25 = vor.u32 %v1464_v2, %v1461_v37  ;;  %v2490_v18 = vshll.u32 %v6683_v57, 16  ;;  %v1476_v27 = vrot.slane %v1475_v48, 4  ;;  %v3545_v29 = vrot.slane %v3543_v3, 4  ;;  %v1826_v8 = vld [vmem:[#allocation2 + $0x5c] sm:$0x1] }
 0x16a   : > { %3891 = vst.msk [vmem:[#allocation3 + $0x1c] sm:$0xf] %vm2303_vm7, %v3798_v23  ;;  %3255 = vrot.lane.b32.xlu2 %v3180_v33, %s5663_s12  ;;  %v882_v49 = vor.u32 %v880_v22, %v6662_v38  ;;  %v601_v59 = vpack.c.bf16 %v569_v50, %v569_v50  ;;  %v2487_v23 = vor.u32 %v2486_v26, %v2483_v5  ;;  %v883_v33 = vrot.slane %v6662_v38, 4  ;;  %v714_v21 = vld [vmem:[#allocation2 + $0x80] sm:$0x1] }
 0x16b   : > { %v1466_v56 = vrot.slane %v1465_v25, 4  ;;  %v1480_v61 = vrot.slane %v1478_v13, 5  ;;  %v2972_v41 = vrot.slane %v6690_v43, 5  ;;  %v659_v36 = vsel %vm5826_vm10, 0, %v658_v63  ;;  %v3379_v26 = vld [vmem:[#allocation2 + $0x60] sm:$0xf] }
 0x16c   : > { %v6658_v31 = vpop.permute.xlu2 %2221  ;;  %v5294_v45 = vld [vmem:[#allocation3 + $0x24] sm:$0xf0]  ;;  %v1120_v35 = vsel %vm5878_vm14, %v882_v49, %v1119_v30  ;;  %v885_v11 = vshrl.u32 %v601_v59, 16  ;;  %v888_v46 = vshll.u32 %v601_v59, 16  ;;  %v2488_v24 = vrot.slane %v2487_v23, 4 }
 0x16d   : > { %1121 = vst [vmem:[#allocation2 + $0x6c] sm:$0xf] %v1120_v35  ;;  %v1471_v7 = vsel %vm5830_vm13, %v1466_v56, %v6670_v42  ;;  %v1827_v30 = vld [vmem:[#allocation2 + $0x60] sm:$0xe]  ;;  %v6708_v37 = vrot.slane %v2490_v18, 5  ;;  %v1955_v2 = vrot.slane %v1953_v19, 4  ;;  %v3546_v50 = vor.u32 %v3545_v29, %v6631_v20 }
 0x16e   : > { %3257 = vrot.lane.b32.xlu0 %v3181_v14, %s5663_s12  ;;  %v887_v10 = vrot.slane %v885_v11, 7  ;;  %v2850_v14 = vld [vmem:[#allocation2 + $0x54] sm:$0xe]  ;;  %v3549_v49 = vshll.u32 %v3378_v28, 16  ;;  %v6727_v20 = vld [vmem:[%s8058_s4] ss:$0 sm:$0xff] }
 0x16f   : > { %1700 = vrot.lane.b32.xlu1 %v1457_v55, %s5664_s13  ;;  %v5252_v32 = vrot.slane %v2850_v14, 9  ;;  %v2493_v42 = vsel %vm5830_vm13, %v2488_v24, %v6708_v37  ;;  %660 = vst [vmem:[#allocation2 + $0x78] sm:$0x1] %v659_v36  ;;  %v715_v35 = vsel %vm5790_vm5, 0, %v714_v21  ;;  %v1956_v19 = vrot.slane %v1826_v8, 5 }
 0x170   : > { %v3051_v53 = vpop.permute.xlu0 %3050  ;;  %v890_v60 = vor.u32 %v888_v46, %v887_v10  ;;  %v892_v34 = vrot.slane %v887_v10, 4  ;;  %v5238_v59 = vrot.slane %v1827_v30, 9  ;;  %v6734_v4 = vld [vmem:[#allocation2 + $0x5c] sm:$0x1]  ;;  %716 = vst [vmem:[#allocation2 + $0x80] sm:$0x1] %v715_v35 }
 0x171   : > { %v3242_v54 = vpop.permute.xlu1 %3241  ;;  %v5565_v39 = vld [vmem:[#allocation3 + $0x1c] sm:$0xf]  ;;  %3141 = vst.msk [vmem:[#allocation3 + $0x40] sm:$0xf] %vm1770_vm4, %v3051_v53  ;;  %v1185_v53 = vld [vmem:[#allocation2 + $0x3c] sm:$0xf]  ;;  %v2973_v5 = vsel %vm5804_vm8, %v5252_v32, %v2972_v41  ;;  %v1957_v10 = vsel %vm5804_vm8, %v1955_v2, %v1956_v19 }
 0x172   : > { %v5297_v58 = vor.u32 %v5565_v39, %v5294_v45  ;;  %3334 = vst.msk [vmem:[#allocation3 + $0x40] sm:$0xf] %vm2110_vm6, %v6639_v6  ;;  %2233 = vrot.lane.b32.xlu2 %v2156_v1, %s5665_s16  ;;  %v891_v55 = vsel %vm5888_vm0, %v883_v33, %v890_v60  ;;  %v1124_v38 = vsel %vm5826_vm10, %v892_v34, %v1123_v15  ;;  %v6712_v45 = vld [vmem:[#allocation2 + $0x64] sm:$0xf]  ;;  %v3547_v3 = vrot.slane %v3546_v50, 4 }
 0x173   : > { %3333 = vst.msk [vmem:[#allocation3 + $0x34] sm:$0xf] %vm2110_vm6, %v3242_v54  ;;  %v517_v47 = vpop.f32.mrf.mxu0  ;;  %v1481_v39 = vsel %vm5830_vm13, %v1476_v27, %v1480_v61  ;;  %v1960_v1 = vrot.slane %v6712_v45, 5  ;;  %v3551_v48 = vrot.slane %v3549_v49, 5  ;;  %v3554_v13 = vshrl.u32 %v3379_v26, 16 }
 0x174   : > { %4792 = vmatmul.bf16.gmra.mxu2 %v5297_v58  ;;  %v1691_v6 = vpop.permute.xlu2 %1690  ;;  %1122 = vst.msk [vmem:[#allocation2 + $0x70] sm:$0xf] %vm616_vm2, %v891_v55  ;;  %v518_v58 = vadd.f32 %v6727_v20, %v517_v47  ;;  %v3557_v23 = vshll.u32 %v3379_v26, 16  ;;  %v2975_v33 = vrot.slane %v6734_v4, 5  ;;  %v6747_v14 = vld [vmem:[#allocation2 + $0x60] sm:$0xe] }
 0x175   : > { %1779 = vst.msk [vmem:[#allocation3 + $0x60] sm:$0xf] %vm1770_vm4, %v1691_v6  ;;  %v2974_v6 = vrot.slane %v2972_v41, 4  ;;  %v6749_v43 = vld [vmem:[#allocation2 + $0x64] sm:$0xf]  ;;  %v3552_v63 = vsel %vm5830_vm13, %v3547_v3, %v3551_v48  ;;  %v2494_v55 = vshrl.u32 %v6683_v57, 16 }
 0x176   : > { %2235 = vrot.lane.b32.xlu0 %v2157_v44, %s5665_s16  ;;  %1125 = vst [vmem:[#allocation2 + $0x74] sm:$0x1] %v1124_v38  ;;  %v3380_v44 = vld [vmem:[#allocation2 + $0x64] sm:$0xf]  ;;  %v570_v25 = vmax.f32 %v518_v58, 0.0  ;;  %v2979_v30 = vrot.slane %v6749_v43, 5 }
 0x177   : > { %2042 = vrot.lane.b32.xlu1 %v1954_v51, %s5663_s12  ;;  %2808 = vst.msk [vmem:[#allocation3 + $0x64] sm:$0xf] %vm616_vm2, %v2493_v42  ;;  %v3563_v56 = vshll.u32 %v3380_v44, 16  ;;  %v3567_v15 = vshrl.u32 %v3380_v44, 16  ;;  %v3942_v34 = vld [vmem:[#allocation2 + $0x6c] sm:$0xe]  ;;  %v2976_v19 = vsel %vm5804_vm8, %v2974_v6, %v2975_v33 }
 0x178   : > { %v3802_v62 = vpop.permute.xlu0 %3801  ;;  %1217 = vst.msk [vmem:[#allocation3 + $0x78] sm:$0xf] %vm616_vm2, %v1185_v53  ;;  %v602_v51 = vpack.c.bf16 %v570_v25, %v570_v25  ;;  %v5269_v38 = vrot.slane %v3942_v34, 9  ;;  %v1126_v32 = vld [vmem:[#allocation2 + $0x78] sm:$0xf] }
 0x179   : > { %v2220_v22 = vpop.permute.xlu1 %2219  ;;  %3893 = vst.msk [vmem:[#allocation3 + $0x34] sm:$0xf] %vm2303_vm7, %v3802_v62  ;;  %v3556_v62 = vrot.slane %v3554_v13, 4  ;;  %v3565_v47 = vrot.slane %v3563_v56, 5  ;;  %v3381_v21 = vld [vmem:[#allocation2 + $0x68] sm:$0x1] }
 0x17a   : > { %2310 = vst.msk [vmem:[#allocation3 + $0x48] sm:$0xf] %vm2303_vm7, %v2220_v22  ;;  %1702 = vrot.lane.b32.xlu2 %v1471_v7, %s5664_s13  ;;  %v894_v18 = vshrl.u32 %v602_v51, 16  ;;  %v897_v60 = vshll.u32 %v602_v51, 16  ;;  %v3559_v22 = vrot.slane %v3557_v23, 5  ;;  %v5253_v7 = vrot.slane %v6747_v14, 9 }
 0x17b   : > { %v519_v27 = vpop.f32.mrf.mxu0  ;;  %v3943_v61 = vld [vmem:[#allocation2 + $0x70] sm:$0xf]  ;;  %v3569_v42 = vrot.slane %v3567_v15, 4  ;;  %v1263_v26 = vld [vmem:[#allocation2 + $0x60] sm:$0xf]  ;;  %v3573_v3 = vshll.u32 %v3381_v21, 16 }
 0x17c   : > { %v6718_v54 = vpop.permute.xlu2 %2032  ;;  %v520_v24 = vadd.f32 %v6727_v20, %v519_v27  ;;  %v4068_v41 = vrot.slane %v3943_v61, 5  ;;  %v3560_v57 = vor.u32 %v3559_v22, %v3556_v62  ;;  %v2351_v35 = vld [vmem:[#allocation2 + $0x48] sm:$0xf]  ;;  %v2980_v33 = vsel %vm5804_vm8, %v5253_v7, %v2979_v30  ;;  %v6792_v22 = vld [vmem:[#allocation2 + $0x4c] sm:$0xf] }
 0x17d   : > { %v3944_v28 = vld [vmem:[#allocation2 + $0x74] sm:$0x1]  ;;  %v3570_v51 = vor.u32 %v3569_v42, %v3565_v47  ;;  %v2505_v14 = vshrl.u32 %v2351_v35, 16  ;;  %v1486_v15 = vshll.u32 %v1263_v26, 16  ;;  %v2496_v27 = vrot.slane %v2494_v55, 4 }
 0x17e   : > { %1704 = vrot.lane.b32.xlu0 %v1481_v39, %s5664_s13  ;;  %v4071_v8 = vrot.slane %v3944_v28, 5  ;;  %v571_v2 = vmax.f32 %v520_v24, 0.0  ;;  %v4070_v53 = vrot.slane %v4068_v41, 4  ;;  %v4069_v58 = vsel %vm5804_vm8, %v5269_v38, %v4068_v41  ;;  %v2350_v41 = vld [vmem:[#allocation2 + $0x44] sm:$0x1] }
 0x17f   : > { %3064 = vrot.lane.b32.xlu1 %v2973_v5, %s5664_s13  ;;  %v3561_v23 = vrot.slane %v3560_v57, 4  ;;  %4175 = vst.msk [vmem:[#allocation3 + $0xb0] sm:$0xf] %vm616_vm2, %v4069_v58  ;;  %v3575_v24 = vrot.slane %v3573_v3, 5  ;;  %v1130_v7 = vld [vmem:[#allocation2 + $0x80] sm:$0x1] }
 0x180   : > { %v6738_v11 = vpop.permute.xlu0 %3245  ;;  %v603_v5 = vpack.c.bf16 %v571_v2, %v571_v2  ;;  %v4072_v44 = vsel %vm5804_vm8, %v4070_v53, %v4071_v8  ;;  %v6870_v43 = vld [vmem:[#allocation2 + $0x70] sm:$0xf] }
 0x181   : > { %v1689_v46 = vpop.permute.xlu1 %1688  ;;  %4176 = vst.msk [vmem:[#allocation3 + $0xbc] sm:$0xf] %vm616_vm2, %v4072_v44  ;;  %v3566_v8 = vsel %vm5830_vm13, %v3561_v23, %v3565_v47  ;;  %v1266_v47 = vld [vmem:[#allocation2 + $0x6c] sm:$0xf] }
 0x182   : > { %1778 = vst.msk [vmem:[#allocation3 + $0x54] sm:$0xf] %vm1770_vm4, %v1689_v46  ;;  %2044 = vrot.lane.b32.xlu2 %v1957_v10, %s5663_s12  ;;  %v3182_v46 = vld [vmem:[#allocation2 + $0x64] sm:$0xf]  ;;  %v902_v48 = vshrl.u32 %v603_v5, 16  ;;  %v905_v13 = vshll.u32 %v603_v5, 16 }
 0x183   : > { %2118 = vst.msk [vmem:[#allocation3 + $0x54] sm:$0xf] %vm2110_vm6, %v6651_v9  ;;  %v1961_v9 = vsel %vm5804_vm8, %v5238_v59, %v1960_v1  ;;  %v5316_v59 = vld [vmem:[#allocation3 + $0x48] sm:$0xf]  ;;  %v1483_v10 = vshrl.u32 %v1263_v26, 16  ;;  %v2500_v5 = vshll.u32 %v2350_v41, 16 }
 0x184   : > { %2311 = vst.msk [vmem:[#allocation3 + $0x54] sm:$0xf] %vm2303_vm7, %v6658_v31  ;;  %v3055_v29 = vpop.permute.xlu2 %3054  ;;  %v6760_v31 = vrot.slane %v894_v18, 7  ;;  %v904_v56 = vrot.slane %v902_v48, 7  ;;  %v661_v18 = vld [vmem:[#allocation2 + $0x84] sm:$0x1] }
 0x185   : > { %3143 = vst.msk [vmem:[#allocation3 + $0x58] sm:$0xf] %vm1770_vm4, %v3055_v29  ;;  %v662_v34 = vsel %vm5826_vm10, 0, %v661_v18  ;;  %v3571_v29 = vrot.slane %v3570_v51, 4  ;;  %v1507_v44 = vshrl.u32 %v1266_v47, 16  ;;  %v1962_v41 = vrot.slane %v1960_v1, 4 }
 0x186   : > { %2046 = vrot.lane.b32.xlu0 %v1961_v9, %s5663_s12  ;;  %v899_v36 = vor.u32 %v897_v60, %v6760_v31  ;;  %v1264_v60 = vld [vmem:[#allocation2 + $0x64] sm:$0xf]  ;;  %v2508_v9 = vshll.u32 %v2351_v35, 16  ;;  %v907_v62 = vor.u32 %v905_v13, %v904_v56  ;;  %663 = vst [vmem:[#allocation2 + $0x84] sm:$0x1] %v662_v34  ;;  %v909_v38 = vrot.slane %v904_v56, 4 }
 0x187   : > { %3815 = vrot.lane.b32.xlu1 %v3552_v63, %s5665_s16  ;;  %v900_v63 = vrot.slane %v6760_v31, 4  ;;  %v1488_v31 = vrot.slane %v1486_v15, 5  ;;  %v1492_v2 = vshll.u32 %v1264_v60, 16  ;;  %v1496_v55 = vshrl.u32 %v1264_v60, 16  ;;  %v5372_v21 = vld [vmem:[#allocation3 + $0xb0] sm:$0xf] }
 0x188   : > { %v2224_v49 = vpop.permute.xlu0 %2223  ;;  %v1127_v39 = vsel %vm5878_vm14, %v899_v36, %v1126_v32  ;;  %v2507_v32 = vrot.slane %v2505_v14, 4  ;;  %v1485_v36 = vrot.slane %v1483_v10, 4  ;;  %v5585_v42 = vld [vmem:[#allocation3 + $0xb8] sm:$0xf0]  ;;  %v3576_v58 = vsel %vm5830_vm13, %v3571_v29, %v3575_v24  ;;  %v2158_v35 = vld [vmem:[#allocation2 + $0x64] sm:$0xf] }
 0x189   : > { %v2031_v50 = vpop.permute.xlu1 %2030  ;;  %1128 = vst [vmem:[#allocation2 + $0x78] sm:$0xf] %v1127_v39  ;;  %v908_v57 = vsel %vm5888_vm0, %v900_v63, %v907_v62  ;;  %v2497_v39 = vor.u32 %v2496_v27, %v6708_v37  ;;  %v1498_v37 = vrot.slane %v1496_v55, 4  ;;  %v717_v48 = vld [vmem:[#allocation2 + $0x8c] sm:$0x1]  ;;  %v1509_v27 = vrot.slane %v1507_v44, 4 }
 0x18a   : > { %2119 = vst.msk [vmem:[#allocation3 + $0x60] sm:$0xf] %vm2110_vm6, %v2031_v50  ;;  %3066 = vrot.lane.b32.xlu2 %v2976_v19, %s5664_s13  ;;  %v2514_v50 = vshll.u32 %v6792_v22, 16  ;;  %v1489_v19 = vor.u32 %v1488_v31, %v1485_v36  ;;  %v3183_v51 = vld [vmem:[#allocation2 + $0x6c] sm:$0xf]  ;;  %v718_v10 = vsel %vm5790_vm5, 0, %v717_v48 }
 0x18b   : > { %2312 = vst.msk [vmem:[#allocation3 + $0x60] sm:$0xf] %vm2303_vm7, %v2224_v49  ;;  %v5572_v4 = vld [vmem:[#allocation3 + $0x50] sm:$0xf0]  ;;  %v2510_v49 = vrot.slane %v2508_v9, 5  ;;  %v2498_v14 = vrot.slane %v2497_v39, 4 }
 0x18c   : > { %v5317_v25 = vor.u32 %v5572_v4, %v5316_v59  ;;  %v3806_v6 = vpop.permute.xlu2 %3805  ;;  %v5373_v59 = vor.u32 %v5585_v42, %v5372_v21  ;;  %v1265_v4 = vld [vmem:[#allocation2 + $0x68] sm:$0x1]  ;;  %1129 = vst.msk [vmem:[#allocation2 + $0x7c] sm:$0xf] %vm616_vm2, %v908_v57  ;;  %v6818_v3 = vrot.slane %v2514_v50, 5  ;;  %v1490_v56 = vrot.slane %v1489_v19, 4 }
 0x18d   : > { %v2511_v53 = vor.u32 %v2510_v49, %v2507_v32  ;;  %v6825_v15 = vld [vmem:[#allocation2 + $0x68] sm:$0x1]  ;;  %v1502_v9 = vshll.u32 %v1265_v4, 16  ;;  %v6831_v62 = vld [vmem:[#allocation2 + $0x70] sm:$0xf] }
 0x18e   : > { %4713 = vmatmul.bf16.gmra.mxu1 %v5317_v25  ;;  %3068 = vrot.lane.b32.xlu0 %v2980_v33, %s5664_s13  ;;  %v1510_v25 = vshll.u32 %v1266_v47, 16  ;;  %v3184_v33 = vld [vmem:[#allocation2 + $0x70] sm:$0xf]  ;;  %719 = vst [vmem:[#allocation2 + $0x8c] sm:$0x1] %v718_v10  ;;  %v1520_v50 = vshrl.u32 %v6831_v62, 16 }
 0x18f   : > { %3259 = vrot.lane.b32.xlu1 %v3182_v46, %s5663_s12  ;;  %5549 = vmatmul.msk.bf16.gmra.mxu3 %vm4641_vm3, %v5373_v59  ;;  %v2512_v46 = vrot.slane %v2511_v53, 4  ;;  %v522_v18 = vpop.f32.mrf.mxu0  ;;  %v3382_v36 = vld [vmem:[#allocation2 + $0x6c] sm:$0xf]  ;;  %v6849_v55 = vrot.slane %v1502_v9, 5  ;;  %v2855_v1 = vld [vmem:[#allocation2 + $0x68] sm:$0x1] }
 0x190   : > { %v1693_v61 = vpop.permute.xlu0 %1692  ;;  %v523_v63 = vadd.f32 %v6727_v20, %v522_v18  ;;  %v5568_v31 = vld [vmem:[#allocation3 + $0x34] sm:$0xf]  ;;  %v6853_v57 = vld [vmem:[#allocation2 + $0x70] sm:$0xf]  ;;  %v2981_v59 = vrot.slane %v2979_v30, 4  ;;  %v2518_v30 = vshrl.u32 %v6792_v22, 16 }
 0x191   : > { %v3053_v28 = vpop.permute.xlu1 %3052  ;;  %1780 = vst.msk [vmem:[#allocation3 + $0x6c] sm:$0xf] %vm1770_vm4, %v1693_v61  ;;  %v2517_v60 = vsel %vm5830_vm13, %v2512_v46, %v6818_v3  ;;  %v1512_v61 = vrot.slane %v1510_v25, 5  ;;  %v1133_v44 = vld [vmem:[#allocation2 + $0x84] sm:$0xf]  ;;  %v2982_v25 = vrot.slane %v2855_v1, 5 }
 0x192   : > { %2120 = vst.msk [vmem:[#allocation3 + $0x6c] sm:$0xf] %vm2110_vm6, %v6718_v54  ;;  %3817 = vrot.lane.b32.xlu2 %v3566_v8, %s5665_s16  ;;  %v1131_v54 = vsel %vm5826_vm10, %v909_v38, %v1130_v7  ;;  %v572_v29 = vmax.f32 %v523_v63, 0.0  ;;  %v1963_v8 = vrot.slane %v6825_v15, 5  ;;  %v1516_v7 = vshll.u32 %v6831_v62, 16 }
 0x193   : > { %3142 = vst.msk [vmem:[#allocation3 + $0x4c] sm:$0xf] %vm1770_vm4, %v3053_v28  ;;  %v1187_v28 = vld [vmem:[#allocation2 + $0x48] sm:$0xf]  ;;  %v1513_v45 = vor.u32 %v1512_v61, %v1509_v27  ;;  %v2160_v48 = vld [vmem:[#allocation2 + $0x70] sm:$0xf] }
 0x194   : > { %3335 = vst.msk [vmem:[#allocation3 + $0x4c] sm:$0xf] %vm2110_vm6, %v6738_v11  ;;  %v6810_v26 = vpop.permute.xlu2 %3249  ;;  %v1494_v11 = vrot.slane %v1492_v2, 5  ;;  %v604_v49 = vpack.c.bf16 %v572_v29, %v572_v29  ;;  %v6857_v19 = vrot.slane %v1516_v7, 5  ;;  %v1964_v18 = vsel %vm5804_vm8, %v1962_v41, %v1963_v8  ;;  %v3946_v22 = vld [vmem:[#allocation2 + $0x7c] sm:$0xf] }
 0x195   : > { %3895 = vst.msk [vmem:[#allocation3 + $0x4c] sm:$0xf] %vm2303_vm7, %v3806_v6  ;;  %v2502_v6 = vrot.slane %v2500_v5, 5  ;;  %v3578_v5 = vshrl.u32 %v3382_v36, 16  ;;  %v6886_v27 = vld [vmem:[#allocation2 + $0x70] sm:$0xf] }
 0x196   : > { %3819 = vrot.lane.b32.xlu0 %v3576_v58, %s5665_s16  ;;  %1132 = vst [vmem:[#allocation2 + $0x80] sm:$0x1] %v1131_v54  ;;  %v1499_v34 = vor.u32 %v1498_v37, %v1494_v11  ;;  %v1495_v32 = vsel %vm5830_vm13, %v1490_v56, %v1494_v11  ;;  %v2159_v54 = vld [vmem:[#allocation2 + $0x6c] sm:$0xf]  ;;  %v911_v53 = vshrl.u32 %v604_v49, 16  ;;  %v914_v39 = vshll.u32 %v604_v49, 16 }
 0x197   : > { %2237 = vrot.lane.b32.xlu1 %v2158_v35, %s5665_s16  ;;  %2810 = vst.msk [vmem:[#allocation3 + $0x7c] sm:$0xf] %vm616_vm2, %v2517_v60  ;;  %v2503_v24 = vsel %vm5830_vm13, %v2498_v14, %v2502_v6  ;;  %v3581_v58 = vshll.u32 %v3382_v36, 16  ;;  %v524_v4 = vpop.f32.mrf.mxu0  ;;  %v1188_v11 = vld [vmem:[#allocation2 + $0x4c] sm:$0xf]  ;;  %v4075_v41 = vrot.slane %v3946_v22, 5 }
 0x198   : > { %v6820_v13 = vpop.permute.xlu0 %2034  ;;  %v6847_v2 = vrot.slane %v1499_v34, 4  ;;  %1219 = vst.msk [vmem:[#allocation3 + $0x90] sm:$0xf] %vm616_vm2, %v1187_v28  ;;  %v6863_v37 = vrot.slane %v911_v53, 7  ;;  %v525_v46 = vadd.f32 %v6727_v20, %v524_v4  ;;  %v6876_v14 = vld [vmem:[#allocation2 + $0x6c] sm:$0xe] }
 0x199   : > { %v3804_v23 = vpop.permute.xlu1 %3803  ;;  %2809 = vst.msk [vmem:[#allocation3 + $0x70] sm:$0xf] %vm616_vm2, %v2503_v24  ;;  %v3583_v56 = vrot.slane %v3581_v58, 5  ;;  %v664_v60 = vld [vmem:[#allocation2 + $0x90] sm:$0x1]  ;;  %v1967_v49 = vrot.slane %v6870_v43, 5 }
 0x19a   : > { %3894 = vst.msk [vmem:[#allocation3 + $0x40] sm:$0xf] %vm2303_vm7, %v3804_v23  ;;  %3261 = vrot.lane.b32.xlu2 %v3183_v51, %s5663_s12  ;;  %v6868_v23 = vrot.slane %v1513_v45, 4  ;;  %v3591_v51 = vshrl.u32 %v6853_v57, 16  ;;  %v916_v10 = vor.u32 %v914_v39, %v6863_v37  ;;  %v573_v6 = vmax.f32 %v525_v46, 0.0 }
 0x19b   : > { %1220 = vst.msk [vmem:[#allocation3 + $0x9c] sm:$0xf] %vm616_vm2, %v1188_v11  ;;  %v3945_v34 = vld [vmem:[#allocation2 + $0x78] sm:$0xe]  ;;  %v665_v61 = vsel %vm5826_vm10, 0, %v664_v60  ;;  %v1505_v24 = vsel %vm5830_vm13, %v6847_v2, %v6849_v55  ;;  %v2520_v2 = vrot.slane %v2518_v30, 4 }
 0x19c   : > { %v6837_v38 = vpop.permute.xlu2 %2227  ;;  %v1134_v9 = vsel %vm5878_vm14, %v916_v10, %v1133_v44  ;;  %v605_v63 = vpack.c.bf16 %v573_v6, %v573_v6  ;;  %v5270_v29 = vrot.slane %v3945_v34, 9  ;;  %v2353_v7 = vld [vmem:[#allocation2 + $0x50] sm:$0x1]  ;;  %666 = vst [vmem:[#allocation2 + $0x90] sm:$0x1] %v665_v61  ;;  %v5239_v55 = vrot.slane %v6876_v14, 9 }
 0x19d   : > { %v3947_v28 = vld [vmem:[#allocation2 + $0x80] sm:$0x1]  ;;  %1135 = vst [vmem:[#allocation2 + $0x84] sm:$0xf] %v1134_v9  ;;  %v4077_v39 = vrot.slane %v4075_v41, 4  ;;  %v1519_v4 = vsel %vm5830_vm13, %v6868_v23, %v6857_v19  ;;  %v2986_v11 = vrot.slane %v6886_v27, 5  ;;  %v2521_v30 = vor.u32 %v2520_v2, %v6818_v3 }
 0x19e   : > { %3263 = vrot.lane.b32.xlu0 %v3184_v33, %s5663_s12  ;;  %v3580_v33 = vrot.slane %v3578_v5, 4  ;;  %v4078_v8 = vrot.slane %v3947_v28, 5  ;;  %v919_v45 = vshrl.u32 %v605_v63, 16  ;;  %v922_v1 = vshll.u32 %v605_v63, 16  ;;  %v5328_v34 = vld [vmem:[#allocation3 + $0x60] sm:$0xf] }
 0x19f   : > { %1706 = vrot.lane.b32.xlu1 %v1495_v32, %s5664_s13  ;;  %v2983_v32 = vsel %vm5804_vm8, %v2981_v59, %v2982_v25  ;;  %v4076_v53 = vsel %vm5804_vm8, %v5270_v29, %v4075_v41  ;;  %v917_v5 = vrot.slane %v6863_v37, 4  ;;  %v2524_v59 = vshll.u32 %v2353_v7, 16  ;;  %v3384_v25 = vld [vmem:[#allocation2 + $0x74] sm:$0x1]  ;;  %v6939_v61 = vld [vmem:[#allocation2 + $0x7c] sm:$0xf] }
 0x1a0   : > { %v3057_v21 = vpop.permute.xlu0 %3056  ;;  %v921_v58 = vrot.slane %v919_v45, 7  ;;  %v4079_v44 = vsel %vm5804_vm8, %v4077_v39, %v4078_v8  ;;  %4177 = vst.msk [vmem:[#allocation3 + $0xc8] sm:$0xf] %vm616_vm2, %v4076_v53  ;;  %v3593_v37 = vrot.slane %v3591_v51, 4  ;;  %v1969_v43 = vrot.slane %v1967_v49, 4 }
 0x1a1   : > { %v3248_v47 = vpop.permute.xlu1 %3247  ;;  %v5306_v42 = vld [vmem:[#allocation3 + $0x3c] sm:$0xf0]  ;;  %3144 = vst.msk [vmem:[#allocation3 + $0x64] sm:$0xf] %vm1770_vm4, %v3057_v21  ;;  %v6899_v21 = vld [vmem:[#allocation2 + $0x6c] sm:$0xe] }
 0x1a2   : > { %v5309_v35 = vor.u32 %v5568_v31, %v5306_v42  ;;  %3337 = vst.msk [vmem:[#allocation3 + $0x64] sm:$0xf] %vm2110_vm6, %v6810_v26  ;;  %2239 = vrot.lane.b32.xlu2 %v2159_v54, %s5665_s16  ;;  %v3587_v26 = vshll.u32 %v6853_v57, 16  ;;  %v6897_v57 = vld [vmem:[#allocation2 + $0x74] sm:$0x1]  ;;  %v3584_v42 = vor.u32 %v3583_v56, %v3580_v33  ;;  %v924_v46 = vor.u32 %v922_v1, %v921_v58 }
 0x1a3   : > { %3336 = vst.msk [vmem:[#allocation3 + $0x58] sm:$0xf] %vm2110_vm6, %v3248_v47  ;;  %v6901_v47 = vld [vmem:[#allocation2 + $0x74] sm:$0x1]  ;;  %v1137_v54 = vld [vmem:[#allocation2 + $0x8c] sm:$0x1] }
 0x1a4   : > { %4797 = vmatmul.bf16.gmra.mxu2 %v5309_v35  ;;  %v1697_v15 = vpop.permute.xlu2 %1696  ;;  %v6909_v35 = vrot.slane %v3587_v26, 5  ;;  %4178 = vst.msk [vmem:[#allocation3 + $0xd4] sm:$0xf] %vm616_vm2, %v4079_v44  ;;  %v1970_v23 = vrot.slane %v6897_v57, 5  ;;  %v3585_v10 = vrot.slane %v3584_v42, 4  ;;  %v5254_v14 = vrot.slane %v6899_v21, 9 }
 0x1a5   : > { %1782 = vst.msk [vmem:[#allocation3 + $0x84] sm:$0xf] %vm1770_vm4, %v1697_v15  ;;  %v2989_v6 = vrot.slane %v6901_v47, 5  ;;  %v3385_v33 = vld [vmem:[#allocation2 + $0x78] sm:$0xf]  ;;  %v925_v56 = vsel %vm5888_vm0, %v917_v5, %v924_v46  ;;  %v3597_v15 = vshll.u32 %v3384_v25, 16  ;;  %v527_v9 = vpop.f32.mrf.mxu0 }
 0x1a6   : > { %2241 = vrot.lane.b32.xlu0 %v2160_v48, %s5665_s16  ;;  %v926_v48 = vrot.slane %v921_v58, 4  ;;  %v5571_v51 = vld [vmem:[#allocation3 + $0x4c] sm:$0xf]  ;;  %v2526_v60 = vrot.slane %v2524_v59, 5  ;;  %1136 = vst.msk [vmem:[#allocation2 + $0x88] sm:$0xf] %vm616_vm2, %v925_v56  ;;  %v3594_v63 = vor.u32 %v3593_v37, %v6909_v35  ;;  %v528_v41 = vadd.f32 %v6727_v20, %v527_v9 }
 0x1a7   : > { %2048 = vrot.lane.b32.xlu1 %v1964_v18, %s5663_s12  ;;  %v720_v18 = vld [vmem:[#allocation2 + $0x98] sm:$0x1]  ;;  %v6936_v22 = vrot.slane %v2986_v11, 4  ;;  %v6943_v28 = vrot.slane %v1520_v50, 4  ;;  %v3602_v8 = vshrl.u32 %v3385_v33, 16  ;;  %v3605_v50 = vshll.u32 %v3385_v33, 16 }
 0x1a8   : > { %v3808_v36 = vpop.permute.xlu0 %3807  ;;  %v1138_v3 = vsel %vm5826_vm10, %v926_v48, %v1137_v54  ;;  %v6948_v7 = vld [vmem:[#allocation2 + $0x74] sm:$0x1]  ;;  %v721_v1 = vsel %vm5790_vm5, 0, %v720_v18  ;;  %v574_v2 = vmax.f32 %v528_v41, 0.0  ;;  %v5384_v54 = vld [vmem:[#allocation3 + $0xc8] sm:$0xf]  ;;  %v3590_v44 = vsel %vm5830_vm13, %v3585_v10, %v6909_v35 }
 0x1a9   : > { %v2226_v31 = vpop.permute.xlu1 %2225  ;;  %3896 = vst.msk [vmem:[#allocation3 + $0x58] sm:$0xf] %vm2303_vm7, %v3808_v36  ;;  %v2522_v36 = vrot.slane %v2521_v30, 4  ;;  %v6957_v42 = vrot.slane %v3597_v15, 5  ;;  %v3611_v39 = vshll.u32 %v6939_v61, 16  ;;  %v6967_v58 = vrot.slane %v3602_v8, 4 }
 0x1aa   : > { %2313 = vst.msk [vmem:[#allocation3 + $0x6c] sm:$0xf] %vm2303_vm7, %v2226_v31  ;;  %1708 = vrot.lane.b32.xlu2 %v1505_v24, %s5664_s13  ;;  %v1968_v31 = vsel %vm5804_vm8, %v5239_v55, %v1967_v49  ;;  %v6964_v55 = vrot.slane %v3594_v63, 4  ;;  %v3615_v59 = vshrl.u32 %v6939_v61, 16  ;;  %v3607_v25 = vrot.slane %v3605_v50, 5 }
 0x1ab   : > { %1139 = vst [vmem:[#allocation2 + $0x8c] sm:$0x1] %v1138_v3  ;;  %v2527_v53 = vsel %vm5830_vm13, %v2522_v36, %v2526_v60  ;;  %v5588_v49 = vld [vmem:[#allocation3 + $0xd0] sm:$0xf0]  ;;  %v1526_v37 = vshll.u32 %v6948_v7, 16 }
 0x1ac   : > { %v6922_v26 = vpop.permute.xlu2 %2038  ;;  %v5385_v5 = vor.u32 %v5588_v49, %v5384_v54  ;;  %722 = vst [vmem:[#allocation2 + $0x98] sm:$0x1] %v721_v1  ;;  %v667_v46 = vld [vmem:[#allocation2 + $0x9c] sm:$0x1]  ;;  %v1140_v10 = vld [vmem:[#allocation2 + $0x90] sm:$0xf]  ;;  %v3608_v8 = vor.u32 %v3607_v25, %v6967_v58 }
 0x1ad   : > { %2811 = vst.msk [vmem:[#allocation3 + $0x88] sm:$0xf] %vm616_vm2, %v2527_v53  ;;  %v668_v35 = vsel %vm5826_vm10, 0, %v667_v46  ;;  %v529_v33 = vpop.f32.mrf.mxu0  ;;  %v5650_v56 = vld [vmem:[%s8055_s1] ss:$0 sm:$0xff] }
 0x1ae   : > { %1710 = vrot.lane.b32.xlu0 %v1519_v4, %s5664_s13  ;;  %5550 = vmatmul.msk.bf16.gmra.mxu3 %vm4641_vm3, %v5385_v5  ;;  %669 = vst [vmem:[#allocation2 + $0x9c] sm:$0x1] %v668_v35  ;;  %v1270_v9 = vld [vmem:[#allocation2 + $0x7c] sm:$0xf]  ;;  %v5651_v21 = vld [vmem:[%s8056_s2] ss:$0 sm:$0xff] }
 0x1af   : > { %3070 = vrot.lane.b32.xlu1 %v2983_v32, %s5664_s13  ;;  %v1544_v50 = vshrl.u32 %v1270_v9, 16 }
 0x1b0   : > { %v6945_v29 = vpop.permute.xlu0 %3251  ;;  %v5318_v32 = vld [vmem:[#allocation3 + $0x54] sm:$0xf0] }
 0x1b1   : > { %v1695_v24 = vpop.permute.xlu1 %1694  ;;  %v5575_v45 = vld [vmem:[#allocation3 + $0x68] sm:$0xf0]  ;;  %v5321_v62 = vor.u32 %v5571_v51, %v5318_v32  ;;  %v1269_v51 = vld [vmem:[#allocation2 + $0x78] sm:$0xf] }
 0x1b2   : > { %1781 = vst.msk [vmem:[#allocation3 + $0x78] sm:$0xf] %vm1770_vm4, %v1695_v24  ;;  %v5329_v57 = vor.u32 %v5575_v45, %v5328_v34  ;;  %2050 = vrot.lane.b32.xlu2 %v1968_v31, %s5663_s12  ;;  %v530_v34 = vadd.f32 %v6727_v20, %v529_v33  ;;  %v1531_v63 = vshrl.u32 %v1269_v51, 16  ;;  %v7002_v24 = vrot.slane %v3611_v39, 5  ;;  %v7015_v45 = vld [vmem:[#allocation2 + $0x7c] sm:$0xf] }
 0x1b3   : > { %2121 = vst.msk [vmem:[#allocation3 + $0x78] sm:$0xf] %vm2110_vm6, %v6820_v13  ;;  %v606_v13 = vpack.c.bf16 %v574_v2, %v574_v2  ;;  %v1534_v32 = vshll.u32 %v1269_v51, 16  ;;  %v7013_v31 = vrot.slane %v1526_v37, 5  ;;  %v1974_v37 = vrot.slane %v7015_v45, 5 }
 0x1b4   : > { %2314 = vst.msk [vmem:[#allocation3 + $0x78] sm:$0xf] %vm2303_vm7, %v6837_v38  ;;  %4802 = vmatmul.bf16.gmra.mxu2 %v5321_v62  ;;  %4718 = vmatmul.bf16.gmra.mxu1 %v5329_v57  ;;  %v3061_v4 = vpop.permute.xlu2 %3060  ;;  %v1971_v38 = vsel %vm5804_vm8, %v1969_v43, %v1970_v23  ;;  %v1523_v43 = vor.u32 %v6943_v28, %v6857_v19  ;;  %v283_v23 = vld [vmem:[%s5721_s30 + $0xf0] sm:$0xff]  ;;  %v284_v28 = vld [vmem:[%s5721_s30 + $0xf8] sm:$0xff]  ;;  %v575_v36 = vmax.f32 %v530_v34, 0.0  ;;  %v1540_v62 = vshll.u32 %v1270_v9, 16 }
 0x1b5   : > { %3146 = vst.msk [vmem:[#allocation3 + $0x7c] sm:$0xf] %vm1770_vm4, %v3061_v4  ;;  %v928_v48 = vshrl.u32 %v606_v13, 16  ;;  %v931_v30 = vshll.u32 %v606_v13, 16  ;;  %v319_v3 = vmul.f32 %v5650_v56, %v283_v23  ;;  %v2987_v19 = vsel %vm5804_vm8, %v5254_v14, %v2986_v11  ;;  %v1189_v14 = vld [vmem:[#allocation2 + $0x54] sm:$0xf] }
 0x1b6   : > { %2052 = vrot.lane.b32.xlu0 %v1971_v38, %s5663_s12  ;;  %4987 = vst.msk [vmem:[%s5731_s11 + $0xf0] sm:$0xff] %vm410_vm1, %v283_v23  ;;  %v320_v27 = vmul.f32 %v5650_v56, %v284_v28  ;;  %v7010_v7 = vrot.slane %v1523_v43, 4  ;;  %v3185_v57 = vld [vmem:[#allocation2 + $0x78] sm:$0xf]  ;;  %v607_v54 = vpack.c.bf16 %v575_v36, %v575_v36  ;;  %v1533_v53 = vrot.slane %v1531_v63, 4 }
 0x1b7   : > { %3821 = vrot.lane.b32.xlu1 %v3590_v44, %s5665_s16  ;;  %v6995_v60 = vrot.slane %v928_v48, 7  ;;  %v355_v11 = vadd.f32 %v5651_v21, %v319_v3  ;;  %4988 = vst.msk [vmem:[%s5731_s11 + $0xf8] sm:$0xff] %vm410_vm1, %v284_v28  ;;  %v2990_v13 = vsel %vm5804_vm8, %v6936_v22, %v2989_v6  ;;  %v1536_v5 = vrot.slane %v1534_v32, 5  ;;  %v1271_v4 = vld [vmem:[#allocation2 + $0x80] sm:$0x1]  ;;  %v532_v48 = vpop.f32.mrf.mxu0 }
 0x1b8   : > { %v2230_v15 = vpop.permute.xlu0 %2229  ;;  %v356_v1 = vadd.f32 %v5651_v21, %v320_v27  ;;  %1221 = vst.msk [vmem:[#allocation3 + $0xa8] sm:$0xf] %vm616_vm2, %v1189_v14  ;;  %v3609_v38 = vrot.slane %v3608_v8, 4  ;;  %v936_v44 = vshrl.u32 %v607_v54, 16  ;;  %v939_v25 = vshll.u32 %v607_v54, 16 }
 0x1b9   : > { %v2037_v18 = vpop.permute.xlu1 %2036  ;;  %v933_v41 = vor.u32 %v931_v30, %v6995_v60  ;;  %v387_v49 = vmax.f32 %v355_v11, 0.0  ;;  %v934_v46 = vrot.slane %v6995_v60, 4  ;;  %v7031_v30 = vrot.slane %v1540_v62, 5  ;;  %v7033_v33 = vld [vmem:[#allocation2 + $0x78] sm:$0xe] }
 0x1ba   : > { %2122 = vst.msk [vmem:[#allocation3 + $0x84] sm:$0xf] %vm2110_vm6, %v2037_v18  ;;  %3072 = vrot.lane.b32.xlu2 %v2987_v19, %s5664_s13  ;;  %v388_v58 = vmax.f32 %v356_v1, 0.0  ;;  %v1546_v22 = vrot.slane %v1544_v50, 4  ;;  %v938_v23 = vrot.slane %v936_v44, 7  ;;  %v533_v51 = vadd.f32 %v6727_v20, %v532_v48 }
 0x1bb   : > { %2315 = vst.msk [vmem:[#allocation3 + $0x84] sm:$0xf] %vm2303_vm7, %v2230_v15  ;;  %v1141_v2 = vsel %vm5878_vm14, %v933_v41, %v1140_v10  ;;  %v5340_v47 = vld [vmem:[#allocation3 + $0x78] sm:$0xf]  ;;  %v1144_v10 = vld [vmem:[#allocation2 + $0x98] sm:$0x1]  ;;  %v3600_v15 = vsel %vm5830_vm13, %v6964_v55, %v6957_v42  ;;  %v1529_v19 = vsel %vm5830_vm13, %v7010_v7, %v7013_v31  ;;  %v1537_v60 = vor.u32 %v1536_v5, %v1533_v53 }
 0x1bc   : > { %v3812_v39 = vpop.permute.xlu2 %3811  ;;  %1142 = vst [vmem:[#allocation2 + $0x90] sm:$0xf] %v1141_v2  ;;  %v404_v6 = vpack.c.bf16 %v388_v58, %v387_v49  ;;  %v1550_v56 = vshll.u32 %v1271_v4, 16  ;;  %v3948_v3 = vld [vmem:[#allocation2 + $0x84] sm:$0xe]  ;;  %v941_v28 = vor.u32 %v939_v25, %v938_v23  ;;  %v943_v32 = vrot.slane %v938_v23, 4 }
 0x1bd   : > { %v7046_v34 = vld [vmem:[#allocation2 + $0x78] sm:$0xe]  ;;  %v723_v9 = vld [vmem:[#allocation2 + $0xa4] sm:$0x1]  ;;  %v576_v27 = vmax.f32 %v533_v51, 0.0  ;;  %v3614_v55 = vsel %vm5830_vm13, %v3609_v38, %v7002_v24  ;;  %v1547_v21 = vor.u32 %v1546_v22, %v7031_v30  ;;  %v5271_v14 = vrot.slane %v3948_v3, 9 }
 0x1be   : > { %3074 = vrot.lane.b32.xlu0 %v2990_v13, %s5664_s13  ;;  %5229 = vmatmul.msk.bf16.gmra.mxu0 %vm410_vm1, %v404_v6  ;;  %v3949_v42 = vld [vmem:[#allocation2 + $0x88] sm:$0xf]  ;;  %v3950_v11 = vld [vmem:[#allocation2 + $0x8c] sm:$0x1]  ;;  %v1145_v8 = vsel %vm5826_vm10, %v943_v32, %v1144_v10  ;;  %v7062_v36 = vld [vmem:[#allocation2 + $0x7c] sm:$0xf] }
 0x1bf   : > { %3265 = vrot.lane.b32.xlu1 %v3185_v57, %s5663_s12  ;;  %v4082_v41 = vrot.slane %v3949_v42, 5  ;;  %v608_v7 = vpack.c.bf16 %v576_v27, %v576_v27  ;;  %v4085_v31 = vrot.slane %v3950_v11, 5  ;;  %v5240_v50 = vrot.slane %v7033_v33, 9  ;;  %1146 = vst [vmem:[#allocation2 + $0x98] sm:$0x1] %v1145_v8  ;;  %v534_v58 = vpop.f32.mrf.mxu0 }
 0x1c0   : > { %v1699_v43 = vpop.permute.xlu0 %1698  ;;  %v7068_v1 = vrot.slane %v1537_v60, 4  ;;  %v7075_v53 = vrot.slane %v1550_v56, 5  ;;  %v5255_v49 = vrot.slane %v7046_v34, 9  ;;  %v7078_v13 = vrot.slane %v1547_v21, 4  ;;  %v7083_v38 = vld [vmem:[#allocation2 + $0x80] sm:$0x1] }
 0x1c1   : > { %v3059_v35 = vpop.permute.xlu1 %3058  ;;  %1783 = vst.msk [vmem:[#allocation3 + $0x90] sm:$0xf] %vm1770_vm4, %v1699_v43  ;;  %v4084_v57 = vrot.slane %v4082_v41, 4  ;;  %v945_v2 = vshrl.u32 %v608_v7, 16  ;;  %v948_v54 = vshll.u32 %v608_v7, 16  ;;  %v2993_v5 = vrot.slane %v7062_v36, 5 }
 0x1c2   : > { %v5578_v18 = vld [vmem:[#allocation3 + $0x80] sm:$0xf0]  ;;  %2123 = vst.msk [vmem:[#allocation3 + $0x90] sm:$0xf] %vm2110_vm6, %v6922_v26  ;;  %3823 = vrot.lane.b32.xlu2 %v3600_v15, %s5665_s16  ;;  %v942_v26 = vsel %vm5888_vm0, %v934_v46, %v941_v28  ;;  %v4083_v4 = vsel %vm5804_vm8, %v5271_v14, %v4082_v41  ;;  %v535_v48 = vadd.f32 %v6727_v20, %v534_v58  ;;  %v7094_v22 = vrot.slane %v1974_v37, 4 }
 0x1c3   : > { %v5341_v63 = vor.u32 %v5578_v18, %v5340_v47  ;;  %3145 = vst.msk [vmem:[#allocation3 + $0x70] sm:$0xf] %vm1770_vm4, %v3059_v35  ;;  %v3186_v46 = vld [vmem:[#allocation2 + $0x7c] sm:$0xf]  ;;  %v7087_v47 = vrot.slane %v945_v2, 7  ;;  %v4086_v6 = vsel %vm5804_vm8, %v4084_v57, %v4085_v31  ;;  %v1977_v20 = vrot.slane %v7083_v38, 5 }
 0x1c4   : > { %3338 = vst.msk [vmem:[#allocation3 + $0x70] sm:$0xf] %vm2110_vm6, %v6945_v29  ;;  %v7065_v62 = vpop.permute.xlu2 %3255  ;;  %v724_v29 = vsel %vm5790_vm5, 0, %v723_v9  ;;  %v3387_v43 = vld [vmem:[#allocation2 + $0x80] sm:$0x1]  ;;  %v577_v51 = vmax.f32 %v535_v48, 0.0  ;;  %v1975_v32 = vsel %vm5804_vm8, %v5240_v50, %v1974_v37  ;;  %v1543_v27 = vsel %vm5830_vm13, %v7068_v1, %v7031_v30 }
 0x1c5   : > { %4723 = vmatmul.bf16.gmra.mxu1 %v5341_v63  ;;  %3898 = vst.msk [vmem:[#allocation3 + $0x70] sm:$0xf] %vm2303_vm7, %v3812_v39  ;;  %v1147_v39 = vld [vmem:[#allocation2 + $0x9c] sm:$0xf]  ;;  %v3187_v35 = vld [vmem:[#allocation2 + $0x84] sm:$0xf]  ;;  %v950_v33 = vor.u32 %v948_v54, %v7087_v47 }
 0x1c6   : > { %3825 = vrot.lane.b32.xlu0 %v3614_v55, %s5665_s16  ;;  %1143 = vst.msk [vmem:[#allocation2 + $0x94] sm:$0xf] %vm616_vm2, %v942_v26  ;;  %v7097_v23 = vld [vmem:[#allocation2 + $0x84] sm:$0xe]  ;;  %v670_v10 = vld [vmem:[#allocation2 + $0xa8] sm:$0x1]  ;;  %v609_v60 = vpack.c.bf16 %v577_v51, %v577_v51 }
 0x1c7   : > { %1712 = vrot.lane.b32.xlu1 %v1529_v19, %s5664_s13  ;;  %725 = vst [vmem:[#allocation2 + $0xa4] sm:$0x1] %v724_v29  ;;  %v2355_v56 = vld [vmem:[#allocation2 + $0x58] sm:$0xf]  ;;  %v7104_v3 = vld [vmem:[#allocation2 + $0x88] sm:$0xf]  ;;  %v1148_v19 = vsel %vm5878_vm14, %v950_v33, %v1147_v39  ;;  %v537_v8 = vpop.f32.mrf.mxu0 }
 0x1c8   : > { %v7085_v44 = vpop.permute.xlu0 %2040  ;;  %4179 = vst.msk [vmem:[#allocation3 + $0xe0] sm:$0xf] %vm616_vm2, %v4083_v4  ;;  %v3621_v15 = vshll.u32 %v3387_v43, 16  ;;  %v671_v18 = vsel %vm5826_vm10, 0, %v670_v10  ;;  %v3617_v9 = vrot.slane %v3615_v59, 4  ;;  %v2538_v63 = vshll.u32 %v2355_v56, 16 }
 0x1c9   : > { %v3810_v25 = vpop.permute.xlu1 %3809  ;;  %4180 = vst.msk [vmem:[#allocation3 + $0xec] sm:$0xf] %vm616_vm2, %v4086_v6  ;;  %v5241_v42 = vrot.slane %v7097_v23, 9  ;;  %v2356_v55 = vld [vmem:[#allocation2 + $0x5c] sm:$0x1]  ;;  %v2542_v61 = vshrl.u32 %v2355_v56, 16 }
 0x1ca   : > { %3897 = vst.msk [vmem:[#allocation3 + $0x64] sm:$0xf] %vm2303_vm7, %v3810_v25  ;;  %3267 = vrot.lane.b32.xlu2 %v3186_v46, %s5663_s12  ;;  %v953_v59 = vshrl.u32 %v609_v60, 16  ;;  %v956_v21 = vshll.u32 %v609_v60, 16  ;;  %v1981_v45 = vrot.slane %v7104_v3, 5  ;;  %v7128_v37 = vrot.slane %v2538_v63, 5 }
 0x1cb   : > { %672 = vst [vmem:[#allocation2 + $0xa8] sm:$0x1] %v671_v18  ;;  %v7126_v11 = vld [vmem:[#allocation2 + $0x80] sm:$0x1]  ;;  %v3389_v14 = vld [vmem:[#allocation2 + $0x88] sm:$0xf]  ;;  %v3618_v54 = vor.u32 %v3617_v9, %v7002_v24  ;;  %v1553_v24 = vsel %vm5830_vm13, %v7078_v13, %v7075_v53  ;;  %v2994_v9 = vsel %vm5804_vm8, %v5255_v49, %v2993_v5 }
 0x1cc   : > { %v7112_v28 = vpop.permute.xlu2 %2233  ;;  %1149 = vst [vmem:[#allocation2 + $0x9c] sm:$0xf] %v1148_v19  ;;  %v951_v41 = vrot.slane %v7087_v47, 4  ;;  %v5330_v30 = vld [vmem:[#allocation3 + $0x6c] sm:$0xf0]  ;;  %v7131_v26 = vrot.slane %v3621_v15, 5 }
 0x1cd   : > { %v2544_v7 = vrot.slane %v2542_v61, 4  ;;  %v2548_v31 = vshll.u32 %v2356_v55, 16  ;;  %v955_v57 = vrot.slane %v953_v59, 7  ;;  %v7137_v39 = vld [vmem:[%s8058_s4] ss:$0 sm:$0xff]  ;;  %v3635_v4 = vshll.u32 %v3389_v14, 16 }
 0x1ce   : > { %3269 = vrot.lane.b32.xlu0 %v3187_v35, %s5663_s12  ;;  %v1151_v2 = vld [vmem:[#allocation2 + $0xa4] sm:$0x1]  ;;  %v538_v58 = vadd.f32 %v7137_v39, %v537_v8  ;;  %v3639_v6 = vshrl.u32 %v3389_v14, 16  ;;  %v7152_v56 = vrot.slane %v2993_v5, 4  ;;  %v3619_v18 = vrot.slane %v3618_v54, 4 }
 0x1cf   : > { %2054 = vrot.lane.b32.xlu1 %v1975_v32, %s5663_s12  ;;  %v5396_v46 = vld [vmem:[#allocation3 + $0xe0] sm:$0xf]  ;;  %v2545_v47 = vor.u32 %v2544_v7, %v7128_v37  ;;  %v2550_v48 = vrot.slane %v2548_v31, 5  ;;  %v958_v43 = vor.u32 %v956_v21, %v955_v57  ;;  %v960_v35 = vrot.slane %v955_v57, 4  ;;  %v3390_v32 = vld [vmem:[#allocation2 + $0x8c] sm:$0x1]  ;;  %v539_v59 = vpop.f32.mrf.mxu0 }
 0x1d0   : > { %v3063_v50 = vpop.permute.xlu0 %3062  ;;  %v5591_v10 = vld [vmem:[#allocation3 + $0xe8] sm:$0xf0]  ;;  %v578_v33 = vmax.f32 %v538_v58, 0.0  ;;  %v7171_v55 = vrot.slane %v3639_v6, 4  ;;  %v726_v61 = vld [vmem:[#allocation2 + $0xb0] sm:$0x1]  ;;  %v540_v7 = vadd.f32 %v7137_v39, %v539_v59  ;;  %v1982_v54 = vsel %vm5804_vm8, %v5241_v42, %v1981_v45 }
 0x1d1   : > { %v3254_v1 = vpop.permute.xlu1 %3253  ;;  %v5574_v29 = vld [vmem:[#allocation3 + $0x64] sm:$0xf]  ;;  %3147 = vst.msk [vmem:[#allocation3 + $0x88] sm:$0xf] %vm1770_vm4, %v3063_v50  ;;  %v5397_v51 = vor.u32 %v5591_v10, %v5396_v46  ;;  %v2546_v15 = vrot.slane %v2545_v47, 4  ;;  %v959_v53 = vsel %vm5888_vm0, %v951_v41, %v958_v43  ;;  %v1152_v13 = vsel %vm5826_vm10, %v960_v35, %v1151_v2 }
 0x1d2   : > { %v5333_v25 = vor.u32 %v5574_v29, %v5330_v30  ;;  %3340 = vst.msk [vmem:[#allocation3 + $0x88] sm:$0xf] %vm2110_vm6, %v7065_v62  ;;  %1714 = vrot.lane.b32.xlu2 %v1543_v27, %s5664_s13  ;;  %v2996_v62 = vrot.slane %v7126_v11, 5  ;;  %v610_v19 = vpack.c.bf16 %v578_v33, %v578_v33  ;;  %v7169_v27 = vrot.slane %v3635_v4, 5  ;;  %v3951_v49 = vld [vmem:[#allocation2 + $0x90] sm:$0xe] }
 0x1d3   : > { %3339 = vst.msk [vmem:[#allocation3 + $0x7c] sm:$0xf] %vm2110_vm6, %v3254_v1  ;;  %5551 = vmatmul.msk.bf16.gmra.mxu3 %vm4641_vm3, %v5397_v51  ;;  %v2551_v63 = vsel %vm5830_vm13, %v2546_v15, %v2550_v48  ;;  %v1154_v5 = vld [vmem:[#allocation2 + $0xa8] sm:$0xf]  ;;  %v3952_v21 = vld [vmem:[#allocation2 + $0x94] sm:$0xf]  ;;  %v1978_v1 = vsel %vm5804_vm8, %v7094_v22, %v1977_v20  ;;  %v3624_v23 = vsel %vm5830_vm13, %v3619_v18, %v7131_v26 }
 0x1d4   : > { %4807 = vmatmul.bf16.gmra.mxu2 %v5333_v25  ;;  %v1703_v60 = vpop.permute.xlu2 %1702  ;;  %1150 = vst.msk [vmem:[#allocation2 + $0xa0] sm:$0xf] %vm616_vm2, %v959_v53  ;;  %v962_v34 = vshrl.u32 %v610_v19, 16  ;;  %v965_v36 = vshll.u32 %v610_v19, 16  ;;  %v3953_v14 = vld [vmem:[#allocation2 + $0x98] sm:$0x1]  ;;  %v3642_v35 = vor.u32 %v7171_v55, %v7169_v27 }
 0x1d5   : > { %1785 = vst.msk [vmem:[#allocation3 + $0xa8] sm:$0xf] %vm1770_vm4, %v1703_v60  ;;  %v727_v31 = vsel %vm5790_vm5, 0, %v726_v61  ;;  %v5272_v50 = vrot.slane %v3951_v49, 9  ;;  %v4089_v29 = vrot.slane %v3952_v21, 5  ;;  %v4092_v57 = vrot.slane %v3953_v14, 5 }
 0x1d6   : > { %1716 = vrot.lane.b32.xlu0 %v1553_v24, %s5664_s13  ;;  %1153 = vst [vmem:[#allocation2 + $0xa4] sm:$0x1] %v1152_v13  ;;  %v7176_v8 = vrot.slane %v962_v34, 7  ;;  %v1275_v2 = vld [vmem:[#allocation2 + $0x90] sm:$0xf]  ;;  %v3645_v4 = vshll.u32 %v3390_v32, 16 }
 0x1d7   : > { %3076 = vrot.lane.b32.xlu1 %v2994_v9, %s5664_s13  ;;  %2813 = vst.msk [vmem:[#allocation3 + $0xa0] sm:$0xf] %vm616_vm2, %v2551_v63  ;;  %v579_v38 = vmax.f32 %v540_v7, 0.0  ;;  %v7196_v25 = vld [vmem:[#allocation2 + $0x94] sm:$0xf]  ;;  %v4090_v22 = vsel %vm5804_vm8, %v5272_v50, %v4089_v29  ;;  %v4091_v20 = vrot.slane %v4089_v29, 4  ;;  %v542_v55 = vpop.f32.mrf.mxu0 }
 0x1d8   : > { %v3814_v41 = vpop.permute.xlu0 %3813  ;;  %v967_v58 = vor.u32 %v965_v36, %v7176_v8  ;;  %728 = vst [vmem:[#allocation2 + $0xb0] sm:$0x1] %v727_v31  ;;  %v1579_v46 = vshrl.u32 %v1275_v2, 16  ;;  %v1582_v47 = vshll.u32 %v1275_v2, 16  ;;  %v1588_v6 = vshll.u32 %v7196_v25, 16 }
 0x1d9   : > { %v2232_v30 = vpop.permute.xlu1 %2231  ;;  %3899 = vst.msk [vmem:[#allocation3 + $0x7c] sm:$0xf] %vm2303_vm7, %v3814_v41  ;;  %v611_v48 = vpack.c.bf16 %v579_v38, %v579_v38  ;;  %v1272_v24 = vld [vmem:[#allocation2 + $0x84] sm:$0xf]  ;;  %v4093_v10 = vsel %vm5804_vm8, %v4091_v20, %v4092_v57  ;;  %v7214_v51 = vld [vmem:[#allocation2 + $0x88] sm:$0xf]  ;;  %v543_v59 = vadd.f32 %v7137_v39, %v542_v55  ;;  %v4699_v38 = vpop.f32.mrf.mxu1 }
 0x1da   : > { %2316 = vst.msk [vmem:[#allocation3 + $0x90] sm:$0xf] %vm2303_vm7, %v2232_v30  ;;  %2056 = vrot.lane.b32.xlu2 %v1978_v1, %s5663_s12  ;;  %v1155_v42 = vsel %vm5878_vm14, %v967_v58, %v1154_v5  ;;  %v1581_v33 = vrot.slane %v1579_v46, 4  ;;  %v1584_v26 = vrot.slane %v1582_v47, 5  ;;  %v3647_v15 = vrot.slane %v3645_v4, 5 }
 0x1db   : > { %4181 = vst.msk [vmem:[#allocation3 + $0xf8] sm:$0xf] %vm616_vm2, %v4090_v22  ;;  %v970_v53 = vshrl.u32 %v611_v48, 16  ;;  %v973_v13 = vshll.u32 %v611_v48, 16  ;;  %v1555_v18 = vshrl.u32 %v1272_v24, 16  ;;  %v968_v19 = vrot.slane %v7176_v8, 4 }
 0x1dc   : > { %v7208_v43 = vpop.permute.xlu2 %2044  ;;  %1156 = vst [vmem:[#allocation2 + $0xa8] sm:$0xf] %v1155_v42  ;;  %v1585_v60 = vor.u32 %v1584_v26, %v1581_v33  ;;  %v1558_v9 = vshll.u32 %v1272_v24, 16  ;;  %v1564_v63 = vshll.u32 %v7214_v51, 16  ;;  %v1190_v32 = vld [vmem:[#allocation2 + $0x58] sm:$0xf]  ;;  %v2997_v8 = vsel %vm5804_vm8, %v7152_v56, %v2996_v62 }
 0x1dd   : > { %4182 = vst.msk [vmem:[#allocation3 + $0x104] sm:$0xf] %vm616_vm2, %v4093_v10  ;;  %v972_v36 = vrot.slane %v970_v53, 7  ;;  %v1557_v49 = vrot.slane %v1555_v18, 4  ;;  %v2354_v5 = vld [vmem:[#allocation2 + $0x54] sm:$0xf] }
 0x1de   : > { %2058 = vrot.lane.b32.xlu0 %v1982_v54, %s5663_s12  ;;  %1222 = vst.msk [vmem:[#allocation3 + $0xb4] sm:$0xf] %vm616_vm2, %v1190_v32  ;;  %v3643_v21 = vrot.slane %v3642_v35, 4  ;;  %v7226_v14 = vrot.slane %v1588_v6, 5  ;;  %v1560_v41 = vrot.slane %v1558_v9, 5  ;;  %v1568_v30 = vshrl.u32 %v7214_v51, 16 }
 0x1df   : > { %3827 = vrot.lane.b32.xlu1 %v3624_v23, %s5665_s16  ;;  %v975_v7 = vor.u32 %v973_v13, %v972_v36  ;;  %v977_v31 = vrot.slane %v972_v36, 4  ;;  %v1158_v50 = vld [vmem:[#allocation2 + $0xb0] sm:$0x1]  ;;  %v7236_v1 = vrot.slane %v1585_v60, 4  ;;  %v2529_v2 = vshrl.u32 %v2354_v5, 16 }
 0x1e0   : > { %v7221_v61 = vpop.permute.xlu0 %3257  ;;  %v1561_v57 = vor.u32 %v1560_v41, %v1557_v49  ;;  %v3188_v54 = vld [vmem:[#allocation2 + $0x88] sm:$0xf]  ;;  %v7245_v62 = vrot.slane %v1564_v63, 5  ;;  %v580_v58 = vmax.f32 %v543_v59, 0.0  ;;  %v673_v4 = vld [vmem:[#allocation2 + $0xb4] sm:$0x1] }
 0x1e1   : > { %v1701_v34 = vpop.permute.xlu1 %1700  ;;  %v976_v11 = vsel %vm5888_vm0, %v968_v19, %v975_v7  ;;  %v1159_v56 = vsel %vm5826_vm10, %v977_v31, %v1158_v50  ;;  %v2531_v47 = vrot.slane %v2529_v2, 4  ;;  %v674_v6 = vsel %vm5826_vm10, 0, %v673_v4  ;;  %v3388_v24 = vld [vmem:[#allocation2 + $0x84] sm:$0xf]  ;;  %v7255_v26 = vld [vmem:[#allocation2 + $0x94] sm:$0xf]  ;;  %v7292_v4 = vpop.f32.mrf.mxu1 }
 0x1e2   : > { %1784 = vst.msk [vmem:[#allocation3 + $0x9c] sm:$0xf] %vm1770_vm4, %v1701_v34  ;;  %3078 = vrot.lane.b32.xlu2 %v2997_v8, %s5664_s13  ;;  %v5408_v29 = vld [vmem:[#allocation3 + $0xf8] sm:$0xf]  ;;  %v1562_v46 = vrot.slane %v1561_v57, 4  ;;  %v612_v48 = vpack.c.bf16 %v580_v58, %v580_v58  ;;  %v3626_v10 = vshrl.u32 %v3388_v24, 16 }
 0x1e3   : > { %2124 = vst.msk [vmem:[#allocation3 + $0x9c] sm:$0xf] %vm2110_vm6, %v7085_v44  ;;  %v2532_v44 = vshll.u32 %v2354_v5, 16  ;;  %v3629_v33 = vshll.u32 %v3388_v24, 16  ;;  %v2162_v19 = vld [vmem:[#allocation2 + $0x7c] sm:$0xf]  ;;  %v1591_v5 = vsel %vm5830_vm13, %v7236_v1, %v7226_v14 }
 0x1e4   : > { %2317 = vst.msk [vmem:[#allocation3 + $0x9c] sm:$0xf] %vm2303_vm7, %v7112_v28  ;;  %v3067_v22 = vpop.permute.xlu2 %3066  ;;  %v3648_v28 = vsel %vm5830_vm13, %v3643_v21, %v3647_v15  ;;  %v5594_v20 = vld [vmem:[#allocation3 + $0x100] sm:$0xf0]  ;;  %v544_v15 = vpop.f32.mrf.mxu0  ;;  %v5352_v60 = vld [vmem:[#allocation3 + $0x90] sm:$0xf] }
 0x1e5   : > { %1157 = vst.msk [vmem:[#allocation2 + $0xac] sm:$0xf] %vm616_vm2, %v976_v11  ;;  %v5409_v23 = vor.u32 %v5594_v20, %v5408_v29  ;;  %v2534_v42 = vrot.slane %v2532_v44, 5  ;;  %v979_v63 = vshrl.u32 %v612_v48, 16  ;;  %v982_v32 = vshll.u32 %v612_v48, 16 }
 0x1e6   : > { %3149 = vst.msk [vmem:[#allocation3 + $0xa0] sm:$0xf] %vm1770_vm4, %v3067_v22  ;;  %3831 = vrot.lane.b32.xlu0 %v3648_v28, %s5665_s16  ;;  %v3628_v55 = vrot.slane %v3626_v10, 4  ;;  %v3631_v34 = vrot.slane %v3629_v33, 5  ;;  %v7261_v36 = vld [vmem:[#allocation2 + $0x98] sm:$0x1]  ;;  %v545_v41 = vadd.f32 %v7137_v39, %v544_v15 }
 0x1e7   : > { %3271 = vrot.lane.b32.xlu1 %v3188_v54, %s5663_s12  ;;  %v4788_v35 = vpop.f32.mrf.mxu2  ;;  %1160 = vst [vmem:[#allocation2 + $0xb0] sm:$0x1] %v1159_v56  ;;  %5552 = vmatmul.msk.bf16.gmra.mxu3 %vm4641_vm3, %v5409_v23  ;;  %v2535_v9 = vor.u32 %v2534_v42, %v2531_v47  ;;  %v1988_v21 = vrot.slane %v7255_v26, 5  ;;  %v7271_v7 = vrot.slane %v979_v63, 7  ;;  %v729_v50 = vld [vmem:[#allocation2 + $0xbc] sm:$0x1]  ;;  %v1567_v54 = vsel %vm5830_vm13, %v1562_v46, %v7245_v62 }
 0x1e8   : > { %v7257_v53 = vadd.f32 %v4788_v35, %v4699_v38  ;;  %v2236_v13 = vpop.permute.xlu0 %2235  ;;  %675 = vst [vmem:[#allocation2 + $0xb4] sm:$0x1] %v674_v6  ;;  %v3632_v31 = vor.u32 %v3631_v34, %v3628_v55  ;;  %v1570_v29 = vrot.slane %v1568_v30, 4  ;;  %v1838_v1 = vld [vmem:[#allocation2 + $0x8c] sm:$0x1]  ;;  %v1983_v2 = vrot.slane %v1981_v45, 4 }
 0x1e9   : > { %v2043_v18 = vpop.permute.xlu1 %2042  ;;  %v2536_v59 = vrot.slane %v2535_v9, 4  ;;  %v1991_v51 = vrot.slane %v7261_v36, 5  ;;  %v581_v30 = vmax.f32 %v545_v41, 0.0  ;;  %v1274_v11 = vld [vmem:[#allocation2 + $0x8c] sm:$0x1]  ;;  %v730_v45 = vsel %vm5790_vm5, 0, %v729_v50 }
 0x1ea   : > { %2125 = vst.msk [vmem:[#allocation3 + $0xa8] sm:$0xf] %vm2110_vm6, %v2043_v18  ;;  %2245 = vrot.lane.b32.xlu2 %v2162_v19, %s5665_s16  ;;  %v3633_v3 = vrot.slane %v3632_v31, 4  ;;  %v3954_v56 = vld [vmem:[#allocation2 + $0x9c] sm:$0xe]  ;;  %v984_v22 = vor.u32 %v982_v32, %v7271_v7  ;;  %v985_v28 = vrot.slane %v7271_v7, 4 }
 0x1eb   : > { %2318 = vst.msk [vmem:[#allocation3 + $0xa8] sm:$0xf] %vm2303_vm7, %v2236_v13  ;;  %v5581_v49 = vld [vmem:[#allocation3 + $0x98] sm:$0xf0]  ;;  %v2541_v57 = vsel %vm5830_vm13, %v2536_v59, %v7128_v37  ;;  %v1571_v37 = vor.u32 %v1570_v29, %v7245_v62  ;;  %v3955_v58 = vld [vmem:[#allocation2 + $0xa0] sm:$0xf]  ;;  %v613_v47 = vpack.c.bf16 %v581_v30, %v581_v30 }
 0x1ec   : > { %v5353_v8 = vor.u32 %v5581_v49, %v5352_v60  ;;  %v7280_v44 = vld [vmem:[#allocation2 + $0xac] sm:$0xf]  ;;  %v3818_v39 = vpop.permute.xlu2 %3817  ;;  %2812 = vst.msk [vmem:[#allocation3 + $0x94] sm:$0xf] %vm616_vm2, %v2541_v57  ;;  %v1990_v46 = vrot.slane %v1988_v21, 4  ;;  %v1574_v48 = vshll.u32 %v1274_v11, 16  ;;  %v3638_v19 = vsel %vm5830_vm13, %v3633_v3, %v7169_v27 }
 0x1ed   : > { %731 = vst [vmem:[#allocation2 + $0xbc] sm:$0x1] %v730_v45  ;;  %v7300_v23 = vld [vmem:[#allocation2 + $0xa8] sm:$0xe]  ;;  %v3956_v6 = vld [vmem:[#allocation2 + $0xa4] sm:$0x1] }
 0x1ee   : > { %4728 = vmatmul.bf16.gmra.mxu1 %v5353_v8  ;;  %1722 = vrot.lane.b32.xlu0 %v1591_v5, %s5664_s13  ;;  %v5273_v24 = vrot.slane %v3954_v56, 9  ;;  %v7302_v35 = vld [vmem:[#allocation2 + $0x84] sm:$0xe]  ;;  %v1984_v10 = vrot.slane %v1838_v1, 5  ;;  %v987_v33 = vshrl.u32 %v613_v47, 16  ;;  %v990_v15 = vshll.u32 %v613_v47, 16  ;;  %v4704_v1 = vpop.f32.mrf.mxu1 }
 0x1ef   : > { %1718 = vrot.lane.b32.xlu1 %v1567_v54, %s5664_s13  ;;  %v7294_v38 = vpop.f32.mrf.mxu2  ;;  %v1161_v20 = vld [vmem:[#allocation2 + $0xb4] sm:$0xf]  ;;  %v4096_v13 = vrot.slane %v3955_v58, 5  ;;  %v4103_v18 = vrot.slane %v7280_v44, 5  ;;  %v1572_v60 = vrot.slane %v1571_v37, 4  ;;  %v4099_v9 = vrot.slane %v3956_v6, 5 }
 0x1f0   : > { %v1705_v42 = vpop.permute.xlu0 %1704  ;;  %v1162_v63 = vsel %vm5878_vm14, %v984_v22, %v1161_v20  ;;  %v989_v32 = vrot.slane %v987_v33, 7  ;;  %v7315_v34 = vld [vmem:[#allocation2 + $0x88] sm:$0xf]  ;;  %v1576_v27 = vrot.slane %v1574_v48, 5  ;;  %v5256_v49 = vrot.slane %v7302_v35, 9 }
 0x1f1   : > { %v3065_v62 = vpop.permute.xlu1 %3064  ;;  %1786 = vst.msk [vmem:[#allocation3 + $0xb4] sm:$0xf] %vm1770_vm4, %v1705_v42  ;;  %v4098_v55 = vrot.slane %v4096_v13, 4  ;;  %v4097_v36 = vsel %vm5804_vm8, %v5273_v24, %v4096_v13  ;;  %v2357_v5 = vld [vmem:[#allocation2 + $0x60] sm:$0xf]  ;;  %v1985_v41 = vsel %vm5804_vm8, %v1983_v2, %v1984_v10  ;;  %v5274_v31 = vrot.slane %v7300_v23, 9 }
 0x1f2   : > { %2126 = vst.msk [vmem:[#allocation3 + $0xb4] sm:$0xf] %vm2110_vm6, %v7208_v43  ;;  %3829 = vrot.lane.b32.xlu2 %v3638_v19, %s5665_s16  ;;  %v1992_v43 = vsel %vm5804_vm8, %v1990_v46, %v1991_v51  ;;  %v992_v8 = vor.u32 %v990_v15, %v989_v32  ;;  %v994_v7 = vrot.slane %v989_v32, 4  ;;  %v2553_v29 = vshrl.u32 %v2357_v5, 16  ;;  %v1839_v30 = vld [vmem:[#allocation2 + $0x90] sm:$0xe] }
 0x1f3   : > { %3148 = vst.msk [vmem:[#allocation3 + $0x94] sm:$0xf] %vm1770_vm4, %v3065_v62  ;;  %v2556_v57 = vshll.u32 %v2357_v5, 16  ;;  %v4100_v54 = vsel %vm5804_vm8, %v4098_v55, %v4099_v9  ;;  %v3000_v51 = vrot.slane %v7315_v34, 5  ;;  %v1592_v22 = vshrl.u32 %v7196_v25, 16 }
 0x1f4   : > { %3341 = vst.msk [vmem:[#allocation3 + $0x94] sm:$0xf] %vm2110_vm6, %v7221_v61  ;;  %v7325_v59 = vpop.permute.xlu2 %3261  ;;  %v7329_v61 = vld [vmem:[#allocation2 + $0x64] sm:$0xf]  ;;  %v1165_v50 = vld [vmem:[#allocation2 + $0xbc] sm:$0x1]  ;;  %v1577_v20 = vsel %vm5830_vm13, %v1572_v60, %v1576_v27  ;;  %v4104_v48 = vsel %vm5804_vm8, %v5274_v31, %v4103_v18 }
 0x1f5   : > { %3901 = vst.msk [vmem:[#allocation3 + $0x94] sm:$0xf] %vm2303_vm7, %v3818_v39  ;;  %v993_v39 = vsel %vm5888_vm0, %v985_v28, %v992_v8  ;;  %v1166_v2 = vsel %vm5826_vm10, %v994_v7, %v1165_v50  ;;  %v2555_v37 = vrot.slane %v2553_v29, 4  ;;  %v2558_v56 = vrot.slane %v2556_v57, 5  ;;  %v1192_v23 = vld [vmem:[#allocation2 + $0x64] sm:$0xf] }
 0x1f6   : > { %1163 = vst [vmem:[#allocation2 + $0xb4] sm:$0xf] %v1162_v63  ;;  %2064 = vrot.lane.b32.xlu0 %v1992_v43, %s5663_s12  ;;  %v2562_v58 = vshll.u32 %v7329_v61, 16  ;;  %v4105_v28 = vrot.slane %v4103_v18, 4  ;;  %v5242_v47 = vrot.slane %v1839_v30, 9  ;;  %v3001_v25 = vsel %vm5804_vm8, %v5256_v49, %v3000_v51 }
 0x1f7   : > { %2060 = vrot.lane.b32.xlu1 %v1985_v41, %s5663_s12  ;;  %v4793_v44 = vpop.f32.mrf.mxu2  ;;  %4183 = vst.msk [vmem:[#allocation3 + $0x110] sm:$0xf] %vm616_vm2, %v4097_v36  ;;  %v2559_v46 = vor.u32 %v2558_v56, %v2555_v37  ;;  %v2864_v42 = vld [vmem:[#allocation2 + $0x8c] sm:$0x1]  ;;  %v1278_v62 = vld [vmem:[#allocation2 + $0x9c] sm:$0xf] }
 0x1f8   : > { %v7342_v11 = vadd.f32 %v4793_v44, %v4704_v1  ;;  %v7344_v3 = vpop.permute.xlu0 %2046  ;;  %1164 = vst.msk [vmem:[#allocation2 + $0xb8] sm:$0xf] %vm616_vm2, %v993_v39  ;;  %v7358_v24 = vrot.slane %v2562_v58, 5  ;;  %v1279_v35 = vld [vmem:[#allocation2 + $0xa0] sm:$0xf]  ;;  %v1603_v15 = vshrl.u32 %v1278_v62, 16  ;;  %v1989_v44 = vsel %vm5804_vm8, %v5242_v47, %v1988_v21 }
 0x1f9   : > { %v3816_v45 = vpop.permute.xlu1 %3815  ;;  %1167 = vst [vmem:[#allocation2 + $0xbc] sm:$0x1] %v1166_v2  ;;  %v2560_v6 = vrot.slane %v2559_v46, 4  ;;  %v2161_v33 = vld [vmem:[#allocation2 + $0x78] sm:$0xf]  ;;  %v1606_v13 = vshll.u32 %v1278_v62, 16  ;;  %v7393_v46 = vpop.f32.mrf.mxu3 }
 0x1fa   : > { %3900 = vst.msk [vmem:[#allocation3 + $0x88] sm:$0xf] %vm2303_vm7, %v3816_v45  ;;  %1720 = vrot.lane.b32.xlu2 %v1577_v20, %s5664_s13  ;;  %v1612_v19 = vshll.u32 %v1279_v35, 16  ;;  %v1616_v60 = vshrl.u32 %v1279_v35, 16  ;;  %v5577_v9 = vld [vmem:[#allocation3 + $0x7c] sm:$0xf] }
 0x1fb   : > { %4184 = vst.msk [vmem:[#allocation3 + $0x11c] sm:$0xf] %vm616_vm2, %v4100_v54  ;;  %v2565_v18 = vsel %vm5830_vm13, %v2560_v6, %v7358_v24  ;;  %v3959_v63 = vld [vmem:[#allocation2 + $0xb0] sm:$0x1]  ;;  %v3002_v32 = vrot.slane %v3000_v51, 4  ;;  %v3003_v55 = vrot.slane %v2864_v42, 5 }
 0x1fc   : > { %1224 = vst.msk [vmem:[#allocation3 + $0xcc] sm:$0xf] %vm616_vm2, %v1192_v23  ;;  %v7361_v10 = vpop.permute.xlu2 %2239  ;;  %v1605_v34 = vrot.slane %v1603_v15, 4  ;;  %v1608_v43 = vrot.slane %v1606_v13, 5  ;;  %v1614_v41 = vrot.slane %v1612_v19, 5  ;;  %v4106_v8 = vrot.slane %v3959_v63, 5 }
 0x1fd   : > { %4185 = vst.msk [vmem:[#allocation3 + $0x128] sm:$0xf] %vm616_vm2, %v4104_v48  ;;  %v1280_v31 = vld [vmem:[#allocation2 + $0xa4] sm:$0x1]  ;;  %v1618_v50 = vrot.slane %v1616_v60, 4  ;;  %v1594_v29 = vrot.slane %v1592_v22, 4  ;;  %v3004_v58 = vsel %vm5804_vm8, %v3002_v32, %v3003_v55 }
 0x1fe   : > { %3080 = vrot.lane.b32.xlu0 %v3001_v25, %s5664_s13  ;;  %2814 = vst.msk [vmem:[#allocation3 + $0xac] sm:$0xf] %vm616_vm2, %v2565_v18  ;;  %v5420_v27 = vld [vmem:[#allocation3 + $0x110] sm:$0xf]  ;;  %v3960_v57 = vld [vmem:[#allocation2 + $0xb4] sm:$0xe]  ;;  %v1609_v39 = vor.u32 %v1608_v43, %v1605_v34  ;;  %v4107_v2 = vsel %vm5804_vm8, %v4105_v28, %v4106_v8 }
 0x1ff   : > { %2243 = vrot.lane.b32.xlu1 %v2161_v33, %s5665_s16  ;;  %v1622_v51 = vshll.u32 %v1280_v31, 16  ;;  %v1277_v30 = vld [vmem:[#allocation2 + $0x98] sm:$0x1]  ;;  %4186 = vst.msk [vmem:[#allocation3 + $0x134] sm:$0xf] %vm616_vm2, %v4107_v2  ;;  %v1595_v26 = vor.u32 %v1594_v29, %v7226_v14  ;;  %v2566_v28 = vshrl.u32 %v7329_v61, 16 }
 0x200   : > { %v3069_v36 = vpop.permute.xlu0 %3068  ;;  %v3961_v45 = vld [vmem:[#allocation2 + $0xb8] sm:$0xf]  ;;  %v1191_v37 = vld [vmem:[#allocation2 + $0x60] sm:$0xf]  ;;  %v3190_v56 = vld [vmem:[#allocation2 + $0x94] sm:$0xf] }
 0x201   : > { %v3260_v49 = vpop.permute.xlu1 %3259  ;;  %v5342_v5 = vld [vmem:[#allocation3 + $0x84] sm:$0xf0]  ;;  %3150 = vst.msk [vmem:[#allocation3 + $0xac] sm:$0xf] %vm1770_vm4, %v3069_v36  ;;  %v1598_v22 = vshll.u32 %v1277_v30, 16  ;;  %v1610_v14 = vrot.slane %v1609_v39, 4 }
 0x202   : > { %v5345_v7 = vor.u32 %v5577_v9, %v5342_v5  ;;  %v5597_v1 = vld [vmem:[#allocation3 + $0x118] sm:$0xf0]  ;;  %3343 = vst.msk [vmem:[#allocation3 + $0xac] sm:$0xf] %vm2110_vm6, %v7325_v59  ;;  %2062 = vrot.lane.b32.xlu2 %v1989_v44, %s5663_s12  ;;  %v1619_v59 = vor.u32 %v1618_v50, %v1614_v41  ;;  %v7391_v20 = vld [vmem:[#allocation2 + $0xa0] sm:$0xf] }
 0x203   : > { %v5421_v54 = vor.u32 %v5597_v1, %v5420_v27  ;;  %3342 = vst.msk [vmem:[#allocation3 + $0xa0] sm:$0xf] %vm2110_vm6, %v3260_v49  ;;  %v4110_v47 = vrot.slane %v3961_v45, 5  ;;  %v1624_v23 = vrot.slane %v1622_v51, 5  ;;  %v1995_v42 = vrot.slane %v7391_v20, 5 }
 0x204   : > { %4812 = vmatmul.bf16.gmra.mxu2 %v5345_v7  ;;  %v1709_v21 = vpop.permute.xlu2 %1708  ;;  %1223 = vst.msk [vmem:[#allocation3 + $0xc0] sm:$0xf] %vm616_vm2, %v1191_v37  ;;  %v5275_v62 = vrot.slane %v3960_v57, 9  ;;  %v1620_v6 = vrot.slane %v1619_v59, 4  ;;  %v1596_v61 = vrot.slane %v1595_v26, 4  ;;  %v1600_v15 = vrot.slane %v1598_v22, 5 }
 0x205   : > { %5553 = vmatmul.msk.bf16.gmra.mxu3 %vm4641_vm3, %v5421_v54  ;;  %1788 = vst.msk [vmem:[#allocation3 + $0xcc] sm:$0xf] %vm1770_vm4, %v1709_v21  ;;  %v1844_v35 = vld [vmem:[#allocation2 + $0xa4] sm:$0x1]  ;;  %v2360_v33 = vld [vmem:[#allocation2 + $0x6c] sm:$0xf]  ;;  %v1615_v60 = vsel %vm5830_vm13, %v1610_v14, %v1614_v41 }
 0x206   : > { %3275 = vrot.lane.b32.xlu0 %v3190_v56, %s5663_s12  ;;  %v7397_v13 = vld [vmem:[#allocation2 + $0x70] sm:$0xf]  ;;  %v2577_v19 = vshrl.u32 %v2360_v33, 16  ;;  %v2580_v18 = vshll.u32 %v2360_v33, 16  ;;  %v2568_v63 = vrot.slane %v2566_v28, 4  ;;  %v1997_v55 = vrot.slane %v1995_v42, 4 }
 0x207   : > { %3082 = vrot.lane.b32.xlu1 %v3004_v58, %s5664_s13  ;;  %v2586_v9 = vshll.u32 %v7397_v13, 16  ;;  %v5432_v32 = vld [vmem:[#allocation3 + $0x128] sm:$0xf]  ;;  %v1998_v34 = vrot.slane %v1844_v35, 5  ;;  %v4111_v27 = vsel %vm5804_vm8, %v5275_v62, %v4110_v47  ;;  %v4112_v36 = vrot.slane %v4110_v47, 4 }
 0x208   : > { %v3820_v48 = vpop.permute.xlu0 %3819  ;;  %v2579_v43 = vrot.slane %v2577_v19, 4  ;;  %v5600_v49 = vld [vmem:[#allocation3 + $0x130] sm:$0xf0]  ;;  %v2582_v5 = vrot.slane %v2580_v18, 5  ;;  %v1845_v8 = vld [vmem:[#allocation2 + $0xa8] sm:$0xe]  ;;  %v1625_v7 = vsel %vm5830_vm13, %v1620_v6, %v1624_v23  ;;  %v1601_v31 = vsel %vm5830_vm13, %v1596_v61, %v1600_v15 }
 0x209   : > { %v2238_v25 = vpop.permute.xlu1 %2237  ;;  %3902 = vst.msk [vmem:[#allocation3 + $0xa0] sm:$0xf] %vm2303_vm7, %v3820_v48  ;;  %v7414_v50 = vrot.slane %v2586_v9, 5  ;;  %v2590_v29 = vshrl.u32 %v7397_v13, 16  ;;  %v7417_v57 = vld [vmem:[#allocation2 + $0xac] sm:$0xf]  ;;  %v2569_v54 = vor.u32 %v2568_v63, %v7358_v24  ;;  %v5433_v51 = vor.u32 %v5600_v49, %v5432_v32  ;;  %v7430_v24 = vpop.f32.mrf.mxu3 }
 0x20a   : > { %2319 = vst.msk [vmem:[#allocation3 + $0xb4] sm:$0xf] %vm2303_vm7, %v2238_v25  ;;  %1726 = vrot.lane.b32.xlu2 %v1615_v60, %s5664_s13  ;;  %v5580_v1 = vld [vmem:[#allocation3 + $0x94] sm:$0xf]  ;;  %v2583_v44 = vor.u32 %v2582_v5, %v2579_v43  ;;  %v1842_v39 = vld [vmem:[#allocation2 + $0x9c] sm:$0xe]  ;;  %v1999_v30 = vsel %vm5804_vm8, %v1997_v55, %v1998_v34 }
 0x20b   : > { %v3962_v2 = vld [vmem:[#allocation2 + $0xbc] sm:$0x1]  ;;  %4187 = vst.msk [vmem:[#allocation3 + $0x140] sm:$0xf] %vm616_vm2, %v4111_v27  ;;  %v5364_v45 = vld [vmem:[#allocation3 + $0xa8] sm:$0xf] }
 0x20c   : > { %v7408_v41 = vpop.permute.xlu2 %2050  ;;  %v5244_v59 = vrot.slane %v1845_v8, 9  ;;  %v4113_v26 = vrot.slane %v3962_v2, 5  ;;  %v1284_v37 = vld [vmem:[#allocation2 + $0xb4] sm:$0xf]  ;;  %v7425_v21 = vld [vmem:[#allocation2 + $0xb8] sm:$0xf] }
 0x20d   : > { %v2584_v28 = vrot.slane %v2583_v44, 4  ;;  %v2002_v14 = vrot.slane %v7417_v57, 5  ;;  %v1651_v47 = vshrl.u32 %v1284_v37, 16  ;;  %v1654_v23 = vshll.u32 %v1284_v37, 16  ;;  %v1281_v19 = vld [vmem:[#allocation2 + $0xa8] sm:$0xf] }
 0x20e   : > { %1728 = vrot.lane.b32.xlu0 %v1625_v7, %s5664_s13  ;;  %v5243_v25 = vrot.slane %v1842_v39, 9  ;;  %v4114_v6 = vsel %vm5804_vm8, %v4112_v36, %v4113_v26  ;;  %v1660_v61 = vshll.u32 %v7425_v21, 16  ;;  %v1282_v60 = vld [vmem:[#allocation2 + $0xac] sm:$0xf]  ;;  %v2570_v18 = vrot.slane %v2569_v54, 4 }
 0x20f   : > { %1724 = vrot.lane.b32.xlu1 %v1601_v31, %s5664_s13  ;;  %v2589_v33 = vsel %vm5830_vm13, %v2584_v28, %v7414_v50  ;;  %v1653_v15 = vrot.slane %v1651_v47, 4  ;;  %v1656_v13 = vrot.slane %v1654_v23, 5  ;;  %v1627_v63 = vshrl.u32 %v1281_v19, 16  ;;  %4188 = vst.msk [vmem:[#allocation3 + $0x14c] sm:$0xf] %vm616_vm2, %v4114_v6 }
 0x210   : > { %v7427_v56 = vpop.permute.xlu0 %3263  ;;  %v5354_v22 = vld [vmem:[#allocation3 + $0x9c] sm:$0xf0]  ;;  %2816 = vst.msk [vmem:[#allocation3 + $0xc4] sm:$0xf] %vm616_vm2, %v2589_v33  ;;  %v1630_v32 = vshll.u32 %v1281_v19, 16  ;;  %v7455_v34 = vrot.slane %v1660_v61, 5 }
 0x211   : > { %v1707_v58 = vpop.permute.xlu1 %1706  ;;  %v5584_v62 = vld [vmem:[#allocation3 + $0xb0] sm:$0xf0]  ;;  %v5357_v48 = vor.u32 %v5580_v1, %v5354_v22  ;;  %v1657_v9 = vor.u32 %v1656_v13, %v1653_v15  ;;  %v1636_v43 = vshll.u32 %v1282_v60, 16  ;;  %v1640_v27 = vshrl.u32 %v1282_v60, 16  ;;  %v2359_v7 = vld [vmem:[#allocation2 + $0x68] sm:$0x1]  ;;  %v7468_v22 = vpop.f32.mrf.mxu3 }
 0x212   : > { %1787 = vst.msk [vmem:[#allocation3 + $0xc0] sm:$0xf] %vm1770_vm4, %v1707_v58  ;;  %v5365_v35 = vor.u32 %v5584_v62, %v5364_v45  ;;  %2068 = vrot.lane.b32.xlu2 %v1999_v30, %s5663_s12  ;;  %v1629_v49 = vrot.slane %v1627_v63, 4  ;;  %v1632_v5 = vrot.slane %v1630_v32, 5  ;;  %v2592_v8 = vrot.slane %v2590_v29, 4 }
 0x213   : > { %2127 = vst.msk [vmem:[#allocation3 + $0xc0] sm:$0xf] %vm2110_vm6, %v7344_v3  ;;  %v2003_v3 = vsel %vm5804_vm8, %v5244_v59, %v2002_v14  ;;  %v1658_v36 = vrot.slane %v1657_v9, 4  ;;  %v1193_v20 = vld [vmem:[#allocation2 + $0x6c] sm:$0xf]  ;;  %v2572_v2 = vshll.u32 %v2359_v7, 16 }
 0x214   : > { %2320 = vst.msk [vmem:[#allocation3 + $0xc0] sm:$0xf] %vm2303_vm7, %v7361_v10  ;;  %4817 = vmatmul.bf16.gmra.mxu2 %v5357_v48  ;;  %4733 = vmatmul.bf16.gmra.mxu1 %v5365_v35  ;;  %v3073_v55 = vpop.permute.xlu2 %3072  ;;  %v1996_v10 = vsel %vm5804_vm8, %v5243_v25, %v1995_v42  ;;  %v3392_v31 = vld [vmem:[#allocation2 + $0x94] sm:$0xf]  ;;  %v3189_v44 = vld [vmem:[#allocation2 + $0x90] sm:$0xf]  ;;  %v1633_v39 = vor.u32 %v1632_v5, %v1629_v49  ;;  %v7476_v48 = vpop.f32.mrf.mxu1 }
 0x215   : > { %5554 = vmatmul.msk.bf16.gmra.mxu3 %vm4641_vm3, %v5433_v51  ;;  %3152 = vst.msk [vmem:[#allocation3 + $0xc4] sm:$0xf] %vm1770_vm4, %v3073_v55  ;;  %v3393_v54 = vld [vmem:[#allocation2 + $0x98] sm:$0x1]  ;;  %v3659_v51 = vshll.u32 %v3392_v31, 16  ;;  %v3663_v30 = vshrl.u32 %v3392_v31, 16  ;;  %v1663_v28 = vsel %vm5830_vm13, %v1658_v36, %v7455_v34  ;;  %v2593_v57 = vor.u32 %v2592_v8, %v7414_v50 }
 0x216   : > { %2070 = vrot.lane.b32.xlu0 %v2003_v3, %s5663_s12  ;;  %1225 = vst.msk [vmem:[#allocation3 + $0xd8] sm:$0xf] %vm616_vm2, %v1193_v20  ;;  %v3669_v45 = vshll.u32 %v3393_v54, 16  ;;  %v7462_v59 = vld [vmem:[#allocation2 + $0xb8] sm:$0xf]  ;;  %v1634_v29 = vrot.slane %v1633_v39, 4 }
 0x217   : > { %2066 = vrot.lane.b32.xlu1 %v1996_v10, %s5663_s12  ;;  %v2574_v26 = vrot.slane %v2572_v2, 5  ;;  %v7465_v37 = vrot.slane %v3659_v51, 5  ;;  %v2009_v58 = vrot.slane %v7462_v59, 5  ;;  %v1638_v47 = vrot.slane %v1636_v43, 5  ;;  %v5444_v25 = vld [vmem:[#allocation3 + $0x140] sm:$0xf] }
 0x218   : > { %v2242_v42 = vpop.permute.xlu0 %2241  ;;  %v3665_v23 = vrot.slane %v3663_v30, 4  ;;  %v2004_v62 = vrot.slane %v2002_v14, 4  ;;  %v1850_v61 = vld [vmem:[#allocation2 + $0xbc] sm:$0x1]  ;;  %v1847_v35 = vld [vmem:[#allocation2 + $0xb0] sm:$0x1]  ;;  %v7485_v14 = vpop.f32.mrf.mxu2 }
 0x219   : > { %v2049_v1 = vpop.permute.xlu1 %2048  ;;  %v2575_v6 = vsel %vm5830_vm13, %v2570_v18, %v2574_v26  ;;  %v1639_v15 = vsel %vm5830_vm13, %v1634_v29, %v1638_v47  ;;  %v1283_v19 = vld [vmem:[#allocation2 + $0xb0] sm:$0x1]  ;;  %v1642_v60 = vrot.slane %v1640_v27, 4  ;;  %v5603_v3 = vld [vmem:[#allocation3 + $0x148] sm:$0xf0]  ;;  %v3671_v18 = vrot.slane %v3669_v45, 5  ;;  %v7501_v29 = vpop.f32.mrf.mxu3 }
 0x21a   : > { %2128 = vst.msk [vmem:[#allocation3 + $0xcc] sm:$0xf] %vm2110_vm6, %v2049_v1  ;;  %3273 = vrot.lane.b32.xlu2 %v3189_v44, %s5663_s12  ;;  %v3666_v13 = vor.u32 %v3665_v23, %v7465_v37  ;;  %v2011_v9 = vrot.slane %v2009_v58, 4  ;;  %v1195_v63 = vld [vmem:[#allocation2 + $0x78] sm:$0xf]  ;;  %v2012_v10 = vrot.slane %v1850_v61, 5  ;;  %v5445_v7 = vor.u32 %v5603_v3, %v5444_v25 }
 0x21b   : > { %2321 = vst.msk [vmem:[#allocation3 + $0xcc] sm:$0xf] %vm2303_vm7, %v2242_v42  ;;  %v5376_v55 = vld [vmem:[#allocation3 + $0xc0] sm:$0xf]  ;;  %v3391_v43 = vld [vmem:[#allocation2 + $0x90] sm:$0xf]  ;;  %v1643_v42 = vor.u32 %v1642_v60, %v1638_v47 }
 0x21c   : > { %v3824_v33 = vpop.permute.xlu2 %3823  ;;  %2815 = vst.msk [vmem:[#allocation3 + $0xb8] sm:$0xf] %vm616_vm2, %v2575_v6  ;;  %v3667_v32 = vrot.slane %v3666_v13, 4  ;;  %v2005_v36 = vrot.slane %v1847_v35, 5  ;;  %v1646_v49 = vshll.u32 %v1283_v19, 16  ;;  %v3650_v5 = vshrl.u32 %v3391_v43, 16  ;;  %v4709_v23 = vpop.f32.mrf.mxu1 }
 0x21d   : > { %1227 = vst.msk [vmem:[#allocation3 + $0xf0] sm:$0xf] %vm616_vm2, %v1195_v63  ;;  %v3653_v8 = vshll.u32 %v3391_v43, 16  ;;  %v2362_v20 = vld [vmem:[#allocation2 + $0x74] sm:$0x1]  ;;  %v2594_v1 = vrot.slane %v2593_v57, 4  ;;  %v2013_v26 = vsel %vm5804_vm8, %v2011_v9, %v2012_v10 }
 0x21e   : > { %1734 = vrot.lane.b32.xlu0 %v1663_v28, %s5664_s13  ;;  %v2596_v44 = vshll.u32 %v2362_v20, 16  ;;  %v3672_v39 = vsel %vm5830_vm13, %v3667_v32, %v3671_v18  ;;  %v3652_v54 = vrot.slane %v3650_v5, 4  ;;  %v2006_v28 = vsel %vm5804_vm8, %v2004_v62, %v2005_v36  ;;  %v1194_v61 = vld [vmem:[#allocation2 + $0x70] sm:$0xf]  ;;  %v2364_v62 = vld [vmem:[#allocation2 + $0x7c] sm:$0xf] }
 0x21f   : > { %1730 = vrot.lane.b32.xlu1 %v1639_v15, %s5664_s13  ;;  %v3655_v51 = vrot.slane %v3653_v8, 5  ;;  %v1644_v25 = vrot.slane %v1643_v42, 4  ;;  %v1648_v6 = vrot.slane %v1646_v49, 5  ;;  %v1664_v35 = vshrl.u32 %v7425_v21, 16  ;;  %1226 = vst.msk [vmem:[#allocation3 + $0xe4] sm:$0xf] %vm616_vm2, %v1194_v61 }
 0x220   : > { %v1711_v27 = vpop.permute.xlu0 %1710  ;;  %v2598_v30 = vrot.slane %v2596_v44, 5  ;;  %v7520_v60 = vld [vmem:[#allocation2 + $0x94] sm:$0xf]  ;;  %v2365_v57 = vld [vmem:[#allocation2 + $0x80] sm:$0x1]  ;;  %v2610_v3 = vshll.u32 %v2364_v62, 16 }
 0x221   : > { %v3071_v50 = vpop.permute.xlu1 %3070  ;;  %1789 = vst.msk [vmem:[#allocation3 + $0xd8] sm:$0xf] %vm1770_vm4, %v1711_v27  ;;  %v3656_v45 = vor.u32 %v3655_v51, %v3652_v54  ;;  %v2614_v18 = vshrl.u32 %v2364_v62, 16  ;;  %v2620_v9 = vshll.u32 %v2365_v57, 16  ;;  %v1649_v21 = vsel %vm5830_vm13, %v1644_v25, %v1648_v6  ;;  %v3394_v32 = vld [vmem:[#allocation2 + $0x9c] sm:$0xf] }
 0x222   : > { %v5587_v31 = vld [vmem:[#allocation3 + $0xc8] sm:$0xf0]  ;;  %2129 = vst.msk [vmem:[#allocation3 + $0xd8] sm:$0xf] %vm2110_vm6, %v7408_v41  ;;  %3835 = vrot.lane.b32.xlu2 %v3672_v39, %s5665_s16  ;;  %v2599_v47 = vsel %vm5830_vm13, %v2594_v1, %v2598_v30  ;;  %v7525_v63 = vrot.slane %v2610_v3, 5  ;;  %v3007_v43 = vrot.slane %v7520_v60, 5 }
 0x223   : > { %v5377_v2 = vor.u32 %v5587_v31, %v5376_v55  ;;  %3151 = vst.msk [vmem:[#allocation3 + $0xb8] sm:$0xf] %vm1770_vm4, %v3071_v50  ;;  %v3657_v19 = vrot.slane %v3656_v45, 4  ;;  %v1848_v55 = vld [vmem:[#allocation2 + $0xb4] sm:$0xe]  ;;  %v2616_v27 = vrot.slane %v2614_v18, 4 }
 0x224   : > { %3344 = vst.msk [vmem:[#allocation3 + $0xb8] sm:$0xf] %vm2110_vm6, %v7427_v56  ;;  %v3268_v41 = vpop.permute.xlu2 %3267  ;;  %v2867_v10 = vld [vmem:[#allocation2 + $0x98] sm:$0x1]  ;;  %v1666_v50 = vrot.slane %v1664_v35, 4  ;;  %v2622_v20 = vrot.slane %v2620_v9, 5 }
 0x225   : > { %4738 = vmatmul.bf16.gmra.mxu1 %v5377_v2  ;;  %5555 = vmatmul.msk.bf16.gmra.mxu3 %vm4641_vm3, %v5445_v7  ;;  %3904 = vst.msk [vmem:[#allocation3 + $0xb8] sm:$0xf] %vm2303_vm7, %v3824_v33  ;;  %v3662_v36 = vsel %vm5830_vm13, %v3657_v19, %v7465_v37  ;;  %v2163_v5 = vld [vmem:[#allocation2 + $0x84] sm:$0xf]  ;;  %v2617_v8 = vor.u32 %v2616_v27, %v7525_v63  ;;  %v3674_v7 = vshrl.u32 %v3394_v32, 16  ;;  %v3677_v31 = vshll.u32 %v3394_v32, 16 }
 0x226   : > { %2076 = vrot.lane.b32.xlu0 %v2013_v26, %s5663_s12  ;;  %2817 = vst.msk [vmem:[#allocation3 + $0xd0] sm:$0xf] %vm616_vm2, %v2599_v47  ;;  %v5245_v42 = vrot.slane %v1848_v55, 9  ;;  %v3010_v1 = vrot.slane %v2867_v10, 5  ;;  %v1196_v44 = vld [vmem:[#allocation2 + $0x7c] sm:$0xf] }
 0x227   : > { %2072 = vrot.lane.b32.xlu1 %v2006_v28, %s5663_s12  ;;  %v4798_v56 = vpop.f32.mrf.mxu2  ;;  %v3009_v39 = vrot.slane %v3007_v43, 4  ;;  %v2618_v37 = vrot.slane %v2617_v8, 4  ;;  %1228 = vst.msk [vmem:[#allocation3 + $0xfc] sm:$0xf] %vm616_vm2, %v1196_v44  ;;  %v2363_v2 = vld [vmem:[#allocation2 + $0x78] sm:$0xf] }
 0x228   : > { %v7515_v33 = vadd.f32 %v4798_v56, %v4709_v23  ;;  %v7518_v15 = vpop.permute.xlu0 %2052  ;;  %v2601_v26 = vshrl.u32 %v2363_v2, 16  ;;  %v2604_v28 = vshll.u32 %v2363_v2, 16  ;;  %v3676_v56 = vrot.slane %v3674_v7, 4  ;;  %v1286_v61 = vld [vmem:[#allocation2 + $0xbc] sm:$0x1] }
 0x229   : > { %v3822_v13 = vpop.permute.xlu1 %3821  ;;  %v2623_v23 = vsel %vm5830_vm13, %v2618_v37, %v2622_v20  ;;  %v3679_v25 = vrot.slane %v3677_v31, 5  ;;  %v2010_v6 = vsel %vm5804_vm8, %v5245_v42, %v2009_v58  ;;  %v676_v19 = vld [vmem:[#allocation2 + $0xc0] sm:$0x1]  ;;  %v3011_v18 = vsel %vm5804_vm8, %v3009_v39, %v3010_v1  ;;  %v2164_v9 = vld [vmem:[#allocation2 + $0x88] sm:$0xf] }
 0x22a   : > { %3903 = vst.msk [vmem:[#allocation3 + $0xac] sm:$0xf] %vm2303_vm7, %v3822_v13  ;;  %1732 = vrot.lane.b32.xlu2 %v1649_v21, %s5664_s13  ;;  %v2603_v35 = vrot.slane %v2601_v26, 4  ;;  %v2606_v62 = vrot.slane %v2604_v28, 5  ;;  %v2865_v13 = vld [vmem:[#allocation2 + $0x90] sm:$0xe] }
 0x22b   : > { %2819 = vst.msk [vmem:[#allocation3 + $0xe8] sm:$0xf] %vm616_vm2, %v2623_v23  ;;  %v3395_v57 = vld [vmem:[#allocation2 + $0xa0] sm:$0xf]  ;;  %v677_v59 = vsel %vm5826_vm10, 0, %v676_v19  ;;  %v3680_v21 = vor.u32 %v3679_v25, %v3676_v56  ;;  %v1670_v32 = vshll.u32 %v1286_v61, 16 }
 0x22c   : > { %v1715_v49 = vpop.permute.xlu2 %1714  ;;  %v5366_v45 = vld [vmem:[#allocation3 + $0xb4] sm:$0xf0]  ;;  %v2607_v3 = vor.u32 %v2606_v62, %v2603_v35  ;;  %678 = vst [vmem:[#allocation2 + $0xc0] sm:$0x1] %v677_v59  ;;  %v5257_v55 = vrot.slane %v2865_v13, 9  ;;  %v3687_v1 = vshrl.u32 %v3395_v57, 16 }
 0x22d   : > { %1791 = vst.msk [vmem:[#allocation3 + $0xf0] sm:$0xf] %vm1770_vm4, %v1715_v49  ;;  %v1198_v27 = vld [vmem:[#allocation2 + $0x88] sm:$0xf]  ;;  %v3681_v49 = vrot.slane %v3680_v21, 4  ;;  %v1672_v8 = vrot.slane %v1670_v32, 5 }
 0x22e   : > { %2247 = vrot.lane.b32.xlu0 %v2163_v5, %s5665_s16  ;;  %v2608_v10 = vrot.slane %v2607_v3, 4  ;;  %1230 = vst.msk [vmem:[#allocation3 + $0x114] sm:$0xf] %vm616_vm2, %v1198_v27  ;;  %v3008_v7 = vsel %vm5804_vm8, %v5257_v55, %v3007_v43  ;;  %v732_v31 = vld [vmem:[#allocation2 + $0xc8] sm:$0x1]  ;;  %v3689_v39 = vrot.slane %v3687_v1, 4 }
 0x22f   : > { %3833 = vrot.lane.b32.xlu1 %v3662_v36, %s5665_s16  ;;  %v3683_v36 = vshll.u32 %v3395_v57, 16  ;;  %v733_v44 = vsel %vm5790_vm5, 0, %v732_v31  ;;  %v5653_v37 = vld [vmem:[%s8058_s4] ss:$0 sm:$0xff]  ;;  %v3398_v28 = vld [vmem:[#allocation2 + $0xac] sm:$0xf] }
 0x230   : > { %v3075_v54 = vpop.permute.xlu0 %3074  ;;  %v2613_v20 = vsel %vm5830_vm13, %v2608_v10, %v7525_v63  ;;  %734 = vst [vmem:[#allocation2 + $0xc8] sm:$0x1] %v733_v44  ;;  %v1197_v23 = vld [vmem:[#allocation2 + $0x84] sm:$0xf]  ;;  %v2166_v56 = vld [vmem:[#allocation2 + $0x94] sm:$0xf] }
 0x231   : > { %v3266_v51 = vpop.permute.xlu1 %3265  ;;  %v5583_v30 = vld [vmem:[#allocation3 + $0xac] sm:$0xf]  ;;  %3153 = vst.msk [vmem:[#allocation3 + $0xd0] sm:$0xf] %vm1770_vm4, %v3075_v54  ;;  %v3685_v42 = vrot.slane %v3683_v36, 5  ;;  %v3707_v3 = vshll.u32 %v3398_v28, 16 }
 0x232   : > { %v5369_v47 = vor.u32 %v5583_v30, %v5366_v45  ;;  %3346 = vst.msk [vmem:[#allocation3 + $0xd0] sm:$0xf] %vm2110_vm6, %v3268_v41  ;;  %2074 = vrot.lane.b32.xlu2 %v2010_v6, %s5663_s12  ;;  %v1667_v41 = vor.u32 %v1666_v50, %v7455_v34  ;;  %v3192_v30 = vld [vmem:[#allocation2 + $0xa0] sm:$0xf]  ;;  %v3396_v45 = vld [vmem:[#allocation2 + $0xa4] sm:$0x1] }
 0x233   : > { %3345 = vst.msk [vmem:[#allocation3 + $0xc4] sm:$0xf] %vm2110_vm6, %v3266_v51  ;;  %v3686_v60 = vsel %vm5830_vm13, %v3681_v49, %v3685_v42  ;;  %v3191_v25 = vld [vmem:[#allocation2 + $0x9c] sm:$0xf]  ;;  %v3690_v6 = vor.u32 %v3689_v39, %v3685_v42  ;;  %v3693_v35 = vshll.u32 %v3396_v45, 16  ;;  %v3711_v59 = vshrl.u32 %v3398_v28, 16 }
 0x234   : > { %4822 = vmatmul.bf16.gmra.mxu2 %v5369_v47  ;;  %v7553_v58 = vpop.permute.xlu2 %2056  ;;  %v1668_v5 = vrot.slane %v1667_v41, 4  ;;  %2818 = vst.msk [vmem:[#allocation3 + $0xdc] sm:$0xf] %vm616_vm2, %v2613_v20  ;;  %v1199_v47 = vld [vmem:[#allocation2 + $0x90] sm:$0xf]  ;;  %v7600_v20 = vrot.slane %v3707_v3, 5 }
 0x235   : > { %1231 = vst.msk [vmem:[#allocation3 + $0x120] sm:$0xf] %vm616_vm2, %v1199_v47  ;;  %v7588_v62 = vld [vmem:[#allocation2 + $0xa0] sm:$0xf]  ;;  %v1201_v41 = vld [vmem:[#allocation2 + $0x9c] sm:$0xf] }
 0x236   : > { %3086 = vrot.lane.b32.xlu0 %v3011_v18, %s5664_s13  ;;  %v1673_v43 = vsel %vm5830_vm13, %v1668_v5, %v1672_v8  ;;  %1229 = vst.msk [vmem:[#allocation3 + $0x108] sm:$0xf] %vm616_vm2, %v1197_v23  ;;  %v2870_v32 = vld [vmem:[#allocation2 + $0xa4] sm:$0x1]  ;;  %v3397_v10 = vld [vmem:[#allocation2 + $0xa8] sm:$0xf] }
 0x237   : > { %2249 = vrot.lane.b32.xlu1 %v2164_v9, %s5665_s16  ;;  %v3691_v9 = vrot.slane %v3690_v6, 4  ;;  %1233 = vst.msk [vmem:[#allocation3 + $0x138] sm:$0xf] %vm616_vm2, %v1201_v41  ;;  %v3014_v49 = vrot.slane %v7588_v62, 5  ;;  %v3399_v5 = vld [vmem:[#allocation2 + $0xb0] sm:$0x1] }
 0x238   : > { %v3826_v34 = vpop.permute.xlu0 %3825  ;;  %v2165_v42 = vld [vmem:[#allocation2 + $0x90] sm:$0xf]  ;;  %v3698_v1 = vshrl.u32 %v3397_v10, 16  ;;  %v3701_v44 = vshll.u32 %v3397_v10, 16  ;;  %v3017_v39 = vrot.slane %v2870_v32, 5  ;;  %vm5117_vm1 = vcmask 97312  }
 0x239   : > { %v1713_v50 = vpop.permute.xlu1 %1712  ;;  %3905 = vst.msk [vmem:[#allocation3 + $0xc4] sm:$0xf] %vm2303_vm7, %v3826_v34  ;;  %v3695_v34 = vrot.slane %v3693_v35, 5  ;;  %v2366_v23 = vld [vmem:[#allocation2 + $0x84] sm:$0xf] }
 0x23a   : > { %1790 = vst.msk [vmem:[#allocation3 + $0xe4] sm:$0xf] %vm1770_vm4, %v1713_v50  ;;  %3084 = vrot.lane.b32.xlu2 %v3008_v7, %s5664_s13  ;;  %v1168_v50 = vld [vmem:[#allocation2 + $0xc0] sm:$0xf]  ;;  %v3713_v7 = vrot.slane %v3711_v59, 4  ;;  %v3700_v0 = vrot.slane %v3698_v1, 4 }
 0x23b   : > { %2130 = vst.msk [vmem:[#allocation3 + $0xe4] sm:$0xf] %vm2110_vm6, %v7518_v15  ;;  %v547_v15 = vpop.f32.mrf.mxu0  ;;  %v1172_v62 = vld [vmem:[#allocation2 + $0xc8] sm:$0x1] }
 0x23c   : > { %v3079_v63 = vpop.permute.xlu2 %3078  ;;  %v548_v2 = vadd.f32 %v5653_v37, %v547_v15  ;;  %v3016_v15 = vrot.slane %v3014_v49, 4 }
 0x23d   : > { %3155 = vst.msk [vmem:[#allocation3 + $0xe8] sm:$0xf] %vm1770_vm4, %v3079_v63  ;;  %v3193_v63 = vld [vmem:[#allocation2 + $0xa8] sm:$0xf] }
 0x23e   : > { %3837 = vrot.lane.b32.xlu0 %v3686_v60, %s5665_s16  ;;  %v582_v26 = vmax.f32 %v548_v2, 0.0 }
 0x23f   : > { %1736 = vrot.lane.b32.xlu1 %v1673_v43, %s5664_s13 }
 0x240   : > { %v3270_v54 = vpop.permute.xlu0 %3269  ;;  %v614_v61 = vpack.c.bf16 %v582_v26, %v582_v26 }
 0x241   : > { %v2055_v51 = vpop.permute.xlu1 %2054 }
 0x242   : > { %2131 = vst.msk [vmem:[#allocation3 + $0xf0] sm:$0xf] %vm2110_vm6, %v2055_v51  ;;  %3279 = vrot.lane.b32.xlu2 %v3192_v30, %s5663_s12  ;;  %v996_v19 = vshrl.u32 %v614_v61, 16  ;;  %v999_v57 = vshll.u32 %v614_v61, 16  ;;  %v3714_v51 = vor.u32 %v3713_v7, %v7600_v20  ;;  %v2868_v30 = vld [vmem:[#allocation2 + $0x9c] sm:$0xe]  ;;  %v3018_v61 = vsel %vm5804_vm8, %v3016_v15, %v3017_v39 }
 0x243   : > { %v549_v18 = vpop.f32.mrf.mxu0  ;;  %v5258_v35 = vrot.slane %v2868_v30, 9  ;;  %v2872_v7 = vld [vmem:[#allocation2 + $0xac] sm:$0xf] }
 0x244   : > { %v2246_v13 = vpop.permute.xlu2 %2245  ;;  %v7594_v21 = vrot.slane %v996_v19, 7  ;;  %v550_v55 = vadd.f32 %v5653_v37, %v549_v18  ;;  %v3717_v37 = vshll.u32 %v3399_v5, 16  ;;  %v2628_v19 = vshll.u32 %v2366_v23, 16 }
 0x245   : > { %2323 = vst.msk [vmem:[#allocation3 + $0xe4] sm:$0xf] %vm2303_vm7, %v2246_v13  ;;  %v2625_v13 = vshrl.u32 %v2366_v23, 16  ;;  %v3015_v5 = vsel %vm5804_vm8, %v5258_v35, %v3014_v49 }
 0x246   : > { %2253 = vrot.lane.b32.xlu0 %v2166_v56, %s5665_s16  ;;  %v1001_v8 = vor.u32 %v999_v57, %v7594_v21  ;;  %v583_v31 = vmax.f32 %v550_v55, 0.0  ;;  %v1002_v28 = vrot.slane %v7594_v21, 4  ;;  %v2367_v56 = vld [vmem:[#allocation2 + $0x88] sm:$0xf]  ;;  %v3715_v57 = vrot.slane %v3714_v51, 4 }
 0x247   : > { %3277 = vrot.lane.b32.xlu1 %v3191_v25, %s5663_s12  ;;  %v3719_v3 = vrot.slane %v3717_v37, 5  ;;  %v2630_v21 = vrot.slane %v2628_v19, 5  ;;  %v2634_v32 = vshll.u32 %v2367_v56, 16  ;;  %v3021_v37 = vrot.slane %v2872_v7, 5  ;;  %v7653_v19 = vld [vmem:[#allocation2 + $0xbc] sm:$0x1] }
 0x248   : > { %v1717_v27 = vpop.permute.xlu0 %1716  ;;  %v1169_v60 = vsel %vm5878_vm14, %v1001_v8, %v1168_v50  ;;  %v615_v43 = vpack.c.bf16 %v583_v31, %v583_v31  ;;  %v2871_v8 = vld [vmem:[#allocation2 + $0xa8] sm:$0xe] }
 0x249   : > { %v3077_v36 = vpop.permute.xlu1 %3076  ;;  %1792 = vst.msk [vmem:[#allocation3 + $0xfc] sm:$0xf] %vm1770_vm4, %v1717_v27  ;;  %v2638_v27 = vshrl.u32 %v2367_v56, 16  ;;  %v3720_v50 = vsel %vm5830_vm13, %v3715_v57, %v3719_v3  ;;  %v5259_v39 = vrot.slane %v2871_v8, 9  ;;  %v2167_v8 = vld [vmem:[#allocation2 + $0x9c] sm:$0xf] }
 0x24a   : > { %2132 = vst.msk [vmem:[#allocation3 + $0xfc] sm:$0xf] %vm2110_vm6, %v7553_v58  ;;  %2251 = vrot.lane.b32.xlu2 %v2165_v42, %s5665_s16  ;;  %v3696_v58 = vsel %vm5830_vm13, %v3691_v9, %v3695_v34  ;;  %v1004_v45 = vshrl.u32 %v615_v43, 16  ;;  %v1007_v26 = vshll.u32 %v615_v43, 16  ;;  %v2627_v9 = vrot.slane %v2625_v13, 4  ;;  %v7651_v13 = vpop.f32.mrf.mxu3 }
 0x24b   : > { %3154 = vst.msk [vmem:[#allocation3 + $0xdc] sm:$0xf] %vm1770_vm4, %v3077_v36  ;;  %v2636_v42 = vrot.slane %v2634_v32, 5  ;;  %v2640_v1 = vrot.slane %v2638_v27, 4  ;;  %v3022_v56 = vsel %vm5804_vm8, %v5259_v39, %v3021_v37  ;;  %v2168_v32 = vld [vmem:[#allocation2 + $0xa0] sm:$0xf] }
 0x24c   : > { %3347 = vst.msk [vmem:[#allocation3 + $0xdc] sm:$0xf] %vm2110_vm6, %v3270_v54  ;;  %v3830_v2 = vpop.permute.xlu2 %3829  ;;  %v3703_v54 = vrot.slane %v3701_v44, 5  ;;  %v1006_v47 = vrot.slane %v1004_v45, 7  ;;  %v2631_v36 = vor.u32 %v2630_v21, %v2627_v9  ;;  %v3400_v9 = vld [vmem:[#allocation2 + $0xb4] sm:$0xf] }
 0x24d   : > { %1170 = vst [vmem:[#allocation2 + $0xc0] sm:$0xf] %v1169_v60  ;;  %v5586_v60 = vld [vmem:[#allocation3 + $0xc4] sm:$0xf]  ;;  %v2641_v51 = vor.u32 %v2640_v1, %v2636_v42 }
 0x24e   : > { %3907 = vst.msk [vmem:[#allocation3 + $0xdc] sm:$0xf] %vm2303_vm7, %v3830_v2  ;;  %3281 = vrot.lane.b32.xlu0 %v3193_v63, %s5663_s12  ;;  %v1009_v59 = vor.u32 %v1007_v26, %v1006_v47  ;;  %v1011_v41 = vrot.slane %v1006_v47, 4  ;;  %v3704_v18 = vor.u32 %v3703_v54, %v3700_v0  ;;  %v2632_v31 = vrot.slane %v2631_v36, 4  ;;  %v2368_v2 = vld [vmem:[#allocation2 + $0x8c] sm:$0x1] }
 0x24f   : > { %3839 = vrot.lane.b32.xlu1 %v3696_v58, %s5665_s16  ;;  %v2644_v30 = vshll.u32 %v2368_v2, 16  ;;  %v3401_v54 = vld [vmem:[#allocation2 + $0xb8] sm:$0xf]  ;;  %v3741_v36 = vshll.u32 %v7653_v19, 16  ;;  %v2370_v2 = vld [vmem:[#allocation2 + $0x94] sm:$0xf] }
 0x250   : > { %v7616_v25 = vpop.permute.xlu0 %2058  ;;  %v1010_v55 = vsel %vm5888_vm0, %v1002_v28, %v1009_v59  ;;  %v1173_v10 = vsel %vm5826_vm10, %v1011_v41, %v1172_v62  ;;  %v3705_v16 = vrot.slane %v3704_v18, 4  ;;  %v2637_v49 = vsel %vm5830_vm13, %v2632_v31, %v2636_v42 }
 0x251   : > { %v3828_v6 = vpop.permute.xlu1 %3827  ;;  %1171 = vst.msk [vmem:[#allocation2 + $0xc4] sm:$0xf] %vm616_vm2, %v1010_v55  ;;  %v2642_v28 = vrot.slane %v2641_v51, 4  ;;  %v2646_v47 = vrot.slane %v2644_v30, 5  ;;  %v3731_v57 = vshll.u32 %v3401_v54, 16  ;;  %v3735_v3 = vshrl.u32 %v3401_v54, 16  ;;  %v7657_v55 = vpop.f32.mrf.mxu2 }
 0x252   : > { %3906 = vst.msk [vmem:[#allocation3 + $0xd0] sm:$0xf] %vm2303_vm7, %v3828_v6  ;;  %3090 = vrot.lane.b32.xlu2 %v3018_v61, %s5664_s13  ;;  %v3710_v58 = vsel %vm5830_vm13, %v3705_v16, %v7600_v20  ;;  %v3194_v6 = vld [vmem:[#allocation2 + $0xac] sm:$0xf]  ;;  %v7647_v20 = vld [vmem:[#allocation2 + $0xb0] sm:$0x1] }
 0x253   : > { %1174 = vst [vmem:[#allocation2 + $0xc8] sm:$0x1] %v1173_v10  ;;  %v2647_v61 = vsel %vm5830_vm13, %v2642_v28, %v2646_v47  ;;  %v7660_v10 = vrot.slane %v3021_v37, 4  ;;  %v3024_v27 = vrot.slane %v7647_v20, 5  ;;  %v7670_v7 = vrot.slane %v3731_v57, 5 }
 0x254   : > { %v1721_v34 = vpop.permute.xlu2 %1720  ;;  %v3963_v45 = vld [vmem:[#allocation2 + $0xc0] sm:$0xe]  ;;  %2820 = vst.msk [vmem:[#allocation3 + $0xf4] sm:$0xf] %vm616_vm2, %v2637_v49  ;;  %v3737_v16 = vrot.slane %v3735_v3, 4  ;;  %v3722_v31 = vshrl.u32 %v3400_v9, 16 }
 0x255   : > { %1794 = vst.msk [vmem:[#allocation3 + $0x114] sm:$0xf] %vm1770_vm4, %v1721_v34  ;;  %v5276_v62 = vrot.slane %v3963_v45, 9  ;;  %v3725_v42 = vshll.u32 %v3400_v9, 16  ;;  %v5589_v39 = vld [vmem:[#allocation3 + $0xdc] sm:$0xf] }
 0x256   : > { %3843 = vrot.lane.b32.xlu0 %v3720_v50, %s5665_s16  ;;  %2821 = vst.msk [vmem:[#allocation3 + $0x100] sm:$0xf] %vm616_vm2, %v2647_v61  ;;  %v7666_v50 = vpop.f32.mrf.mxu1  ;;  %v7680_v37 = vld [vmem:[#allocation2 + $0xb8] sm:$0xf]  ;;  %v2658_v30 = vshll.u32 %v2370_v2, 16  ;;  %v2662_v45 = vshrl.u32 %v2370_v2, 16  ;;  %v3738_v57 = vor.u32 %v3737_v16, %v7670_v7 }
 0x257   : > { %3088 = vrot.lane.b32.xlu1 %v3015_v5, %s5664_s13  ;;  %v3196_v5 = vld [vmem:[#allocation2 + $0xb8] sm:$0xf]  ;;  %v3195_v54 = vld [vmem:[#allocation2 + $0xb4] sm:$0xf]  ;;  %v3403_v28 = vld [vmem:[#allocation2 + $0xc0] sm:$0xf] }
 0x258   : > { %v3832_v44 = vpop.permute.xlu0 %3831  ;;  %v3964_v26 = vld [vmem:[#allocation2 + $0xc4] sm:$0xf]  ;;  %v1204_v47 = vld [vmem:[#allocation2 + $0xac] sm:$0xf]  ;;  %v3724_v61 = vrot.slane %v3722_v31, 4  ;;  %v2660_v3 = vrot.slane %v2658_v30, 5 }
 0x259   : > { %v3272_v63 = vpop.permute.xlu1 %3271  ;;  %v5378_v43 = vld [vmem:[#allocation3 + $0xcc] sm:$0xf0]  ;;  %v4117_v0 = vrot.slane %v3964_v26, 5  ;;  %v3028_v9 = vrot.slane %v7680_v37, 5  ;;  %1236 = vst.msk [vmem:[#allocation3 + $0x15c] sm:$0xf] %vm616_vm2, %v1204_v47 }
 0x25a   : > { %3348 = vst.msk [vmem:[#allocation3 + $0xe8] sm:$0xf] %vm2110_vm6, %v3272_v63  ;;  %v5381_v15 = vor.u32 %v5586_v60, %v5378_v43  ;;  %3841 = vrot.lane.b32.xlu2 %v3710_v58, %s5665_s16  ;;  %v3965_v35 = vld [vmem:[#allocation2 + $0xc8] sm:$0x1]  ;;  %v2369_v63 = vld [vmem:[#allocation2 + $0x90] sm:$0xf] }
 0x25b   : > { %3908 = vst.msk [vmem:[#allocation3 + $0xe8] sm:$0xf] %vm2303_vm7, %v3832_v44  ;;  %v4119_v59 = vrot.slane %v4117_v0, 4  ;;  %v4120_v21 = vrot.slane %v3965_v35, 5  ;;  %v4118_v34 = vsel %vm5804_vm8, %v5276_v62, %v4117_v0  ;;  %v1202_v43 = vld [vmem:[#allocation2 + $0xa0] sm:$0xf] }
 0x25c   : > { %4827 = vmatmul.bf16.gmra.mxu2 %v5381_v15  ;;  %v2063_v23 = vpop.permute.xlu2 %2062  ;;  %4189 = vst.msk [vmem:[#allocation3 + $0x158] sm:$0xf] %vm616_vm2, %v4118_v34  ;;  %v2649_v49 = vshrl.u32 %v2369_v63, 16  ;;  %v2652_v15 = vshll.u32 %v2369_v63, 16  ;;  %v3727_v35 = vrot.slane %v3725_v42, 5  ;;  %v3743_v63 = vrot.slane %v3741_v36, 5 }
 0x25d   : > { %v4121_v44 = vsel %vm5804_vm8, %v4119_v59, %v4120_v21  ;;  %1234 = vst.msk [vmem:[#allocation3 + $0x144] sm:$0xf] %vm616_vm2, %v1202_v43  ;;  %v2371_v59 = vld [vmem:[#allocation2 + $0x98] sm:$0x1]  ;;  %v3746_v21 = vshrl.u32 %v3403_v28, 16  ;;  %v3030_v20 = vrot.slane %v3028_v9, 4 }
 0x25e   : > { %3092 = vrot.lane.b32.xlu0 %v3022_v56, %s5664_s13  ;;  %4190 = vst.msk [vmem:[#allocation3 + $0x164] sm:$0xf] %vm616_vm2, %v4121_v44  ;;  %v2651_v58 = vrot.slane %v2649_v49, 4  ;;  %v2654_v51 = vrot.slane %v2652_v15, 5  ;;  %v2668_v31 = vshll.u32 %v2371_v59, 16  ;;  %v3025_v44 = vsel %vm5804_vm8, %v7660_v10, %v3024_v27 }
 0x25f   : > { %3283 = vrot.lane.b32.xlu1 %v3194_v6, %s5663_s12  ;;  %v2876_v6 = vld [vmem:[#allocation2 + $0xbc] sm:$0x1]  ;;  %v3739_v49 = vrot.slane %v3738_v57, 4  ;;  %v3748_v27 = vrot.slane %v3746_v21, 4  ;;  %v2874_v2 = vld [vmem:[#allocation2 + $0xb4] sm:$0xe] }
 0x260   : > { %v1723_v41 = vpop.permute.xlu0 %1722  ;;  %v2655_v62 = vor.u32 %v2654_v51, %v2651_v58  ;;  %v3031_v15 = vrot.slane %v2876_v6, 5  ;;  %v679_v58 = vld [vmem:[#allocation2 + $0xcc] sm:$0x1]  ;;  %v2670_v30 = vrot.slane %v2668_v31, 5  ;;  %v1203_v6 = vld [vmem:[#allocation2 + $0xa8] sm:$0xf] }
 0x261   : > { %v1719_v18 = vpop.permute.xlu1 %1718  ;;  %1795 = vst.msk [vmem:[#allocation3 + $0x120] sm:$0xf] %vm1770_vm4, %v1723_v41  ;;  %v2664_v41 = vrot.slane %v2662_v45, 4  ;;  %v3744_v47 = vsel %vm5830_vm13, %v3739_v49, %v3743_v63  ;;  %v5260_v59 = vrot.slane %v2874_v2, 9  ;;  %v2372_v21 = vld [vmem:[#allocation2 + $0x9c] sm:$0xf] }
 0x262   : > { %2135 = vst.msk [vmem:[#allocation3 + $0x120] sm:$0xf] %vm2110_vm6, %v2063_v23  ;;  %2257 = vrot.lane.b32.xlu2 %v2168_v32, %s5665_s16  ;;  %v5390_v1 = vld [vmem:[#allocation3 + $0xe4] sm:$0xf0]  ;;  %v7686_v23 = vpop.f32.mrf.mxu3  ;;  %v3749_v32 = vshll.u32 %v3403_v28, 16  ;;  %v2656_v34 = vrot.slane %v2655_v62, 4  ;;  %v3032_v57 = vsel %vm5804_vm8, %v3030_v20, %v3031_v15 }
 0x263   : > { %1793 = vst.msk [vmem:[#allocation3 + $0x108] sm:$0xf] %vm1770_vm4, %v1719_v18  ;;  %v5393_v56 = vor.u32 %v5589_v39, %v5390_v1  ;;  %v7691_v18 = vpop.f32.mrf.mxu1  ;;  %v2665_v16 = vor.u32 %v2664_v41, %v2660_v3  ;;  %v2169_v1 = vld [vmem:[#allocation2 + $0xa8] sm:$0xf]  ;;  %v680_v28 = vsel %vm5826_vm10, 0, %v679_v58 }
 0x264   : > { %2133 = vst.msk [vmem:[#allocation3 + $0x108] sm:$0xf] %vm2110_vm6, %v7616_v25  ;;  %v1727_v60 = vpop.permute.xlu2 %1726  ;;  %v1200_v25 = vld [vmem:[#allocation2 + $0x94] sm:$0xf]  ;;  %v2661_v43 = vsel %vm5830_vm13, %v2656_v34, %v2660_v3  ;;  %v3751_v19 = vrot.slane %v3749_v32, 5 }
 0x265   : > { %1797 = vst.msk [vmem:[#allocation3 + $0x138] sm:$0xf] %vm1770_vm4, %v1727_v60  ;;  %v3728_v60 = vor.u32 %v3727_v35, %v3724_v61  ;;  %v5606_v39 = vld [vmem:[#allocation3 + $0x160] sm:$0xf0]  ;;  %v2666_v51 = vrot.slane %v2665_v16, 4 }
 0x266   : > { %3287 = vrot.lane.b32.xlu0 %v3196_v5, %s5663_s12  ;;  %1232 = vst.msk [vmem:[#allocation3 + $0x12c] sm:$0xf] %vm616_vm2, %v1200_v25  ;;  %v7696_v5 = vpop.f32.mrf.mxu2  ;;  %v3752_v61 = vor.u32 %v3751_v19, %v3748_v27  ;;  %v2373_v34 = vld [vmem:[#allocation2 + $0xa0] sm:$0xf]  ;;  %v735_v63 = vld [vmem:[#allocation2 + $0xd4] sm:$0x1] }
 0x267   : > { %2255 = vrot.lane.b32.xlu1 %v2167_v8, %s5665_s16  ;;  %v5456_v8 = vld [vmem:[#allocation3 + $0x158] sm:$0xf]  ;;  %2822 = vst.msk [vmem:[#allocation3 + $0x10c] sm:$0xf] %vm616_vm2, %v2661_v43  ;;  %v2671_v35 = vsel %vm5830_vm13, %v2666_v51, %v2670_v30  ;;  %v2682_v16 = vshll.u32 %v2373_v34, 16  ;;  %v3029_v43 = vsel %vm5804_vm8, %v5260_v59, %v3028_v9  ;;  %v736_v20 = vsel %vm5790_vm5, 0, %v735_v63 }
 0x268   : > { %v7683_v26 = vpop.permute.xlu0 %2064  ;;  %v5457_v10 = vor.u32 %v5606_v39, %v5456_v8  ;;  %681 = vst [vmem:[#allocation2 + $0xcc] sm:$0x1] %v680_v28  ;;  %v3753_v8 = vrot.slane %v3752_v61, 4  ;;  %v2676_v27 = vshll.u32 %v2372_v21, 16  ;;  %v2170_v51 = vld [vmem:[#allocation2 + $0xac] sm:$0xf] }
 0x269   : > { %v2061_v0 = vpop.permute.xlu1 %2060  ;;  %1235 = vst.msk [vmem:[#allocation3 + $0x150] sm:$0xf] %vm616_vm2, %v1203_v6  ;;  %v3198_v59 = vld [vmem:[#allocation2 + $0xc4] sm:$0xf] }
 0x26a   : > { %2134 = vst.msk [vmem:[#allocation3 + $0x114] sm:$0xf] %vm2110_vm6, %v2061_v0  ;;  %3285 = vrot.lane.b32.xlu2 %v3195_v54, %s5663_s12  ;;  %v7714_v45 = vpop.f32.mrf.mxu3  ;;  %v3729_v0 = vrot.slane %v3728_v60, 4  ;;  %5556 = vmatmul.msk.bf16.gmra.mxu3 %vm4641_vm3, %v5457_v10  ;;  %v7718_v54 = vld [vmem:[#allocation2 + $0xc4] sm:$0xf]  ;;  %v2673_v60 = vshrl.u32 %v2372_v21, 16 }
 0x26b   : > { %v7729_v62 = vpop.f32.mrf.mxu1  ;;  %v3755_v41 = vshll.u32 %v7718_v54, 16  ;;  %2823 = vst.msk [vmem:[#allocation3 + $0x118] sm:$0xf] %vm616_vm2, %v2671_v35  ;;  %v2684_v10 = vrot.slane %v2682_v16, 5  ;;  %v3759_v40 = vshrl.u32 %v7718_v54, 16 }
 0x26c   : > { %4832 = vmatmul.bf16.gmra.mxu2 %v5393_v56  ;;  %v7698_v42 = vpop.permute.xlu2 %2068  ;;  %v1205_v56 = vld [vmem:[#allocation2 + $0xb4] sm:$0xf]  ;;  %v3734_v3 = vsel %vm5830_vm13, %v3729_v0, %v7670_v7  ;;  %v2686_v7 = vshrl.u32 %v2373_v34, 16  ;;  %737 = vst [vmem:[#allocation2 + $0xd4] sm:$0x1] %v736_v20 }
 0x26d   : > { %1237 = vst.msk [vmem:[#allocation3 + $0x168] sm:$0xf] %vm616_vm2, %v1205_v56  ;;  %v7749_v15 = vrot.slane %v3755_v41, 5  ;;  %v3405_v54 = vld [vmem:[#allocation2 + $0xc8] sm:$0x1] }
 0x26e   : > { %2259 = vrot.lane.b32.xlu0 %v2169_v1, %s5665_s16  ;;  %v7738_v32 = vpop.f32.mrf.mxu2  ;;  %v2688_v9 = vrot.slane %v2686_v7, 4  ;;  %v3197_v16 = vld [vmem:[#allocation2 + $0xc0] sm:$0xf]  ;;  %v2376_v20 = vld [vmem:[#allocation2 + $0xac] sm:$0xf] }
 0x26f   : > { %3094 = vrot.lane.b32.xlu1 %v3025_v44, %s5664_s13  ;;  %v5590_v44 = vld [vmem:[#allocation3 + $0xe0] sm:$0xf0]  ;;  %v3758_v37 = vsel %vm5830_vm13, %v3753_v8, %v7749_v15  ;;  %v2172_v8 = vld [vmem:[#allocation2 + $0xb8] sm:$0xf] }
 0x270   : > { %v3081_v36 = vpop.permute.xlu0 %3080  ;;  %v2689_v30 = vor.u32 %v2688_v9, %v2684_v10 }
 0x271   : > { %v2244_v25 = vpop.permute.xlu1 %2243  ;;  %3156 = vst.msk [vmem:[#allocation3 + $0xf4] sm:$0xf] %vm1770_vm4, %v3081_v36  ;;  %v2374_v36 = vld [vmem:[#allocation2 + $0xa4] sm:$0x1] }
 0x272   : > { %2322 = vst.msk [vmem:[#allocation3 + $0xd8] sm:$0xf] %vm2303_vm7, %v2244_v25  ;;  %3847 = vrot.lane.b32.xlu2 %v3744_v47, %s5665_s16  ;;  %v7754_v19 = vpop.f32.mrf.mxu3  ;;  %v2675_v25 = vrot.slane %v2673_v60, 4  ;;  %v2692_v0 = vshll.u32 %v2374_v36, 16  ;;  %v2678_v47 = vrot.slane %v2676_v27, 5  ;;  %v2690_v56 = vrot.slane %v2689_v30, 4 }
 0x273   : > { %v7760_v2 = vpop.f32.mrf.mxu1  ;;  %v2706_v30 = vshll.u32 %v2376_v20, 16 }
 0x274   : > { %v3274_v12 = vpop.permute.xlu2 %3273  ;;  %v2694_v6 = vrot.slane %v2692_v0, 5 }
 0x275   : > { %3349 = vst.msk [vmem:[#allocation3 + $0xf4] sm:$0xf] %vm2110_vm6, %v3274_v12  ;;  %v3407_v12 = vld [vmem:[#allocation2 + $0xd0] sm:$0xf] }
 0x276   : > { %3098 = vrot.lane.b32.xlu0 %v3032_v57, %s5664_s13  ;;  %v7763_v28 = vpop.f32.mrf.mxu2  ;;  %v2679_v57 = vor.u32 %v2678_v47, %v2675_v25  ;;  %v2695_v41 = vsel %vm5830_vm13, %v2690_v56, %v2694_v6  ;;  %v3779_v7 = vshll.u32 %v3407_v12, 16  ;;  %v3408_v25 = vld [vmem:[#allocation2 + $0xd4] sm:$0x1] }
 0x277   : > { %3845 = vrot.lane.b32.xlu1 %v3734_v3, %s5665_s16  ;;  %v3761_v3 = vrot.slane %v3759_v40, 4  ;;  %2825 = vst.msk [vmem:[#allocation3 + $0x130] sm:$0xf] %vm616_vm2, %v2695_v41  ;;  %v2171_v47 = vld [vmem:[#allocation2 + $0xb4] sm:$0xf] }
 0x278   : > { %v3276_v31 = vpop.permute.xlu0 %3275  ;;  %v2680_v21 = vrot.slane %v2679_v57, 4  ;;  %v2708_v57 = vrot.slane %v2706_v30, 5 }
 0x279   : > { %v3083_v1 = vpop.permute.xlu1 %3082  ;;  %v5388_v49 = vld [vmem:[#allocation3 + $0xd8] sm:$0xf]  ;;  %v3762_v60 = vor.u32 %v3761_v3, %v7749_v15  ;;  %v3199_v3 = vld [vmem:[#allocation2 + $0xcc] sm:$0xf] }
 0x27a   : > { %3157 = vst.msk [vmem:[#allocation3 + $0x100] sm:$0xf] %vm1770_vm4, %v3083_v1  ;;  %v5389_v39 = vor.u32 %v5590_v44, %v5388_v49  ;;  %3096 = vrot.lane.b32.xlu2 %v3029_v43, %s5664_s13  ;;  %v7773_v34 = vpop.f32.mrf.mxu3  ;;  %v3765_v1 = vshll.u32 %v3405_v54, 16  ;;  %v2375_v44 = vld [vmem:[#allocation2 + $0xa8] sm:$0xf] }
 0x27b   : > { %3350 = vst.msk [vmem:[#allocation3 + $0x100] sm:$0xf] %vm2110_vm6, %v3276_v31  ;;  %v3783_v31 = vshrl.u32 %v3407_v12, 16  ;;  %v3406_v43 = vld [vmem:[#allocation2 + $0xcc] sm:$0xf]  ;;  %v2697_v49 = vshrl.u32 %v2375_v44, 16  ;;  %v7788_v27 = vpop.f32.mrf.mxu1 }
 0x27c   : > { %4743 = vmatmul.bf16.gmra.mxu1 %v5389_v39  ;;  %v3836_v58 = vpop.permute.xlu2 %3835  ;;  %v2700_v39 = vshll.u32 %v2375_v44, 16  ;;  %v3773_v40 = vshll.u32 %v3406_v43, 16  ;;  %v3763_v56 = vrot.slane %v3762_v60, 4  ;;  %v3767_v6 = vrot.slane %v3765_v1, 5  ;;  %v2377_v54 = vld [vmem:[#allocation2 + $0xb0] sm:$0x1] }
 0x27d   : > { %3910 = vst.msk [vmem:[#allocation3 + $0x100] sm:$0xf] %vm2303_vm7, %v3836_v58  ;;  %v2699_v15 = vrot.slane %v2697_v49, 4  ;;  %v3770_v58 = vshrl.u32 %v3406_v43, 16  ;;  %v2716_v1 = vshll.u32 %v2377_v54, 16 }
 0x27e   : > { %3849 = vrot.lane.b32.xlu0 %v3758_v37, %s5665_s16  ;;  %v3785_v37 = vrot.slane %v3783_v31, 4  ;;  %v7793_v9 = vpop.f32.mrf.mxu2 }
 0x27f   : > { %2261 = vrot.lane.b32.xlu1 %v2170_v51, %s5665_s16  ;;  %v2702_v51 = vrot.slane %v2700_v39, 5  ;;  %v2877_v39 = vld [vmem:[#allocation2 + $0xc0] sm:$0xe] }
 0x280   : > { %v1729_v61 = vpop.permute.xlu0 %1728 }
 0x281   : > { %v1725_v35 = vpop.permute.xlu1 %1724  ;;  %1798 = vst.msk [vmem:[#allocation3 + $0x144] sm:$0xf] %vm1770_vm4, %v1729_v61  ;;  %v2710_v61 = vshrl.u32 %v2376_v20, 16  ;;  %v2703_v12 = vor.u32 %v2702_v51, %v2699_v15  ;;  %v2718_v51 = vrot.slane %v2716_v1, 5 }
 0x282   : > { %2138 = vst.msk [vmem:[#allocation3 + $0x144] sm:$0xf] %vm2110_vm6, %v7698_v42  ;;  %3291 = vrot.lane.b32.xlu2 %v3198_v59, %s5663_s12  ;;  %v2685_v42 = vsel %vm5830_vm13, %v2680_v21, %v2684_v10  ;;  %v7790_v10 = vrot.slane %v3779_v7, 5  ;;  %v2879_v59 = vld [vmem:[#allocation2 + $0xc8] sm:$0x1]  ;;  %v3789_v21 = vshll.u32 %v3408_v25, 16 }
 0x283   : > { %1796 = vst.msk [vmem:[#allocation3 + $0x12c] sm:$0xf] %vm1770_vm4, %v1725_v35  ;;  %v3775_v7 = vrot.slane %v3773_v40, 5  ;;  %v2704_v31 = vrot.slane %v2703_v12, 4  ;;  %v3038_v49 = vrot.slane %v2879_v59, 5  ;;  %v7810_v30 = vpop.f32.mrf.mxu1 }
 0x284   : > { %2136 = vst.msk [vmem:[#allocation3 + $0x12c] sm:$0xf] %vm2110_vm6, %v7683_v26  ;;  %v1733_v63 = vpop.permute.xlu2 %1732  ;;  %v7786_v26 = vld [vmem:[#allocation2 + $0xc4] sm:$0xf]  ;;  %v3786_v41 = vor.u32 %v3785_v37, %v7790_v10  ;;  %v3791_v37 = vrot.slane %v3789_v21, 5 }
 0x285   : > { %1800 = vst.msk [vmem:[#allocation3 + $0x15c] sm:$0xf] %vm1770_vm4, %v1733_v63  ;;  %v3035_v35 = vrot.slane %v7786_v26, 5  ;;  %v3768_v63 = vsel %vm5830_vm13, %v3763_v56, %v3767_v6  ;;  %v2709_v26 = vsel %vm5830_vm13, %v2704_v31, %v2708_v57  ;;  %v1206_v6 = vld [vmem:[#allocation2 + $0xb8] sm:$0xf] }
 0x286   : > { %2265 = vrot.lane.b32.xlu0 %v2172_v8, %s5665_s16  ;;  %2824 = vst.msk [vmem:[#allocation3 + $0x124] sm:$0xf] %vm616_vm2, %v2685_v42  ;;  %v2712_v8 = vrot.slane %v2710_v61, 4  ;;  %v7799_v42 = vpop.f32.mrf.mxu3  ;;  %v3787_v20 = vrot.slane %v3786_v41, 4 }
 0x287   : > { %3289 = vrot.lane.b32.xlu1 %v3197_v16, %s5663_s12  ;;  %v3772_v16 = vrot.slane %v3770_v58, 4  ;;  %v3037_v43 = vrot.slane %v3035_v35, 4  ;;  %2826 = vst.msk [vmem:[#allocation3 + $0x13c] sm:$0xf] %vm616_vm2, %v2709_v26  ;;  %v7808_v15 = vpop.f32.mrf.mxu2 }
 0x288   : > { %v2071_v36 = vpop.permute.xlu0 %2070  ;;  %v2713_v60 = vor.u32 %v2712_v8, %v2708_v57  ;;  %v3792_v61 = vsel %vm5830_vm13, %v3787_v20, %v3791_v37  ;;  %v2378_v57 = vld [vmem:[#allocation2 + $0xb4] sm:$0xf]  ;;  %1238 = vst.msk [vmem:[#allocation3 + $0x174] sm:$0xf] %vm616_vm2, %v1206_v6  ;;  %v3200_v37 = vld [vmem:[#allocation2 + $0xd0] sm:$0xf] }
 0x289   : > { %v2067_v0 = vpop.permute.xlu1 %2066  ;;  %v3776_v58 = vor.u32 %v3775_v7, %v3772_v16  ;;  %v3039_v56 = vsel %vm5804_vm8, %v3037_v43, %v3038_v49  ;;  %v2721_v21 = vshrl.u32 %v2378_v57, 16  ;;  %v2724_v8 = vshll.u32 %v2378_v57, 16  ;;  %v2174_v57 = vld [vmem:[#allocation2 + $0xc4] sm:$0xf] }
 0x28a   : > { %2137 = vst.msk [vmem:[#allocation3 + $0x138] sm:$0xf] %vm2110_vm6, %v2067_v0  ;;  %2263 = vrot.lane.b32.xlu2 %v2171_v47, %s5665_s16  ;;  %v2714_v40 = vrot.slane %v2713_v60, 4  ;;  %v5261_v47 = vrot.slane %v2877_v39, 9  ;;  %v2380_v39 = vld [vmem:[#allocation2 + $0xbc] sm:$0x1] }
 0x28b   : > { %v3777_v12 = vrot.slane %v3776_v58, 4  ;;  %v2723_v16 = vrot.slane %v2721_v21, 4  ;;  %v2726_v7 = vrot.slane %v2724_v8, 5  ;;  %v7840_v20 = vpop.f32.mrf.mxu1  ;;  %v2740_v58 = vshll.u32 %v2380_v39, 16 }
 0x28c   : > { %v2075_v44 = vpop.permute.xlu2 %2074  ;;  %v2719_v54 = vsel %vm5830_vm13, %v2714_v40, %v2718_v51  ;;  %v3036_v41 = vsel %vm5804_vm8, %v5261_v47, %v3035_v35  ;;  %v4791_v8 = vadd.f32 %v7294_v38, %v7292_v4 }
 0x28d   : > { %2827 = vst.msk [vmem:[#allocation3 + $0x148] sm:$0xf] %vm616_vm2, %v2719_v54  ;;  %v3782_v35 = vsel %vm5830_vm13, %v3777_v12, %v7790_v10  ;;  %v2727_v60 = vor.u32 %v2726_v7, %v2723_v16  ;;  %v4878_v10 = vadd.f32 %v7393_v46, %v7257_v53  ;;  %v2742_v47 = vrot.slane %v2740_v58, 5 }
 0x28e   : > { %3293 = vrot.lane.b32.xlu0 %v3199_v3, %s5663_s12  ;;  %v7823_v3 = vpop.f32.mrf.mxu3  ;;  %v4880_v4 = vadd.f32 %v7430_v24, %v4791_v8 }
 0x28f   : > { %3851 = vrot.lane.b32.xlu1 %v3768_v63, %s5665_s16  ;;  %v7837_v49 = vpop.f32.mrf.mxu2 }
 0x290   : > { %v1735_v25 = vpop.permute.xlu0 %1734 }
 0x291   : > { %1801 = vst.msk [vmem:[#allocation3 + $0x168] sm:$0xf] %vm1770_vm4, %v1735_v25  ;;  %v1731_v0 = vpop.permute.xlu1 %1730  ;;  %v2728_v25 = vrot.slane %v2727_v60, 4 }
 0x292   : > { %2141 = vst.msk [vmem:[#allocation3 + $0x168] sm:$0xf] %vm2110_vm6, %v2075_v44  ;;  %3102 = vrot.lane.b32.xlu2 %v3039_v56, %s5664_s13 }
 0x293   : > { %1799 = vst.msk [vmem:[#allocation3 + $0x150] sm:$0xf] %vm1770_vm4, %v1731_v0  ;;  %v4729_v54 = vpop.f32.mrf.mxu1 }
 0x294   : > { %2139 = vst.msk [vmem:[#allocation3 + $0x150] sm:$0xf] %vm2110_vm6, %v2071_v36  ;;  %v3085_v59 = vpop.permute.xlu2 %3084  ;;  %v2379_v36 = vld [vmem:[#allocation2 + $0xb8] sm:$0xf] }
 0x295   : > { %3158 = vst.msk [vmem:[#allocation3 + $0x10c] sm:$0xf] %vm1770_vm4, %v3085_v59  ;;  %v2730_v31 = vshll.u32 %v2379_v36, 16  ;;  %v2734_v44 = vshrl.u32 %v2379_v36, 16  ;;  %v4804_v36 = vadd.f32 %v7696_v5, %v7691_v18 }
 0x296   : > { %3855 = vrot.lane.b32.xlu0 %v3792_v61, %s5665_s16  ;;  %v7850_v6 = vpop.f32.mrf.mxu3  ;;  %v4796_v61 = vadd.f32 %v7485_v14, %v7476_v48  ;;  %v2173_v48 = vld [vmem:[#allocation2 + $0xc0] sm:$0xf] }
 0x297   : > { %3100 = vrot.lane.b32.xlu1 %v3036_v41, %s5664_s13  ;;  %v2732_v43 = vrot.slane %v2730_v31, 5  ;;  %v2736_v26 = vrot.slane %v2734_v44, 4  ;;  %s5666_s13 = smov 4   ;;  %v4818_v41 = vpop.f32.mrf.mxu2  ;;  %v4893_v38 = vadd.f32 %v7714_v45, %v4804_v36 }
 0x298   : > { %v7832_v1 = vpop.permute.xlu0 %2076  ;;  %v4885_v59 = vadd.f32 %v7501_v29, %v4796_v61  ;;  %v4883_v29 = vadd.f32 %v7468_v22, %v7342_v11  ;;  %v4801_v11 = vadd.f32 %v7657_v55, %v7666_v50  ;;  %v4819_v58 = vadd.f32 %v4818_v41, %v4729_v54 }
 0x299   : > { %v2073_v63 = vpop.permute.xlu1 %2072  ;;  %v2737_v40 = vor.u32 %v2736_v26, %v2732_v43  ;;  %v2733_v0 = vsel %vm5830_vm13, %v2728_v25, %v2732_v43  ;;  %v4888_v26 = vadd.f32 %v7651_v13, %v7515_v33 }
 0x29a   : > { %2140 = vst.msk [vmem:[#allocation3 + $0x15c] sm:$0xf] %vm2110_vm6, %v2073_v63  ;;  %3853 = vrot.lane.b32.xlu2 %v3782_v35, %s5665_s16  ;;  %v5402_v35 = vld [vmem:[#allocation3 + $0xfc] sm:$0xf0]  ;;  %v4811_v63 = vadd.f32 %v7793_v9, %v7788_v27  ;;  %v4890_v45 = vadd.f32 %v7686_v23, %v4801_v11  ;;  %v4809_v9 = vadd.f32 %v7763_v28, %v7760_v2 }
 0x29b   : > { %2828 = vst.msk [vmem:[#allocation3 + $0x154] sm:$0xf] %vm616_vm2, %v2733_v0  ;;  %v2738_v56 = vrot.slane %v2737_v40, 4  ;;  %v7878_v22 = vpop.f32.mrf.mxu1 }
 0x29c   : > { %v3280_v51 = vpop.permute.xlu2 %3279  ;;  %v4900_v27 = vadd.f32 %v7799_v42, %v4811_v63  ;;  %v4898_v33 = vadd.f32 %v7773_v34, %v4809_v9 }
 0x29d   : > { %v2743_v46 = vsel %vm5830_vm13, %v2738_v56, %v2742_v47 }
 0x29e   : > { %5021 = vrot.lane.b32.xlu0 %v4878_v10, %s5666_s13  ;;  %2829 = vst.msk [vmem:[#allocation3 + $0x160] sm:$0xf] %vm616_vm2, %v2743_v46  ;;  %v4907_v14 = vpop.f32.mrf.mxu3 }
 0x29f   : > { %3295 = vrot.lane.b32.xlu1 %v3200_v37, %s5663_s12  ;;  %v4820_v5 = vpop.f32.mrf.mxu2  ;;  %v4908_v28 = vadd.f32 %v4907_v14, %v4819_v58  ;;  %v2383_v14 = vld [vmem:[#allocation2 + $0xc8] sm:$0x1] }
 0x2a0   : > { %v2248_v53 = vpop.permute.xlu0 %2247 }
 0x2a1   : > { %2324 = vst.msk [vmem:[#allocation3 + $0xf0] sm:$0xf] %vm2303_vm7, %v2248_v53  ;;  %v3834_v12 = vpop.permute.xlu1 %3833 }
 0x2a2   : > { %3909 = vst.msk [vmem:[#allocation3 + $0xf4] sm:$0xf] %vm2303_vm7, %v3834_v12  ;;  %2269 = vrot.lane.b32.xlu2 %v2174_v57, %s5665_s16 }
 0x2a3   : > { %v4734_v23 = vpop.f32.mrf.mxu1 }
 0x2a4   : > { %v2252_v21 = vpop.permute.xlu2 %2251 }
 0x2a5   : > { %2326 = vst.msk [vmem:[#allocation3 + $0x108] sm:$0xf] %vm2303_vm7, %v2252_v21 }
 0x2a6   : > { %5027 = vrot.lane.b32.xlu0 %v4885_v59, %s5666_s13  ;;  %v7885_v60 = vpop.f32.mrf.mxu3 }
 0x2a7   : > { %2267 = vrot.lane.b32.xlu1 %v2173_v48, %s5665_s16 }
 0x2a8   : > { %v3087_v16 = vpop.permute.xlu0 %3086  ;;  %v5400_v55 = vld [vmem:[#allocation3 + $0xf0] sm:$0xf] }
 0x2a9   : > { %3159 = vst.msk [vmem:[#allocation3 + $0x118] sm:$0xf] %vm1770_vm4, %v3087_v16  ;;  %v2250_v7 = vpop.permute.xlu1 %2249  ;;  %v5592_v31 = vld [vmem:[#allocation3 + $0xf4] sm:$0xf] }
 0x2aa   : > { %3352 = vst.msk [vmem:[#allocation3 + $0x118] sm:$0xf] %vm2110_vm6, %v3280_v51  ;;  %v5405_v44 = vor.u32 %v5592_v31, %v5402_v35  ;;  %5025 = vrot.lane.b32.xlu2 %v4883_v29, %s5666_s13  ;;  %v4814_v51 = vadd.f32 %v7808_v15, %v7810_v30  ;;  %v4821_v15 = vadd.f32 %v4820_v5, %v7878_v22  ;;  %v2764_v29 = vshll.u32 %v2383_v14, 16 }
 0x2ab   : > { %2325 = vst.msk [vmem:[#allocation3 + $0xfc] sm:$0xf] %vm2303_vm7, %v2250_v7  ;;  %v4736_v34 = vpop.f32.mrf.mxu1 }
 0x2ac   : > { %4837 = vmatmul.bf16.gmra.mxu2 %v5405_v44  ;;  %v3091_v18 = vpop.permute.xlu2 %3090  ;;  %v5412_v56 = vld [vmem:[#allocation3 + $0x108] sm:$0xf]  ;;  %v4903_v46 = vadd.f32 %v7823_v3, %v4814_v51  ;;  %v2382_v3 = vld [vmem:[#allocation2 + $0xc4] sm:$0xf]  ;;  %v4910_v8 = vadd.f32 %v7885_v60, %v4821_v15 }
 0x2ad   : > { %3161 = vst.msk [vmem:[#allocation3 + $0x130] sm:$0xf] %vm1770_vm4, %v3091_v18  ;;  %v2754_v36 = vshll.u32 %v2382_v3, 16  ;;  %v2758_v16 = vshrl.u32 %v2382_v3, 16 }
 0x2ae   : > { %5033 = vrot.lane.b32.xlu0 %v4893_v38, %s5666_s13  ;;  %v4912_v40 = vpop.f32.mrf.mxu3  ;;  %v2766_v38 = vrot.slane %v2764_v29, 5 }
 0x2af   : > { %5023 = vrot.lane.b32.xlu1 %v4880_v4, %s5666_s13  ;;  %v7927_v31 = vrot.slane %v2754_v36, 5  ;;  %v2760_v35 = vrot.slane %v2758_v16, 4 }
 0x2b0   : > { %v3838_v24 = vpop.permute.xlu0 %3837 }
 0x2b1   : > { %v1737_v43 = vpop.permute.xlu1 %1736  ;;  %v2761_v4 = vor.u32 %v2760_v35, %v7927_v31 }
 0x2b2   : > { %1802 = vst.msk [vmem:[#allocation3 + $0x174] sm:$0xf] %vm1770_vm4, %v1737_v43  ;;  %v5593_v50 = vld [vmem:[#allocation3 + $0xf8] sm:$0xf0]  ;;  %5031 = vrot.lane.b32.xlu2 %v4890_v45, %s5666_s13 }
 0x2b3   : > { %2142 = vst.msk [vmem:[#allocation3 + $0x174] sm:$0xf] %vm2110_vm6, %v7832_v1  ;;  %v5401_v39 = vor.u32 %v5593_v50, %v5400_v55  ;;  %v4806_v1 = vadd.f32 %v7738_v32, %v7729_v62  ;;  %v4816_v62 = vadd.f32 %v7837_v49, %v7840_v20  ;;  %v2762_v22 = vrot.slane %v2761_v4, 4  ;;  %v4739_v43 = vpop.f32.mrf.mxu1 }
 0x2b4   : > { %v3842_v37 = vpop.permute.xlu2 %3841 }
 0x2b5   : > { %4748 = vmatmul.bf16.gmra.mxu1 %v5401_v39  ;;  %v4895_v2 = vadd.f32 %v7754_v19, %v4806_v1  ;;  %v4905_v61 = vadd.f32 %v7850_v6, %v4816_v62  ;;  %v2767_v18 = vsel %vm5830_vm13, %v2762_v22, %v2766_v38  ;;  %v2381_v62 = vld [vmem:[#allocation2 + $0xc0] sm:$0xf] }
 0x2b6   : > { %5039 = vrot.lane.b32.xlu0 %v4900_v27, %s5666_s13  ;;  %v4914_v20 = vpop.f32.mrf.mxu3  ;;  %2831 = vst.msk [vmem:[#allocation3 + $0x178] sm:$0xf] %vm616_vm2, %v2767_v18  ;;  %v2748_v51 = vshll.u32 %v2381_v62, 16 }
 0x2b7   : > { %v4823_v25 = vpop.f32.mrf.mxu2  ;;  %5029 = vrot.lane.b32.xlu1 %v4888_v26, %s5666_s13 }
 0x2b8   : > { %v2254_v10 = vpop.permute.xlu0 %2253  ;;  %v4824_v57 = vadd.f32 %v4823_v25, %v4734_v23 }
 0x2b9   : > { %2327 = vst.msk [vmem:[#allocation3 + $0x114] sm:$0xf] %vm2303_vm7, %v2254_v10  ;;  %v3278_v13 = vpop.permute.xlu1 %3277 }
 0x2ba   : > { %3351 = vst.msk [vmem:[#allocation3 + $0x10c] sm:$0xf] %vm2110_vm6, %v3278_v13  ;;  %5037 = vrot.lane.b32.xlu2 %v4898_v33, %s5666_s13  ;;  %v4913_v6 = vadd.f32 %v4912_v40, %v4824_v57 }
 0x2bb   : > { %3911 = vst.msk [vmem:[#allocation3 + $0x10c] sm:$0xf] %vm2303_vm7, %v3838_v24  ;;  %v4741_v40 = vpop.f32.mrf.mxu1 }
 0x2bc   : > { %v2258_v32 = vpop.permute.xlu2 %2257 }
 0x2bd   : > { %2329 = vst.msk [vmem:[#allocation3 + $0x12c] sm:$0xf] %vm2303_vm7, %v2258_v32 }
 0x2be   : > { %5045 = vrot.lane.b32.xlu0 %v4908_v28, %s5666_s13  ;;  %v4917_v39 = vpop.f32.mrf.mxu3 }
 0x2bf   : > { %v4825_v42 = vpop.f32.mrf.mxu2  ;;  %5035 = vrot.lane.b32.xlu1 %v4895_v2, %s5666_s13 }
 0x2c0   : > { %v4826_v0 = vadd.f32 %v4825_v42, %v4736_v34  ;;  %v3282_v47 = vpop.permute.xlu0 %3281  ;;  %v5596_v19 = vld [vmem:[#allocation3 + $0x110] sm:$0xf0]  ;;  %v2745_v34 = vshrl.u32 %v2381_v62, 16 }
 0x2c1   : > { %v3840_v53 = vpop.permute.xlu1 %3839  ;;  %v5413_v49 = vor.u32 %v5596_v19, %v5412_v56 }
 0x2c2   : > { %3912 = vst.msk [vmem:[#allocation3 + $0x118] sm:$0xf] %vm2303_vm7, %v3840_v53  ;;  %5043 = vrot.lane.b32.xlu2 %v4905_v61, %s5666_s13  ;;  %v4915_v12 = vadd.f32 %v4914_v20, %v4826_v0  ;;  %v5595_v41 = vld [vmem:[#allocation3 + $0x10c] sm:$0xf]  ;;  %v2747_v0 = vrot.slane %v2745_v34, 4 }
 0x2c4   : > { %v3286_v54 = vpop.permute.xlu2 %3285  ;;  %v5599_v1 = vld [vmem:[#allocation3 + $0x128] sm:$0xf0] }
 0x2c5   : > { %4753 = vmatmul.bf16.gmra.mxu1 %v5413_v49 }
 0x2c6   : > { %5051 = vrot.lane.b32.xlu0 %v4915_v12, %s5666_s13  ;;  %v4919_v2 = vpop.f32.mrf.mxu3 }
 0x2c7   : > { %5041 = vrot.lane.b32.xlu1 %v4903_v46, %s5666_s13 }
 0x2c8   : > { %v3844_v30 = vpop.permute.xlu0 %3843 }
 0x2c9   : > { %v3089_v59 = vpop.permute.xlu1 %3088  ;;  %v5414_v21 = vld [vmem:[#allocation3 + $0x114] sm:$0xf0] }
 0x2ca   : > { %3160 = vst.msk [vmem:[#allocation3 + $0x124] sm:$0xf] %vm1770_vm4, %v3089_v59  ;;  %v5417_v48 = vor.u32 %v5595_v41, %v5414_v21  ;;  %5049 = vrot.lane.b32.xlu2 %v4913_v6, %s5666_s13  ;;  %v3967_v6 = vld [vmem:[#allocation2 + $0xd0] sm:$0xf]  ;;  %v3968_v59 = vld [vmem:[#allocation2 + $0xd4] sm:$0x1] }
 0x2cb   : > { %3353 = vst.msk [vmem:[#allocation3 + $0x124] sm:$0xf] %vm2110_vm6, %v3282_v47  ;;  %v2750_v47 = vrot.slane %v2748_v51, 5  ;;  %v4124_v21 = vrot.slane %v3967_v6, 5 }
 0x2cc   : > { %3913 = vst.msk [vmem:[#allocation3 + $0x124] sm:$0xf] %vm2303_vm7, %v3842_v37  ;;  %4842 = vmatmul.bf16.gmra.mxu2 %v5417_v48  ;;  %v3848_v7 = vpop.permute.xlu2 %3847  ;;  %v4127_v48 = vrot.slane %v3968_v59, 5 }
 0x2cd   : > { %v2751_v19 = vor.u32 %v2750_v47, %v2747_v0 }
 0x2ce   : > { %v4922_v3 = vpop.f32.mrf.mxu3 }
 0x2cf   : > { %5047 = vrot.lane.b32.xlu1 %v4910_v8, %s5666_s13  ;;  %v2752_v61 = vrot.slane %v2751_v19, 4 }
 0x2d0   : > { %v3093_v44 = vpop.permute.xlu0 %3092 }
 0x2d1   : > { %3162 = vst.msk [vmem:[#allocation3 + $0x13c] sm:$0xf] %vm1770_vm4, %v3093_v44  ;;  %v3284_v11 = vpop.permute.xlu1 %3283  ;;  %v2757_v20 = vsel %vm5830_vm13, %v2752_v61, %v7927_v31 }
 0x2d2   : > { %3355 = vst.msk [vmem:[#allocation3 + $0x13c] sm:$0xf] %vm2110_vm6, %v3286_v54 }
 0x2d3   : > { %3354 = vst.msk [vmem:[#allocation3 + $0x130] sm:$0xf] %vm2110_vm6, %v3284_v11  ;;  %v5598_v60 = vld [vmem:[#allocation3 + $0x124] sm:$0xf] }
 0x2d4   : > { %3914 = vst.msk [vmem:[#allocation3 + $0x130] sm:$0xf] %vm2303_vm7, %v3844_v30  ;;  %v3097_v5 = vpop.permute.xlu2 %3096  ;;  %v3966_v30 = vld [vmem:[#allocation2 + $0xcc] sm:$0xe] }
 0x2d5   : > { %3164 = vst.msk [vmem:[#allocation3 + $0x154] sm:$0xf] %vm1770_vm4, %v3097_v5  ;;  %v5277_v41 = vrot.slane %v3966_v30, 9 }
 0x2d6   : > { %2830 = vst.msk [vmem:[#allocation3 + $0x16c] sm:$0xf] %vm616_vm2, %v2757_v20 }
 0x2d7   : > { %v4125_v29 = vsel %vm5804_vm8, %v5277_v41, %v4124_v21 }
 0x2d8   : > { %v3288_v63 = vpop.permute.xlu0 %3287  ;;  %4191 = vst.msk [vmem:[#allocation3 + $0x170] sm:$0xf] %vm616_vm2, %v4125_v29 }
 0x2d9   : > { %v2256_v24 = vpop.permute.xlu1 %2255 }
 0x2da   : > { %2328 = vst.msk [vmem:[#allocation3 + $0x120] sm:$0xf] %vm2303_vm7, %v2256_v24 }
 0x2db   : > { %v5426_v45 = vld [vmem:[#allocation3 + $0x12c] sm:$0xf0] }
 0x2dc   : > { %v5429_v55 = vor.u32 %v5598_v60, %v5426_v45  ;;  %v3292_v50 = vpop.permute.xlu2 %3291 }
 0x2de   : > { %4847 = vmatmul.bf16.gmra.mxu2 %v5429_v55 }
 0x2df   : > { %v4828_v26 = vpop.f32.mrf.mxu2  ;;  %v5468_v24 = vld [vmem:[#allocation3 + $0x170] sm:$0xf] }
 0x2e0   : > { %v4829_v27 = vadd.f32 %v4828_v26, %v4739_v43  ;;  %v2260_v9 = vpop.permute.xlu0 %2259 }
 0x2e1   : > { %2330 = vst.msk [vmem:[#allocation3 + $0x138] sm:$0xf] %vm2303_vm7, %v2260_v9  ;;  %v3095_v37 = vpop.permute.xlu1 %3094  ;;  %v5424_v25 = vld [vmem:[#allocation3 + $0x120] sm:$0xf] }
 0x2e2   : > { %v4918_v23 = vadd.f32 %v4917_v39, %v4829_v27  ;;  %3163 = vst.msk [vmem:[#allocation3 + $0x148] sm:$0xf] %vm1770_vm4, %v3095_v37  ;;  %v5425_v58 = vor.u32 %v5599_v1, %v5424_v25 }
 0x2e3   : > { %3356 = vst.msk [vmem:[#allocation3 + $0x148] sm:$0xf] %vm2110_vm6, %v3288_v63  ;;  %v4924_v63 = vpop.f32.mrf.mxu3 }
 0x2e4   : > { %5053 = vrot.lane.b32.xlu1 %v4918_v23, %s5666_s13  ;;  %3916 = vst.msk [vmem:[#allocation3 + $0x148] sm:$0xf] %vm2303_vm7, %v3848_v7  ;;  %4758 = vmatmul.bf16.gmra.mxu1 %v5425_v58  ;;  %v2264_v10 = vpop.permute.xlu2 %2263  ;;  %v4126_v7 = vrot.slane %v4124_v21, 4 }
 0x2e5   : > { %2332 = vst.msk [vmem:[#allocation3 + $0x150] sm:$0xf] %vm2303_vm7, %v2264_v10 }
 0x2e6   : > { %v4128_v44 = vsel %vm5804_vm8, %v4126_v7, %v4127_v48 }
 0x2e7   : > { %v4830_v33 = vpop.f32.mrf.mxu2  ;;  %4192 = vst.msk [vmem:[#allocation3 + $0x17c] sm:$0xf] %vm616_vm2, %v4128_v44 }
 0x2e8   : > { %v4831_v13 = vadd.f32 %v4830_v33, %v4741_v40  ;;  %v3099_v28 = vpop.permute.xlu0 %3098  ;;  %v5436_v17 = vld [vmem:[#allocation3 + $0x138] sm:$0xf] }
 0x2e9   : > { %3165 = vst.msk [vmem:[#allocation3 + $0x160] sm:$0xf] %vm1770_vm4, %v3099_v28  ;;  %v3846_v42 = vpop.permute.xlu1 %3845 }
 0x2ea   : > { %v4920_v32 = vadd.f32 %v4919_v2, %v4831_v13  ;;  %3358 = vst.msk [vmem:[#allocation3 + $0x160] sm:$0xf] %vm2110_vm6, %v3292_v50 }
 0x2eb   : > { %3915 = vst.msk [vmem:[#allocation3 + $0x13c] sm:$0xf] %vm2303_vm7, %v3846_v42  ;;  %v5438_v12 = vld [vmem:[#allocation3 + $0x144] sm:$0xf0] }
 0x2ec   : > { %5055 = vrot.lane.b32.xlu2 %v4920_v32, %s5666_s13  ;;  %v3103_v56 = vpop.permute.xlu2 %3102  ;;  %v5448_v27 = vld [vmem:[#allocation3 + $0x150] sm:$0xf] }
 0x2ed   : > { %3167 = vst.msk [vmem:[#allocation3 + $0x178] sm:$0xf] %vm1770_vm4, %v3103_v56 }
 0x2ee   : > { %v5609_v45 = vld [vmem:[#allocation3 + $0x178] sm:$0xf0] }
 0x2ef   : > { %v4833_v15 = vpop.f32.mrf.mxu2  ;;  %v5469_v55 = vor.u32 %v5609_v45, %v5468_v24 }
 0x2f0   : > { %v3850_v53 = vpop.permute.xlu0 %3849 }
 0x2f1   : > { %v2262_v49 = vpop.permute.xlu1 %2261  ;;  %5557 = vmatmul.msk.bf16.gmra.mxu3 %vm4641_vm3, %v5469_v55 }
 0x2f2   : > { %2331 = vst.msk [vmem:[#allocation3 + $0x144] sm:$0xf] %vm2303_vm7, %v2262_v49  ;;  %v5601_v46 = vld [vmem:[#allocation3 + $0x13c] sm:$0xf] }
 0x2f3   : > { %v5441_v57 = vor.u32 %v5601_v46, %v5438_v12  ;;  %v4927_v46 = vpop.f32.mrf.mxu3 }
 0x2f4   : > { %v3854_v54 = vpop.permute.xlu2 %3853 }
 0x2f5   : > { %4852 = vmatmul.bf16.gmra.mxu2 %v5441_v57 }
 0x2f7   : > { %v4835_v11 = vpop.f32.mrf.mxu2 }
 0x2f8   : > { %v2266_v14 = vpop.permute.xlu0 %2265 }
 0x2f9   : > { %2333 = vst.msk [vmem:[#allocation3 + $0x15c] sm:$0xf] %vm2303_vm7, %v2266_v14  ;;  %v3290_v8 = vpop.permute.xlu1 %3289  ;;  %v4744_v36 = vpop.f32.mrf.mxu1  ;;  %v5602_v16 = vld [vmem:[#allocation3 + $0x140] sm:$0xf0] }
 0x2fa   : > { %3357 = vst.msk [vmem:[#allocation3 + $0x154] sm:$0xf] %vm2110_vm6, %v3290_v8  ;;  %v4834_v31 = vadd.f32 %v4833_v15, %v4744_v36  ;;  %v5437_v35 = vor.u32 %v5602_v16, %v5436_v17 }
 0x2fb   : > { %3917 = vst.msk [vmem:[#allocation3 + $0x154] sm:$0xf] %vm2303_vm7, %v3850_v53  ;;  %v4929_v21 = vpop.f32.mrf.mxu3 }
 0x2fc   : > { %v4923_v4 = vadd.f32 %v4922_v3, %v4834_v31  ;;  %4763 = vmatmul.bf16.gmra.mxu1 %v5437_v35  ;;  %v2270_v38 = vpop.permute.xlu2 %2269 }
 0x2fd   : > { %2335 = vst.msk [vmem:[#allocation3 + $0x174] sm:$0xf] %vm2303_vm7, %v2270_v38 }
 0x2fe   : > { %5057 = vrot.lane.b32.xlu0 %v4923_v4, %s5666_s13 }
 0x300   : > { %v3294_v22 = vpop.permute.xlu0 %3293  ;;  %v5605_v50 = vld [vmem:[#allocation3 + $0x158] sm:$0xf0] }
 0x301   : > { %v3852_v18 = vpop.permute.xlu1 %3851  ;;  %v4746_v5 = vpop.f32.mrf.mxu1  ;;  %v5449_v37 = vor.u32 %v5605_v50, %v5448_v27 }
 0x302   : > { %3918 = vst.msk [vmem:[#allocation3 + $0x160] sm:$0xf] %vm2303_vm7, %v3852_v18  ;;  %v4836_v52 = vadd.f32 %v4835_v11, %v4746_v5  ;;  %v5604_v9 = vld [vmem:[#allocation3 + $0x154] sm:$0xf] }
 0x303   : > { %v4932_v17 = vpop.f32.mrf.mxu3 }
 0x304   : > { %v4925_v60 = vadd.f32 %v4924_v63, %v4836_v52  ;;  %v5026_v43 = vpop.permute.xlu2 %5025  ;;  %v5608_v0 = vld [vmem:[#allocation3 + $0x170] sm:$0xf0] }
 0x305   : > { %5120 = vst.msk [vmem:[%s5731_s11 + $0x10] sm:$0xff] %vm5117_vm1, %v5026_v43 }
 0x306   : > { %5059 = vrot.lane.b32.xlu1 %v4925_v60, %s5666_s13 }
 0x308   : > { %v3856_v39 = vpop.permute.xlu0 %3855 }
 0x309   : > { %v3101_v26 = vpop.permute.xlu1 %3100  ;;  %v5450_v23 = vld [vmem:[#allocation3 + $0x15c] sm:$0xf0] }
 0x30a   : > { %3166 = vst.msk [vmem:[#allocation3 + $0x16c] sm:$0xf] %vm1770_vm4, %v3101_v26  ;;  %v5453_v25 = vor.u32 %v5604_v9, %v5450_v23 }
 0x30b   : > { %3359 = vst.msk [vmem:[#allocation3 + $0x16c] sm:$0xf] %vm2110_vm6, %v3294_v22  ;;  %v4934_v31 = vpop.f32.mrf.mxu3 }
 0x30c   : > { %3919 = vst.msk [vmem:[#allocation3 + $0x16c] sm:$0xf] %vm2303_vm7, %v3854_v54  ;;  %4768 = vmatmul.bf16.gmra.mxu1 %v5449_v37  ;;  %4857 = vmatmul.bf16.gmra.mxu2 %v5453_v25  ;;  %v5032_v1 = vpop.permute.xlu2 %5031 }
 0x30d   : > { %5123 = vst.msk [vmem:[%s5731_s11 + $0x28] sm:$0xff] %vm5117_vm1, %v5032_v1 }
 0x310   : > { %v5022_v58 = vpop.permute.xlu0 %5021 }
 0x311   : > { %5118 = vst.msk [vmem:[%s5731_s11] sm:$0xff] %vm5117_vm1, %v5022_v58  ;;  %v3296_v10 = vpop.permute.xlu1 %3295 }
 0x312   : > { %3360 = vst.msk [vmem:[#allocation3 + $0x178] sm:$0xf] %vm2110_vm6, %v3296_v10 }
 0x313   : > { %3920 = vst.msk [vmem:[#allocation3 + $0x178] sm:$0xf] %vm2303_vm7, %v3856_v39  ;;  %v5607_v13 = vld [vmem:[#allocation3 + $0x16c] sm:$0xf]  ;;  %v4937_v11 = vpop.f32.mrf.mxu3 }
 0x314   : > { %v5038_v40 = vpop.permute.xlu2 %5037 }
 0x315   : > { %5126 = vst.msk [vmem:[%s5731_s11 + $0x40] sm:$0xff] %vm5117_vm1, %v5038_v40 }
 0x318   : > { %v5028_v33 = vpop.permute.xlu0 %5027 }
 0x319   : > { %v2268_v2 = vpop.permute.xlu1 %2267  ;;  %5121 = vst.msk [vmem:[%s5731_s11 + $0x18] sm:$0xff] %vm5117_vm1, %v5028_v33 }
 0x31a   : > { %2334 = vst.msk [vmem:[#allocation3 + $0x168] sm:$0xf] %vm2303_vm7, %v2268_v2  ;;  %v5462_v28 = vld [vmem:[#allocation3 + $0x174] sm:$0xf0] }
 0x31b   : > { %v5465_v62 = vor.u32 %v5607_v13, %v5462_v28  ;;  %v4939_v45 = vpop.f32.mrf.mxu3 }
 0x31c   : > { %v5044_v32 = vpop.permute.xlu2 %5043 }
 0x31d   : > { %4862 = vmatmul.bf16.gmra.mxu2 %v5465_v62  ;;  %5129 = vst.msk [vmem:[%s5731_s11 + $0x58] sm:$0xff] %vm5117_vm1, %v5044_v32 }
 0x320   : > { %v5034_v42 = vpop.permute.xlu0 %5033 }
 0x321   : > { %v5024_v34 = vpop.permute.xlu1 %5023  ;;  %5124 = vst.msk [vmem:[%s5731_s11 + $0x30] sm:$0xff] %vm5117_vm1, %v5034_v42  ;;  %v5460_v51 = vld [vmem:[#allocation3 + $0x168] sm:$0xf] }
 0x322   : > { %5119 = vst.msk [vmem:[%s5731_s11 + $0x8] sm:$0xff] %vm5117_vm1, %v5024_v34  ;;  %v5461_v47 = vor.u32 %v5608_v0, %v5460_v51 }
 0x323   : > { %v4942_v26 = vpop.f32.mrf.mxu3 }
 0x324   : > { %4773 = vmatmul.bf16.gmra.mxu1 %v5461_v47  ;;  %v5050_v56 = vpop.permute.xlu2 %5049 }
 0x325   : > { %5132 = vst.msk [vmem:[%s5731_s11 + $0x70] sm:$0xff] %vm5117_vm1, %v5050_v56 }
 0x328   : > { %v5040_v19 = vpop.permute.xlu0 %5039 }
 0x329   : > { %v5030_v61 = vpop.permute.xlu1 %5029  ;;  %5127 = vst.msk [vmem:[%s5731_s11 + $0x48] sm:$0xff] %vm5117_vm1, %v5040_v19 }
 0x32a   : > { %5122 = vst.msk [vmem:[%s5731_s11 + $0x20] sm:$0xff] %vm5117_vm1, %v5030_v61 }
 0x32b   : > { %v4944_v58 = vpop.f32.mrf.mxu3 }
 0x32f   : > { %v4838_v53 = vpop.f32.mrf.mxu2 }
 0x330   : > { %v5046_v49 = vpop.permute.xlu0 %5045 }
 0x331   : > { %v5036_v20 = vpop.permute.xlu1 %5035  ;;  %5130 = vst.msk [vmem:[%s5731_s11 + $0x60] sm:$0xff] %vm5117_vm1, %v5046_v49 }
 0x332   : > { %5125 = vst.msk [vmem:[%s5731_s11 + $0x38] sm:$0xff] %vm5117_vm1, %v5036_v20  ;;  %v4749_v12 = vpop.f32.mrf.mxu1 }
 0x333   : > { %v4839_v57 = vadd.f32 %v4838_v53, %v4749_v12  ;;  %v4947_v33 = vpop.f32.mrf.mxu3 }
 0x335   : > { %v4928_v54 = vadd.f32 %v4927_v46, %v4839_v57 }
 0x337   : > { %5061 = vrot.lane.b32.xlu2 %v4928_v54, %s5666_s13  ;;  %v4840_v6 = vpop.f32.mrf.mxu2 }
 0x338   : > { %v5052_v15 = vpop.permute.xlu0 %5051 }
 0x339   : > { %v5042_v30 = vpop.permute.xlu1 %5041  ;;  %5133 = vst.msk [vmem:[%s5731_s11 + $0x78] sm:$0xff] %vm5117_vm1, %v5052_v15 }
 0x33a   : > { %5128 = vst.msk [vmem:[%s5731_s11 + $0x50] sm:$0xff] %vm5117_vm1, %v5042_v30  ;;  %v4751_v59 = vpop.f32.mrf.mxu1 }
 0x33b   : > { %v4841_v41 = vadd.f32 %v4840_v6, %v4751_v59  ;;  %v4949_v51 = vpop.f32.mrf.mxu3 }
 0x33d   : > { %v4930_v48 = vadd.f32 %v4929_v21, %v4841_v41 }
 0x33f   : > { %5063 = vrot.lane.b32.xlu0 %v4930_v48, %s5666_s13 }
 0x341   : > { %v5048_v3 = vpop.permute.xlu1 %5047 }
 0x342   : > { %5131 = vst.msk [vmem:[%s5731_s11 + $0x68] sm:$0xff] %vm5117_vm1, %v5048_v3  ;;  %v4754_v8 = vpop.f32.mrf.mxu1 }
 0x346   : > { %v5056_v14 = vpop.permute.xlu2 %5055 }
 0x347   : > { %5135 = vst.msk [vmem:[%s5731_s11 + $0x88] sm:$0xff] %vm5117_vm1, %v5056_v14 }
 0x34a   : > { %v4756_v35 = vpop.f32.mrf.mxu1 }
 0x34f   : > { %v4843_v36 = vpop.f32.mrf.mxu2 }
 0x350   : > { %v4844_v16 = vadd.f32 %v4843_v36, %v4754_v8 }
 0x352   : > { %v4933_v29 = vadd.f32 %v4932_v17, %v4844_v16 }
 0x354   : > { %5065 = vrot.lane.b32.xlu1 %v4933_v29, %s5666_s13 }
 0x356   : > { %v5054_v7 = vpop.permute.xlu1 %5053 }
 0x357   : > { %5134 = vst.msk [vmem:[%s5731_s11 + $0x80] sm:$0xff] %vm5117_vm1, %v5054_v7  ;;  %v4845_v44 = vpop.f32.mrf.mxu2 }
 0x358   : > { %v4846_v4 = vadd.f32 %v4845_v44, %v4756_v35 }
 0x35a   : > { %v4935_v38 = vadd.f32 %v4934_v31, %v4846_v4 }
 0x35c   : > { %5067 = vrot.lane.b32.xlu2 %v4935_v38, %s5666_s13 }
 0x361   : > { %v4848_v22 = vpop.f32.mrf.mxu2  ;;  %v4759_v18 = vpop.f32.mrf.mxu1 }
 0x362   : > { %v4849_v5 = vadd.f32 %v4848_v22, %v4759_v18 }
 0x364   : > { %v4938_v52 = vadd.f32 %v4937_v11, %v4849_v5 }
 0x366   : > { %5069 = vrot.lane.b32.xlu0 %v4938_v52, %s5666_s13 }
 0x369   : > { %v4850_v63 = vpop.f32.mrf.mxu2  ;;  %v4761_v24 = vpop.f32.mrf.mxu1 }
 0x36a   : > { %v4851_v60 = vadd.f32 %v4850_v63, %v4761_v24 }
 0x36c   : > { %v4940_v43 = vadd.f32 %v4939_v45, %v4851_v60 }
 0x36e   : > { %5071 = vrot.lane.b32.xlu1 %v4940_v43, %s5666_s13 }
 0x370   : > { %v5058_v55 = vpop.permute.xlu0 %5057 }
 0x371   : > { %5136 = vst.msk [vmem:[%s5731_s11 + $0x90] sm:$0xff] %vm5117_vm1, %v5058_v55 }
 0x374   : > { %v4952_v56 = vpop.f32.mrf.mxu3 }
 0x378   : > { %v4853_v50 = vpop.f32.mrf.mxu2  ;;  %v5060_v39 = vpop.permute.xlu1 %5059 }
 0x379   : > { %5137 = vst.msk [vmem:[%s5731_s11 + $0x98] sm:$0xff] %vm5117_vm1, %v5060_v39  ;;  %v4764_v27 = vpop.f32.mrf.mxu1 }
 0x37a   : > { %v4854_v9 = vadd.f32 %v4853_v50, %v4764_v27 }
 0x37c   : > { %v4943_v23 = vadd.f32 %v4942_v26, %v4854_v9  ;;  %v4954_v12 = vpop.f32.mrf.mxu3 }
 0x37e   : > { %5073 = vrot.lane.b32.xlu2 %v4943_v23, %s5666_s13 }
 0x380   : > { %v4855_v37 = vpop.f32.mrf.mxu2 }
 0x381   : > { %v4766_v25 = vpop.f32.mrf.mxu1 }
 0x382   : > { %v4856_v1 = vadd.f32 %v4855_v37, %v4766_v25 }
 0x384   : > { %v4945_v10 = vadd.f32 %v4944_v58, %v4856_v1 }
 0x386   : > { %5075 = vrot.lane.b32.xlu0 %v4945_v10, %s5666_s13 }
 0x389   : > { %v4769_v40 = vpop.f32.mrf.mxu1 }
 0x38f   : > { %v4858_v13 = vpop.f32.mrf.mxu2 }
 0x390   : > { %v4859_v2 = vadd.f32 %v4858_v13, %v4769_v40 }
 0x391   : > { %v5062_v28 = vpop.permute.xlu2 %5061  ;;  %v4771_v32 = vpop.f32.mrf.mxu1 }
 0x392   : > { %v4948_v62 = vadd.f32 %v4947_v33, %v4859_v2  ;;  %5138 = vst.msk [vmem:[%s5731_s11 + $0xa0] sm:$0xff] %vm5117_vm1, %v5062_v28 }
 0x394   : > { %5077 = vrot.lane.b32.xlu1 %v4948_v62, %s5666_s13 }
 0x397   : > { %v4860_v42 = vpop.f32.mrf.mxu2 }
 0x398   : > { %v4861_v34 = vadd.f32 %v4860_v42, %v4771_v32 }
 0x39a   : > { %v4950_v0 = vadd.f32 %v4949_v51, %v4861_v34 }
 0x39c   : > { %5079 = vrot.lane.b32.xlu2 %v4950_v0, %s5666_s13 }
 0x3a0   : > { %v4863_v47 = vpop.f32.mrf.mxu2 }
 0x3a1   : > { %v4774_v19 = vpop.f32.mrf.mxu1 }
 0x3a2   : > { %v4864_v61 = vadd.f32 %v4863_v47, %v4774_v19 }
 0x3a4   : > { %v4953_v53 = vadd.f32 %v4952_v56, %v4864_v61 }
 0x3a6   : > { %5081 = vrot.lane.b32.xlu0 %v4953_v53, %s5666_s13 }
 0x3a8   : > { %v4865_v49 = vpop.f32.mrf.mxu2 }
 0x3a9   : > { %v4776_v20 = vpop.f32.mrf.mxu1 }
 0x3aa   : > { %v4866_v46 = vadd.f32 %v4865_v49, %v4776_v20 }
 0x3ac   : > { %v4955_v57 = vadd.f32 %v4954_v12, %v4866_v46 }
 0x3ae   : > { %5083 = vrot.lane.b32.xlu1 %v4955_v57, %s5666_s13 }
 0x3b1   : > { %v5064_v54 = vpop.permute.xlu0 %5063 }
 0x3b2   : > { %5139 = vst.msk [vmem:[%s5731_s11 + $0xa8] sm:$0xff] %vm5117_vm1, %v5064_v54 }
 0x3b6   : > { %v5068_v15 = vpop.permute.xlu2 %5067 }
 0x3b7   : > { %5141 = vst.msk [vmem:[%s5731_s11 + $0xb8] sm:$0xff] %vm5117_vm1, %v5068_v15 }
 0x3c6   : > { %v5066_v30 = vpop.permute.xlu1 %5065 }
 0x3c7   : > { %5140 = vst.msk [vmem:[%s5731_s11 + $0xb0] sm:$0xff] %vm5117_vm1, %v5066_v30 }
 0x3d8   : > { %v5070_v6 = vpop.permute.xlu0 %5069  ;;  %v5074_v59 = vpop.permute.xlu2 %5073 }
 0x3d9   : > { %5142 = vst.msk [vmem:[%s5731_s11 + $0xc0] sm:$0xff] %vm5117_vm1, %v5070_v6 }
 0x3da   : > { %5144 = vst.msk [vmem:[%s5731_s11 + $0xd0] sm:$0xff] %vm5117_vm1, %v5074_v59 }
 0x3e0   : > { %v5072_v41 = vpop.permute.xlu1 %5071 }
 0x3e1   : > { %5143 = vst.msk [vmem:[%s5731_s11 + $0xc8] sm:$0xff] %vm5117_vm1, %v5072_v41 }
 0x3f6   : > { %v5080_v21 = vpop.permute.xlu2 %5079 }
 0x3f7   : > { %5147 = vst.msk [vmem:[%s5731_s11 + $0xe8] sm:$0xff] %vm5117_vm1, %v5080_v21 }
 0x3f8   : > { %v5076_v48 = vpop.permute.xlu0 %5075 }
 0x3f9   : > { %5145 = vst.msk [vmem:[%s5731_s11 + $0xd8] sm:$0xff] %vm5117_vm1, %v5076_v48 }
 0x406   : > { %v5078_v3 = vpop.permute.xlu1 %5077 }
 0x407   : > { %5146 = vst.msk [vmem:[%s5731_s11 + $0xe0] sm:$0xff] %vm5117_vm1, %v5078_v3 }
 0x418   : > { %v5082_v14 = vpop.permute.xlu0 %5081 }
 0x419   : > { %5148 = vst.msk [vmem:[%s5731_s11 + $0xf0] sm:$0xff] %vm5117_vm1, %v5082_v14 }
 0x420   : > { %v5084_v17 = vpop.permute.xlu1 %5083 }
 0x421   : > { %5149 = vst.msk [vmem:[%s5731_s11 + $0xf8] sm:$0xff] %vm5117_vm1, %v5084_v17 }
 0x422 PF: > { %s16_s21 = sadd.s32 1, %s5660_s21  }
 0x423   : > { %p13_p4 = scmp.ge.s32.totalorder %s16_s21, 4  }
 0x425   :  { %15 = sbr.rel (!%p13_p4) target bundleno = 1 (0x1), region = 77 }

</bundles_post_ra>
